<compile_context>
chip_gen: v7x
topology: tpu7x:2x2x1
jax: 0.10.0
libtpu: 0.0.40
codegen_flags: <defaults>
</compile_context>

<pallas_src>
import math

import jax
import jax.numpy as jnp
import numpy as np
from jax.experimental import pallas as pl
from jax.experimental.pallas import tpu as pltpu

d_k = 64
d_v = 64
n_heads = 8
d_embedding = 512


def mha_kernel(q_ref, k_ref, v_ref, mask_ref,
               wq_ref, bq_ref, wk_ref, bk_ref, wv_ref, bv_ref,
               wo_ref, bo_ref, gamma_ref, beta_ref,
               out_ref, attnw_ref):
    q_in = q_ref[0]                       # (tq, E) f32 (kept f32 for residual / LN)
    k_in = k_ref[0]                       # (S,  E) f32
    v_in = v_ref[0]                       # (S,  E) f32
    masked = mask_ref[0] != 0             # (tq, S) bool, True = masked out

    q_bf = q_in.astype(jnp.bfloat16)
    k_bf = k_in.astype(jnp.bfloat16)
    v_bf = v_in.astype(jnp.bfloat16)

    # QKV projections: bf16 operands, f32 MXU accumulation.
    # 1/sqrt(d_k) is already folded into wq/bq by the wrapper.
    qp = jnp.dot(q_bf, wq_ref[...], preferred_element_type=jnp.float32) + bq_ref[...]
    kp = jnp.dot(k_bf, wk_ref[...], preferred_element_type=jnp.float32) + bk_ref[...]
    vp = jnp.dot(v_bf, wv_ref[...], preferred_element_type=jnp.float32) + bv_ref[...]

    qp_bf = qp.astype(jnp.bfloat16)
    kp_bf = kp.astype(jnp.bfloat16)
    vp_bf = vp.astype(jnp.bfloat16)

    # Per-head attention.  Only one (tq, S) score/weight matrix is live at a
    # time: each head's weights are written straight to attnw_ref, and only the
    # small (tq, d_v) context slab is carried to the fused output projection.
    ctx_heads = []
    for h in range(n_heads):                               # static unroll
        qh = qp_bf[:, h * d_k:(h + 1) * d_k]               # (tq, d_k)
        kh = kp_bf[:, h * d_k:(h + 1) * d_k]               # (S,  d_k)
        vh = vp_bf[:, h * d_v:(h + 1) * d_v]               # (S,  d_v)

        scores = jnp.dot(qh, kh.T, preferred_element_type=jnp.float32)  # (tq, S)
        scores = jnp.where(masked, jnp.float32(-1e9), scores)

        m = jnp.max(scores, axis=-1, keepdims=True)
        e = jnp.exp(scores - m)
        inv_l = pl.reciprocal(jnp.sum(e, axis=-1, keepdims=True), approx=True)
        w = e * inv_l                                      # (tq, S) softmax weights

        attnw_ref[0, h] = w                                # write now; w dies after P.V
        ctx_heads.append(jnp.dot(w.astype(jnp.bfloat16), vh,
                                 preferred_element_type=jnp.float32))

    ctx = jnp.concatenate(ctx_heads, axis=-1).astype(jnp.bfloat16)  # (tq, H*d_v)

    # Output projection (bf16 in / f32 acc) + residual + LayerNorm in f32.
    out = jnp.dot(ctx, wo_ref[...], preferred_element_type=jnp.float32) + bo_ref[...]
    out = out + q_in
    mean = jnp.mean(out, axis=-1, keepdims=True)
    var = jnp.mean((out - mean) ** 2, axis=-1, keepdims=True)
    normed = (out - mean) * jax.lax.rsqrt(var + 1e-5)
    out_ref[0] = (normed * gamma_ref[...] + beta_ref[...]).astype(out_ref.dtype)


def multi_head_attention(Q, K, V, attn_mask, params, *, block_q=None):
    """Q, K, V: (B, S, E) float32.  attn_mask: (B, S, S) bool (True = masked)."""
    B, S, E = Q.shape
    if block_q is None:
        block_q = 128 if S % 128 == 0 else S
    assert S % block_q == 0
    n_q = S // block_q

    scale = jnp.float32(1.0 / math.sqrt(d_k))
    # Fold the attention scale into the Q projection; cast weights to bf16 once
    # outside the kernel (halves weight DMA + VMEM, native bf16 MXU rate).
    wq = (params["wq"] * scale).astype(jnp.bfloat16)
    bq = params["bq"] * scale
    wk = params["wk"].astype(jnp.bfloat16)
    wv = params["wv"].astype(jnp.bfloat16)
    wo = params["wo"].astype(jnp.bfloat16)
    bk, bv, bo = params["bk"], params["bv"], params["bo"]
    gamma, beta = params["gamma"], params["beta"]

    mask_i8 = attn_mask.astype(jnp.int8)   # 4x less mask bandwidth than int32

    q_spec = pl.BlockSpec((1, block_q, E), lambda b, qi: (b, qi, 0))
    kv_spec = pl.BlockSpec((1, S, E), lambda b, qi: (b, 0, 0))
    mask_spec = pl.BlockSpec((1, block_q, S), lambda b, qi: (b, qi, 0))
    wqk_spec = pl.BlockSpec((E, n_heads * d_k), lambda b, qi: (0, 0))
    wv_spec = pl.BlockSpec((E, n_heads * d_v), lambda b, qi: (0, 0))
    wo_spec = pl.BlockSpec((n_heads * d_v, E), lambda b, qi: (0, 0))
    bqk_spec = pl.BlockSpec((1, n_heads * d_k), lambda b, qi: (0, 0))
    bvv_spec = pl.BlockSpec((1, n_heads * d_v), lambda b, qi: (0, 0))
    vec_spec = pl.BlockSpec((1, E), lambda b, qi: (0, 0))

    out_shapes = (
        jax.ShapeDtypeStruct((B, S, E), jnp.float32),
        jax.ShapeDtypeStruct((B, n_heads, S, S), jnp.float32),
    )
    out_specs = (
        pl.BlockSpec((1, block_q, E), lambda b, qi: (b, qi, 0)),
        pl.BlockSpec((1, n_heads, block_q, S), lambda b, qi: (b, 0, qi, 0)),
    )

    fn = pl.pallas_call(
        mha_kernel,
        out_shape=out_shapes,
        grid_spec=pltpu.PrefetchScalarGridSpec(
            num_scalar_prefetch=0,
            grid=(B, n_q),
            in_specs=[q_spec, kv_spec, kv_spec, mask_spec,
                      wqk_spec, bqk_spec, wqk_spec, bqk_spec,
                      wv_spec, bvv_spec, wo_spec, vec_spec,
                      vec_spec, vec_spec],
            out_specs=out_specs,
        ),
        compiler_params=pltpu.CompilerParams(
            dimension_semantics=("parallel", "parallel"),
            vmem_limit_bytes=48 * 1024 * 1024),
    )
    return fn(Q, K, V, mask_i8,
              wq, bq, wk, bk, wv, bv, wo, bo, gamma, beta)


def init_params(key):
    ks = jax.random.split(key, 8)
    scale = 1.0 / math.sqrt(d_embedding)
    return {
        "wq": jax.random.normal(ks[0], (d_embedding, n_heads * d_k), jnp.float32) * scale,
        "bq": jax.random.normal(ks[1], (1, n_heads * d_k), jnp.float32) * 0.01,
        "wk": jax.random.normal(ks[2], (d_embedding, n_heads * d_k), jnp.float32) * scale,
        "bk": jax.random.normal(ks[3], (1, n_heads * d_k), jnp.float32) * 0.01,
        "wv": jax.random.normal(ks[4], (d_embedding, n_heads * d_v), jnp.float32) * scale,
        "bv": jax.random.normal(ks[5], (1, n_heads * d_v), jnp.float32) * 0.01,
        "wo": jax.random.normal(ks[6], (n_heads * d_v, d_embedding), jnp.float32) * scale,
        "bo": jax.random.normal(ks[7], (1, d_embedding), jnp.float32) * 0.01,
        "gamma": jnp.ones((1, d_embedding), jnp.float32),
        "beta": jnp.zeros((1, d_embedding), jnp.float32),
    }


def reference(Q, K, V, attn_mask, p):
    B, S, E = Q.shape
    qp = Q @ p["wq"] + p["bq"][0]
    kp = K @ p["wk"] + p["bk"][0]
    vp = V @ p["wv"] + p["bv"][0]
    qh = qp.reshape(B, S, n_heads, d_k).transpose(0, 2, 1, 3)
    kh = kp.reshape(B, S, n_heads, d_k).transpose(0, 2, 1, 3)
    vh = vp.reshape(B, S, n_heads, d_v).transpose(0, 2, 1, 3)
    scores = jnp.einsum("bhqd,bhkd->bhqk", qh, kh) / math.sqrt(d_k)
    scores = jnp.where(attn_mask[:, None, :, :], -1e9, scores)
    w = jax.nn.softmax(scores, axis=-1)
    ctx = jnp.einsum("bhqk,bhkd->bhqd", w, vh)
    ctx = ctx.transpose(0, 2, 1, 3).reshape(B, S, n_heads * d_v)
    out = ctx @ p["wo"] + p["bo"][0]
    out = out + Q
    mean = out.mean(-1, keepdims=True)
    var = ((out - mean) ** 2).mean(-1, keepdims=True)
    out = (out - mean) * jax.lax.rsqrt(var + 1e-5) * p["gamma"][0] + p["beta"][0]
    return out, w


if __name__ == "__main__":
    key = jax.random.PRNGKey(0)
    kq, kk, kv, kp = jax.random.split(key, 4)

    B, S = 2, 8
    Q = jax.random.normal(kq, (B, S, d_embedding), jnp.float32)
    K = jax.random.normal(kk, (B, S, d_embedding), jnp.float32)
    V = jax.random.normal(kv, (B, S, d_embedding), jnp.float32)
    # causal mask: True above the diagonal => masked out
    attn_mask = jnp.broadcast_to(
        jnp.triu(jnp.ones((S, S), dtype=bool), k=1), (B, S, S))

    params = init_params(kp)

    out, weights = multi_head_attention(Q, K, V, attn_mask, params)
    out = jax.block_until_ready(out)
    weights = jax.block_until_ready(weights)

    ref_out, ref_w = reference(Q, K, V, attn_mask, params)
    np.testing.assert_allclose(np.asarray(out), np.asarray(ref_out),
                               rtol=2e-2, atol=2e-2)
    np.testing.assert_allclose(np.asarray(weights), np.asarray(ref_w),
                               rtol=2e-2, atol=2e-2)

    print("KERNEL_OK")
</pallas_src>

<mosaic_0001>
module attributes {stable_mosaic.version = 11 : i64} {
  func.func @mha_kernel(%arg0: i32, %arg1: i32, %arg2: memref<1x8x512xf32, #tpu.memory_space<vmem>>, %arg3: memref<1x8x512xf32, #tpu.memory_space<vmem>>, %arg4: memref<1x8x512xf32, #tpu.memory_space<vmem>>, %arg5: memref<1x8x8xi8, #tpu.memory_space<vmem>>, %arg6: memref<512x512xbf16, #tpu.memory_space<vmem>>, %arg7: memref<1x512xf32, #tpu.memory_space<vmem>>, %arg8: memref<512x512xbf16, #tpu.memory_space<vmem>>, %arg9: memref<1x512xf32, #tpu.memory_space<vmem>>, %arg10: memref<512x512xbf16, #tpu.memory_space<vmem>>, %arg11: memref<1x512xf32, #tpu.memory_space<vmem>>, %arg12: memref<512x512xbf16, #tpu.memory_space<vmem>>, %arg13: memref<1x512xf32, #tpu.memory_space<vmem>>, %arg14: memref<1x512xf32, #tpu.memory_space<vmem>>, %arg15: memref<1x512xf32, #tpu.memory_space<vmem>>, %arg16: memref<1x8x512xf32, #tpu.memory_space<vmem>>, %arg17: memref<1x8x8x8xf32, #tpu.memory_space<vmem>>) attributes {dimension_semantics = [#tpu.dimension_semantics<parallel>, #tpu.dimension_semantics<parallel>], iteration_bounds = array<i64: 2, 1>, scalar_prefetch = 0 : i64, scratch_operands = 0 : i64, tpu.core_type = #tpu.core_type<tc>, window_params = [{transform_indices = @transform_0, window_bounds = array<i64: 1, 8, 512>}, {transform_indices = @transform_1, window_bounds = array<i64: 1, 8, 512>}, {transform_indices = @transform_2, window_bounds = array<i64: 1, 8, 512>}, {transform_indices = @transform_3, window_bounds = array<i64: 1, 8, 8>}, {pipeline_mode = #tpu.pipeline_mode<synchronous>, transform_indices = @transform_4, window_bounds = array<i64: 512, 512>}, {pipeline_mode = #tpu.pipeline_mode<synchronous>, transform_indices = @transform_5, window_bounds = array<i64: 1, 512>}, {pipeline_mode = #tpu.pipeline_mode<synchronous>, transform_indices = @transform_6, window_bounds = array<i64: 512, 512>}, {pipeline_mode = #tpu.pipeline_mode<synchronous>, transform_indices = @transform_7, window_bounds = array<i64: 1, 512>}, {pipeline_mode = #tpu.pipeline_mode<synchronous>, transform_indices = @transform_8, window_bounds = array<i64: 512, 512>}, {pipeline_mode = #tpu.pipeline_mode<synchronous>, transform_indices = @transform_9, window_bounds = array<i64: 1, 512>}, {pipeline_mode = #tpu.pipeline_mode<synchronous>, transform_indices = @transform_10, window_bounds = array<i64: 512, 512>}, {pipeline_mode = #tpu.pipeline_mode<synchronous>, transform_indices = @transform_11, window_bounds = array<i64: 1, 512>}, {pipeline_mode = #tpu.pipeline_mode<synchronous>, transform_indices = @transform_12, window_bounds = array<i64: 1, 512>}, {pipeline_mode = #tpu.pipeline_mode<synchronous>, transform_indices = @transform_13, window_bounds = array<i64: 1, 512>}, {transform_indices = @transform_14, window_bounds = array<i64: 1, 8, 512>}, {transform_indices = @transform_15, window_bounds = array<i64: 1, 8, 8, 8>}]} {
    %c0 = arith.constant 0 : index
    %c0_0 = arith.constant 0 : index
    %c0_1 = arith.constant 0 : index
    %0 = vector.load %arg2[%c0, %c0_0, %c0_1] : memref<1x8x512xf32, #tpu.memory_space<vmem>>, vector<1x8x512xf32>
    %1 = vector.shape_cast %0 : vector<1x8x512xf32> to vector<8x512xf32>
    %c0_2 = arith.constant 0 : index
    %c0_3 = arith.constant 0 : index
    %c0_4 = arith.constant 0 : index
    %2 = vector.load %arg3[%c0_2, %c0_3, %c0_4] : memref<1x8x512xf32, #tpu.memory_space<vmem>>, vector<1x8x512xf32>
    %3 = vector.shape_cast %2 : vector<1x8x512xf32> to vector<8x512xf32>
    %c0_5 = arith.constant 0 : index
    %c0_6 = arith.constant 0 : index
    %c0_7 = arith.constant 0 : index
    %4 = vector.load %arg4[%c0_5, %c0_6, %c0_7] : memref<1x8x512xf32, #tpu.memory_space<vmem>>, vector<1x8x512xf32>
    %5 = vector.shape_cast %4 : vector<1x8x512xf32> to vector<8x512xf32>
    %c0_8 = arith.constant 0 : index
    %c0_9 = arith.constant 0 : index
    %c0_10 = arith.constant 0 : index
    %6 = vector.load %arg5[%c0_8, %c0_9, %c0_10] : memref<1x8x8xi8, #tpu.memory_space<vmem>>, vector<1x8x8xi8>
    %7 = vector.shape_cast %6 : vector<1x8x8xi8> to vector<8x8xi8>
    %c0_i8 = arith.constant 0 : i8
    %8 = vector.broadcast %c0_i8 : i8 to vector<8x8xi8>
    %9 = arith.cmpi ne, %7, %8 : vector<8x8xi8>
    %10 = arith.truncf %1 : vector<8x512xf32> to vector<8x512xbf16>
    %11 = arith.truncf %3 : vector<8x512xf32> to vector<8x512xbf16>
    %12 = arith.truncf %5 : vector<8x512xf32> to vector<8x512xbf16>
    %c0_11 = arith.constant 0 : index
    %c0_12 = arith.constant 0 : index
    %13 = vector.load %arg6[%c0_11, %c0_12] : memref<512x512xbf16, #tpu.memory_space<vmem>>, vector<512x512xbf16>
    %cst = arith.constant dense<0.000000e+00> : vector<8x512xf32>
    %14 = tpu.matmul %10, %13, %cst {dimension_numbers = #tpu.dot_dimension_numbers<[1], [0], [0], [1], [0, 0, 1, 1], [], []>} : vector<8x512xbf16>, vector<512x512xbf16>, vector<8x512xf32> -> vector<8x512xf32>
    %c0_13 = arith.constant 0 : index
    %c0_14 = arith.constant 0 : index
    %15 = vector.load %arg7[%c0_13, %c0_14] : memref<1x512xf32, #tpu.memory_space<vmem>>, vector<1x512xf32>
    %16 = vector.broadcast %15 : vector<1x512xf32> to vector<8x512xf32>
    %17 = arith.addf %14, %16 : vector<8x512xf32>
    %c0_15 = arith.constant 0 : index
    %c0_16 = arith.constant 0 : index
    %18 = vector.load %arg8[%c0_15, %c0_16] : memref<512x512xbf16, #tpu.memory_space<vmem>>, vector<512x512xbf16>
    %cst_17 = arith.constant dense<0.000000e+00> : vector<8x512xf32>
    %19 = tpu.matmul %11, %18, %cst_17 {dimension_numbers = #tpu.dot_dimension_numbers<[1], [0], [0], [1], [0, 0, 1, 1], [], []>} : vector<8x512xbf16>, vector<512x512xbf16>, vector<8x512xf32> -> vector<8x512xf32>
    %c0_18 = arith.constant 0 : index
    %c0_19 = arith.constant 0 : index
    %20 = vector.load %arg9[%c0_18, %c0_19] : memref<1x512xf32, #tpu.memory_space<vmem>>, vector<1x512xf32>
    %21 = vector.broadcast %20 : vector<1x512xf32> to vector<8x512xf32>
    %22 = arith.addf %19, %21 : vector<8x512xf32>
    %c0_20 = arith.constant 0 : index
    %c0_21 = arith.constant 0 : index
    %23 = vector.load %arg10[%c0_20, %c0_21] : memref<512x512xbf16, #tpu.memory_space<vmem>>, vector<512x512xbf16>
    %cst_22 = arith.constant dense<0.000000e+00> : vector<8x512xf32>
    %24 = tpu.matmul %12, %23, %cst_22 {dimension_numbers = #tpu.dot_dimension_numbers<[1], [0], [0], [1], [0, 0, 1, 1], [], []>} : vector<8x512xbf16>, vector<512x512xbf16>, vector<8x512xf32> -> vector<8x512xf32>
    %c0_23 = arith.constant 0 : index
    %c0_24 = arith.constant 0 : index
    %25 = vector.load %arg11[%c0_23, %c0_24] : memref<1x512xf32, #tpu.memory_space<vmem>>, vector<1x512xf32>
    %26 = vector.broadcast %25 : vector<1x512xf32> to vector<8x512xf32>
    %27 = arith.addf %24, %26 : vector<8x512xf32>
    %28 = arith.truncf %17 : vector<8x512xf32> to vector<8x512xbf16>
    %29 = arith.truncf %22 : vector<8x512xf32> to vector<8x512xbf16>
    %30 = arith.truncf %27 : vector<8x512xf32> to vector<8x512xbf16>
    %31 = vector.extract_strided_slice %28 {offsets = [0, 0], sizes = [8, 64], strides = [1, 1]} : vector<8x512xbf16> to vector<8x64xbf16>
    %32 = vector.extract_strided_slice %29 {offsets = [0, 0], sizes = [8, 64], strides = [1, 1]} : vector<8x512xbf16> to vector<8x64xbf16>
    %33 = vector.extract_strided_slice %30 {offsets = [0, 0], sizes = [8, 64], strides = [1, 1]} : vector<8x512xbf16> to vector<8x64xbf16>
    %34 = tpu.transpose %32, [1, 0] : vector<8x64xbf16> -> vector<64x8xbf16>
    %cst_25 = arith.constant dense<0.000000e+00> : vector<8x8xf32>
    %35 = tpu.matmul %31, %34, %cst_25 {dimension_numbers = #tpu.dot_dimension_numbers<[1], [0], [0], [1], [0, 0, 1, 1], [], []>} : vector<8x64xbf16>, vector<64x8xbf16>, vector<8x8xf32> -> vector<8x8xf32>
    %cst_26 = arith.constant -1.000000e+09 : f32
    %36 = vector.broadcast %cst_26 : f32 to vector<8x8xf32>
    %37 = arith.select %9, %36, %35 : vector<8x8xi1>, vector<8x8xf32>
    %cst_27 = arith.constant dense<0xFF800000> : vector<8xf32>
    %38 = vector.multi_reduction <maximumf>, %37, %cst_27 [1] : vector<8x8xf32> to vector<8xf32>
    %39 = vector.shape_cast %38 : vector<8xf32> to vector<8x1xf32>
    %40 = vector.broadcast %39 : vector<8x1xf32> to vector<8x8xf32>
    %41 = arith.subf %37, %40 : vector<8x8xf32>
    %42 = math.exp %41 : vector<8x8xf32>
    %cst_28 = arith.constant dense<0.000000e+00> : vector<8xf32>
    %43 = vector.multi_reduction <add>, %42, %cst_28 [1] : vector<8x8xf32> to vector<8xf32>
    %44 = vector.shape_cast %43 : vector<8xf32> to vector<8x1xf32>
    %45 = tpu.reciprocal %44 {approx = true} : vector<8x1xf32> -> vector<8x1xf32>
    %46 = vector.broadcast %45 : vector<8x1xf32> to vector<8x8xf32>
    %47 = arith.mulf %42, %46 : vector<8x8xf32>
    %c0_29 = arith.constant 0 : index
    %c0_30 = arith.constant 0 : index
    %c0_31 = arith.constant 0 : index
    %c0_32 = arith.constant 0 : index
    %48 = vector.load %arg17[%c0_29, %c0_30, %c0_31, %c0_32] : memref<1x8x8x8xf32, #tpu.memory_space<vmem>>, vector<1x1x8x8xf32>
    %49 = vector.shape_cast %48 : vector<1x1x8x8xf32> to vector<8x8xf32>
    %50 = vector.shape_cast %47 : vector<8x8xf32> to vector<1x1x8x8xf32>
    tpu.vector_store %arg17[%c0_29, %c0_30, %c0_31, %c0_32], %50 {strides = array<i32>} : memref<1x8x8x8xf32, #tpu.memory_space<vmem>>, vector<1x1x8x8xf32>,
    %51 = arith.truncf %47 : vector<8x8xf32> to vector<8x8xbf16>
    %cst_33 = arith.constant dense<0.000000e+00> : vector<8x64xf32>
    %52 = tpu.matmul %51, %33, %cst_33 {dimension_numbers = #tpu.dot_dimension_numbers<[1], [0], [0], [1], [0, 0, 1, 1], [], []>} : vector<8x8xbf16>, vector<8x64xbf16>, vector<8x64xf32> -> vector<8x64xf32>
    %53 = vector.extract_strided_slice %28 {offsets = [0, 64], sizes = [8, 64], strides = [1, 1]} : vector<8x512xbf16> to vector<8x64xbf16>
    %54 = vector.extract_strided_slice %29 {offsets = [0, 64], sizes = [8, 64], strides = [1, 1]} : vector<8x512xbf16> to vector<8x64xbf16>
    %55 = vector.extract_strided_slice %30 {offsets = [0, 64], sizes = [8, 64], strides = [1, 1]} : vector<8x512xbf16> to vector<8x64xbf16>
    %56 = tpu.transpose %54, [1, 0] : vector<8x64xbf16> -> vector<64x8xbf16>
    %cst_34 = arith.constant dense<0.000000e+00> : vector<8x8xf32>
    %57 = tpu.matmul %53, %56, %cst_34 {dimension_numbers = #tpu.dot_dimension_numbers<[1], [0], [0], [1], [0, 0, 1, 1], [], []>} : vector<8x64xbf16>, vector<64x8xbf16>, vector<8x8xf32> -> vector<8x8xf32>
    %cst_35 = arith.constant -1.000000e+09 : f32
    %58 = vector.broadcast %cst_35 : f32 to vector<8x8xf32>
    %59 = arith.select %9, %58, %57 : vector<8x8xi1>, vector<8x8xf32>
    %cst_36 = arith.constant dense<0xFF800000> : vector<8xf32>
    %60 = vector.multi_reduction <maximumf>, %59, %cst_36 [1] : vector<8x8xf32> to vector<8xf32>
    %61 = vector.shape_cast %60 : vector<8xf32> to vector<8x1xf32>
    %62 = vector.broadcast %61 : vector<8x1xf32> to vector<8x8xf32>
    %63 = arith.subf %59, %62 : vector<8x8xf32>
    %64 = math.exp %63 : vector<8x8xf32>
    %cst_37 = arith.constant dense<0.000000e+00> : vector<8xf32>
    %65 = vector.multi_reduction <add>, %64, %cst_37 [1] : vector<8x8xf32> to vector<8xf32>
    %66 = vector.shape_cast %65 : vector<8xf32> to vector<8x1xf32>
    %67 = tpu.reciprocal %66 {approx = true} : vector<8x1xf32> -> vector<8x1xf32>
    %68 = vector.broadcast %67 : vector<8x1xf32> to vector<8x8xf32>
    %69 = arith.mulf %64, %68 : vector<8x8xf32>
    %c0_38 = arith.constant 0 : index
    %c1 = arith.constant 1 : index
    %c0_39 = arith.constant 0 : index
    %c0_40 = arith.constant 0 : index
    %70 = vector.load %arg17[%c0_38, %c1, %c0_39, %c0_40] : memref<1x8x8x8xf32, #tpu.memory_space<vmem>>, vector<1x1x8x8xf32>
    %71 = vector.shape_cast %70 : vector<1x1x8x8xf32> to vector<8x8xf32>
    %72 = vector.shape_cast %69 : vector<8x8xf32> to vector<1x1x8x8xf32>
    tpu.vector_store %arg17[%c0_38, %c1, %c0_39, %c0_40], %72 {strides = array<i32>} : memref<1x8x8x8xf32, #tpu.memory_space<vmem>>, vector<1x1x8x8xf32>,
    %73 = arith.truncf %69 : vector<8x8xf32> to vector<8x8xbf16>
    %cst_41 = arith.constant dense<0.000000e+00> : vector<8x64xf32>
    %74 = tpu.matmul %73, %55, %cst_41 {dimension_numbers = #tpu.dot_dimension_numbers<[1], [0], [0], [1], [0, 0, 1, 1], [], []>} : vector<8x8xbf16>, vector<8x64xbf16>, vector<8x64xf32> -> vector<8x64xf32>
    %75 = vector.extract_strided_slice %28 {offsets = [0, 128], sizes = [8, 64], strides = [1, 1]} : vector<8x512xbf16> to vector<8x64xbf16>
    %76 = vector.extract_strided_slice %29 {offsets = [0, 128], sizes = [8, 64], strides = [1, 1]} : vector<8x512xbf16> to vector<8x64xbf16>
    %77 = vector.extract_strided_slice %30 {offsets = [0, 128], sizes = [8, 64], strides = [1, 1]} : vector<8x512xbf16> to vector<8x64xbf16>
    %78 = tpu.transpose %76, [1, 0] : vector<8x64xbf16> -> vector<64x8xbf16>
    %cst_42 = arith.constant dense<0.000000e+00> : vector<8x8xf32>
    %79 = tpu.matmul %75, %78, %cst_42 {dimension_numbers = #tpu.dot_dimension_numbers<[1], [0], [0], [1], [0, 0, 1, 1], [], []>} : vector<8x64xbf16>, vector<64x8xbf16>, vector<8x8xf32> -> vector<8x8xf32>
    %cst_43 = arith.constant -1.000000e+09 : f32
    %80 = vector.broadcast %cst_43 : f32 to vector<8x8xf32>
    %81 = arith.select %9, %80, %79 : vector<8x8xi1>, vector<8x8xf32>
    %cst_44 = arith.constant dense<0xFF800000> : vector<8xf32>
    %82 = vector.multi_reduction <maximumf>, %81, %cst_44 [1] : vector<8x8xf32> to vector<8xf32>
    %83 = vector.shape_cast %82 : vector<8xf32> to vector<8x1xf32>
    %84 = vector.broadcast %83 : vector<8x1xf32> to vector<8x8xf32>
    %85 = arith.subf %81, %84 : vector<8x8xf32>
    %86 = math.exp %85 : vector<8x8xf32>
    %cst_45 = arith.constant dense<0.000000e+00> : vector<8xf32>
    %87 = vector.multi_reduction <add>, %86, %cst_45 [1] : vector<8x8xf32> to vector<8xf32>
    %88 = vector.shape_cast %87 : vector<8xf32> to vector<8x1xf32>
    %89 = tpu.reciprocal %88 {approx = true} : vector<8x1xf32> -> vector<8x1xf32>
    %90 = vector.broadcast %89 : vector<8x1xf32> to vector<8x8xf32>
    %91 = arith.mulf %86, %90 : vector<8x8xf32>
    %c0_46 = arith.constant 0 : index
    %c2 = arith.constant 2 : index
    %c0_47 = arith.constant 0 : index
    %c0_48 = arith.constant 0 : index
    %92 = vector.load %arg17[%c0_46, %c2, %c0_47, %c0_48] : memref<1x8x8x8xf32, #tpu.memory_space<vmem>>, vector<1x1x8x8xf32>
    %93 = vector.shape_cast %92 : vector<1x1x8x8xf32> to vector<8x8xf32>
    %94 = vector.shape_cast %91 : vector<8x8xf32> to vector<1x1x8x8xf32>
    tpu.vector_store %arg17[%c0_46, %c2, %c0_47, %c0_48], %94 {strides = array<i32>} : memref<1x8x8x8xf32, #tpu.memory_space<vmem>>, vector<1x1x8x8xf32>,
    %95 = arith.truncf %91 : vector<8x8xf32> to vector<8x8xbf16>
    %cst_49 = arith.constant dense<0.000000e+00> : vector<8x64xf32>
    %96 = tpu.matmul %95, %77, %cst_49 {dimension_numbers = #tpu.dot_dimension_numbers<[1], [0], [0], [1], [0, 0, 1, 1], [], []>} : vector<8x8xbf16>, vector<8x64xbf16>, vector<8x64xf32> -> vector<8x64xf32>
    %97 = vector.extract_strided_slice %28 {offsets = [0, 192], sizes = [8, 64], strides = [1, 1]} : vector<8x512xbf16> to vector<8x64xbf16>
    %98 = vector.extract_strided_slice %29 {offsets = [0, 192], sizes = [8, 64], strides = [1, 1]} : vector<8x512xbf16> to vector<8x64xbf16>
    %99 = vector.extract_strided_slice %30 {offsets = [0, 192], sizes = [8, 64], strides = [1, 1]} : vector<8x512xbf16> to vector<8x64xbf16>
    %100 = tpu.transpose %98, [1, 0] : vector<8x64xbf16> -> vector<64x8xbf16>
    %cst_50 = arith.constant dense<0.000000e+00> : vector<8x8xf32>
    %101 = tpu.matmul %97, %100, %cst_50 {dimension_numbers = #tpu.dot_dimension_numbers<[1], [0], [0], [1], [0, 0, 1, 1], [], []>} : vector<8x64xbf16>, vector<64x8xbf16>, vector<8x8xf32> -> vector<8x8xf32>
    %cst_51 = arith.constant -1.000000e+09 : f32
    %102 = vector.broadcast %cst_51 : f32 to vector<8x8xf32>
    %103 = arith.select %9, %102, %101 : vector<8x8xi1>, vector<8x8xf32>
    %cst_52 = arith.constant dense<0xFF800000> : vector<8xf32>
    %104 = vector.multi_reduction <maximumf>, %103, %cst_52 [1] : vector<8x8xf32> to vector<8xf32>
    %105 = vector.shape_cast %104 : vector<8xf32> to vector<8x1xf32>
    %106 = vector.broadcast %105 : vector<8x1xf32> to vector<8x8xf32>
    %107 = arith.subf %103, %106 : vector<8x8xf32>
    %108 = math.exp %107 : vector<8x8xf32>
    %cst_53 = arith.constant dense<0.000000e+00> : vector<8xf32>
    %109 = vector.multi_reduction <add>, %108, %cst_53 [1] : vector<8x8xf32> to vector<8xf32>
    %110 = vector.shape_cast %109 : vector<8xf32> to vector<8x1xf32>
    %111 = tpu.reciprocal %110 {approx = true} : vector<8x1xf32> -> vector<8x1xf32>
    %112 = vector.broadcast %111 : vector<8x1xf32> to vector<8x8xf32>
    %113 = arith.mulf %108, %112 : vector<8x8xf32>
    %c0_54 = arith.constant 0 : index
    %c3 = arith.constant 3 : index
    %c0_55 = arith.constant 0 : index
    %c0_56 = arith.constant 0 : index
    %114 = vector.load %arg17[%c0_54, %c3, %c0_55, %c0_56] : memref<1x8x8x8xf32, #tpu.memory_space<vmem>>, vector<1x1x8x8xf32>
    %115 = vector.shape_cast %114 : vector<1x1x8x8xf32> to vector<8x8xf32>
    %116 = vector.shape_cast %113 : vector<8x8xf32> to vector<1x1x8x8xf32>
    tpu.vector_store %arg17[%c0_54, %c3, %c0_55, %c0_56], %116 {strides = array<i32>} : memref<1x8x8x8xf32, #tpu.memory_space<vmem>>, vector<1x1x8x8xf32>,
    %117 = arith.truncf %113 : vector<8x8xf32> to vector<8x8xbf16>
    %cst_57 = arith.constant dense<0.000000e+00> : vector<8x64xf32>
    %118 = tpu.matmul %117, %99, %cst_57 {dimension_numbers = #tpu.dot_dimension_numbers<[1], [0], [0], [1], [0, 0, 1, 1], [], []>} : vector<8x8xbf16>, vector<8x64xbf16>, vector<8x64xf32> -> vector<8x64xf32>
    %119 = vector.extract_strided_slice %28 {offsets = [0, 256], sizes = [8, 64], strides = [1, 1]} : vector<8x512xbf16> to vector<8x64xbf16>
    %120 = vector.extract_strided_slice %29 {offsets = [0, 256], sizes = [8, 64], strides = [1, 1]} : vector<8x512xbf16> to vector<8x64xbf16>
    %121 = vector.extract_strided_slice %30 {offsets = [0, 256], sizes = [8, 64], strides = [1, 1]} : vector<8x512xbf16> to vector<8x64xbf16>
    %122 = tpu.transpose %120, [1, 0] : vector<8x64xbf16> -> vector<64x8xbf16>
    %cst_58 = arith.constant dense<0.000000e+00> : vector<8x8xf32>
    %123 = tpu.matmul %119, %122, %cst_58 {dimension_numbers = #tpu.dot_dimension_numbers<[1], [0], [0], [1], [0, 0, 1, 1], [], []>} : vector<8x64xbf16>, vector<64x8xbf16>, vector<8x8xf32> -> vector<8x8xf32>
    %cst_59 = arith.constant -1.000000e+09 : f32
    %124 = vector.broadcast %cst_59 : f32 to vector<8x8xf32>
    %125 = arith.select %9, %124, %123 : vector<8x8xi1>, vector<8x8xf32>
    %cst_60 = arith.constant dense<0xFF800000> : vector<8xf32>
    %126 = vector.multi_reduction <maximumf>, %125, %cst_60 [1] : vector<8x8xf32> to vector<8xf32>
    %127 = vector.shape_cast %126 : vector<8xf32> to vector<8x1xf32>
    %128 = vector.broadcast %127 : vector<8x1xf32> to vector<8x8xf32>
    %129 = arith.subf %125, %128 : vector<8x8xf32>
    %130 = math.exp %129 : vector<8x8xf32>
    %cst_61 = arith.constant dense<0.000000e+00> : vector<8xf32>
    %131 = vector.multi_reduction <add>, %130, %cst_61 [1] : vector<8x8xf32> to vector<8xf32>
    %132 = vector.shape_cast %131 : vector<8xf32> to vector<8x1xf32>
    %133 = tpu.reciprocal %132 {approx = true} : vector<8x1xf32> -> vector<8x1xf32>
    %134 = vector.broadcast %133 : vector<8x1xf32> to vector<8x8xf32>
    %135 = arith.mulf %130, %134 : vector<8x8xf32>
    %c0_62 = arith.constant 0 : index
    %c4 = arith.constant 4 : index
    %c0_63 = arith.constant 0 : index
    %c0_64 = arith.constant 0 : index
    %136 = vector.load %arg17[%c0_62, %c4, %c0_63, %c0_64] : memref<1x8x8x8xf32, #tpu.memory_space<vmem>>, vector<1x1x8x8xf32>
    %137 = vector.shape_cast %136 : vector<1x1x8x8xf32> to vector<8x8xf32>
    %138 = vector.shape_cast %135 : vector<8x8xf32> to vector<1x1x8x8xf32>
    tpu.vector_store %arg17[%c0_62, %c4, %c0_63, %c0_64], %138 {strides = array<i32>} : memref<1x8x8x8xf32, #tpu.memory_space<vmem>>, vector<1x1x8x8xf32>,
    %139 = arith.truncf %135 : vector<8x8xf32> to vector<8x8xbf16>
    %cst_65 = arith.constant dense<0.000000e+00> : vector<8x64xf32>
    %140 = tpu.matmul %139, %121, %cst_65 {dimension_numbers = #tpu.dot_dimension_numbers<[1], [0], [0], [1], [0, 0, 1, 1], [], []>} : vector<8x8xbf16>, vector<8x64xbf16>, vector<8x64xf32> -> vector<8x64xf32>
    %141 = vector.extract_strided_slice %28 {offsets = [0, 320], sizes = [8, 64], strides = [1, 1]} : vector<8x512xbf16> to vector<8x64xbf16>
    %142 = vector.extract_strided_slice %29 {offsets = [0, 320], sizes = [8, 64], strides = [1, 1]} : vector<8x512xbf16> to vector<8x64xbf16>
    %143 = vector.extract_strided_slice %30 {offsets = [0, 320], sizes = [8, 64], strides = [1, 1]} : vector<8x512xbf16> to vector<8x64xbf16>
    %144 = tpu.transpose %142, [1, 0] : vector<8x64xbf16> -> vector<64x8xbf16>
    %cst_66 = arith.constant dense<0.000000e+00> : vector<8x8xf32>
    %145 = tpu.matmul %141, %144, %cst_66 {dimension_numbers = #tpu.dot_dimension_numbers<[1], [0], [0], [1], [0, 0, 1, 1], [], []>} : vector<8x64xbf16>, vector<64x8xbf16>, vector<8x8xf32> -> vector<8x8xf32>
    %cst_67 = arith.constant -1.000000e+09 : f32
    %146 = vector.broadcast %cst_67 : f32 to vector<8x8xf32>
    %147 = arith.select %9, %146, %145 : vector<8x8xi1>, vector<8x8xf32>
    %cst_68 = arith.constant dense<0xFF800000> : vector<8xf32>
    %148 = vector.multi_reduction <maximumf>, %147, %cst_68 [1] : vector<8x8xf32> to vector<8xf32>
    %149 = vector.shape_cast %148 : vector<8xf32> to vector<8x1xf32>
    %150 = vector.broadcast %149 : vector<8x1xf32> to vector<8x8xf32>
    %151 = arith.subf %147, %150 : vector<8x8xf32>
    %152 = math.exp %151 : vector<8x8xf32>
    %cst_69 = arith.constant dense<0.000000e+00> : vector<8xf32>
    %153 = vector.multi_reduction <add>, %152, %cst_69 [1] : vector<8x8xf32> to vector<8xf32>
    %154 = vector.shape_cast %153 : vector<8xf32> to vector<8x1xf32>
    %155 = tpu.reciprocal %154 {approx = true} : vector<8x1xf32> -> vector<8x1xf32>
    %156 = vector.broadcast %155 : vector<8x1xf32> to vector<8x8xf32>
    %157 = arith.mulf %152, %156 : vector<8x8xf32>
    %c0_70 = arith.constant 0 : index
    %c5 = arith.constant 5 : index
    %c0_71 = arith.constant 0 : index
    %c0_72 = arith.constant 0 : index
    %158 = vector.load %arg17[%c0_70, %c5, %c0_71, %c0_72] : memref<1x8x8x8xf32, #tpu.memory_space<vmem>>, vector<1x1x8x8xf32>
    %159 = vector.shape_cast %158 : vector<1x1x8x8xf32> to vector<8x8xf32>
    %160 = vector.shape_cast %157 : vector<8x8xf32> to vector<1x1x8x8xf32>
    tpu.vector_store %arg17[%c0_70, %c5, %c0_71, %c0_72], %160 {strides = array<i32>} : memref<1x8x8x8xf32, #tpu.memory_space<vmem>>, vector<1x1x8x8xf32>,
    %161 = arith.truncf %157 : vector<8x8xf32> to vector<8x8xbf16>
    %cst_73 = arith.constant dense<0.000000e+00> : vector<8x64xf32>
    %162 = tpu.matmul %161, %143, %cst_73 {dimension_numbers = #tpu.dot_dimension_numbers<[1], [0], [0], [1], [0, 0, 1, 1], [], []>} : vector<8x8xbf16>, vector<8x64xbf16>, vector<8x64xf32> -> vector<8x64xf32>
    %163 = vector.extract_strided_slice %28 {offsets = [0, 384], sizes = [8, 64], strides = [1, 1]} : vector<8x512xbf16> to vector<8x64xbf16>
    %164 = vector.extract_strided_slice %29 {offsets = [0, 384], sizes = [8, 64], strides = [1, 1]} : vector<8x512xbf16> to vector<8x64xbf16>
    %165 = vector.extract_strided_slice %30 {offsets = [0, 384], sizes = [8, 64], strides = [1, 1]} : vector<8x512xbf16> to vector<8x64xbf16>
    %166 = tpu.transpose %164, [1, 0] : vector<8x64xbf16> -> vector<64x8xbf16>
    %cst_74 = arith.constant dense<0.000000e+00> : vector<8x8xf32>
    %167 = tpu.matmul %163, %166, %cst_74 {dimension_numbers = #tpu.dot_dimension_numbers<[1], [0], [0], [1], [0, 0, 1, 1], [], []>} : vector<8x64xbf16>, vector<64x8xbf16>, vector<8x8xf32> -> vector<8x8xf32>
    %cst_75 = arith.constant -1.000000e+09 : f32
    %168 = vector.broadcast %cst_75 : f32 to vector<8x8xf32>
    %169 = arith.select %9, %168, %167 : vector<8x8xi1>, vector<8x8xf32>
    %cst_76 = arith.constant dense<0xFF800000> : vector<8xf32>
    %170 = vector.multi_reduction <maximumf>, %169, %cst_76 [1] : vector<8x8xf32> to vector<8xf32>
    %171 = vector.shape_cast %170 : vector<8xf32> to vector<8x1xf32>
    %172 = vector.broadcast %171 : vector<8x1xf32> to vector<8x8xf32>
    %173 = arith.subf %169, %172 : vector<8x8xf32>
    %174 = math.exp %173 : vector<8x8xf32>
    %cst_77 = arith.constant dense<0.000000e+00> : vector<8xf32>
    %175 = vector.multi_reduction <add>, %174, %cst_77 [1] : vector<8x8xf32> to vector<8xf32>
    %176 = vector.shape_cast %175 : vector<8xf32> to vector<8x1xf32>
    %177 = tpu.reciprocal %176 {approx = true} : vector<8x1xf32> -> vector<8x1xf32>
    %178 = vector.broadcast %177 : vector<8x1xf32> to vector<8x8xf32>
    %179 = arith.mulf %174, %178 : vector<8x8xf32>
    %c0_78 = arith.constant 0 : index
    %c6 = arith.constant 6 : index
    %c0_79 = arith.constant 0 : index
    %c0_80 = arith.constant 0 : index
    %180 = vector.load %arg17[%c0_78, %c6, %c0_79, %c0_80] : memref<1x8x8x8xf32, #tpu.memory_space<vmem>>, vector<1x1x8x8xf32>
    %181 = vector.shape_cast %180 : vector<1x1x8x8xf32> to vector<8x8xf32>
    %182 = vector.shape_cast %179 : vector<8x8xf32> to vector<1x1x8x8xf32>
    tpu.vector_store %arg17[%c0_78, %c6, %c0_79, %c0_80], %182 {strides = array<i32>} : memref<1x8x8x8xf32, #tpu.memory_space<vmem>>, vector<1x1x8x8xf32>,
    %183 = arith.truncf %179 : vector<8x8xf32> to vector<8x8xbf16>
    %cst_81 = arith.constant dense<0.000000e+00> : vector<8x64xf32>
    %184 = tpu.matmul %183, %165, %cst_81 {dimension_numbers = #tpu.dot_dimension_numbers<[1], [0], [0], [1], [0, 0, 1, 1], [], []>} : vector<8x8xbf16>, vector<8x64xbf16>, vector<8x64xf32> -> vector<8x64xf32>
    %185 = vector.extract_strided_slice %28 {offsets = [0, 448], sizes = [8, 64], strides = [1, 1]} : vector<8x512xbf16> to vector<8x64xbf16>
    %186 = vector.extract_strided_slice %29 {offsets = [0, 448], sizes = [8, 64], strides = [1, 1]} : vector<8x512xbf16> to vector<8x64xbf16>
    %187 = vector.extract_strided_slice %30 {offsets = [0, 448], sizes = [8, 64], strides = [1, 1]} : vector<8x512xbf16> to vector<8x64xbf16>
    %188 = tpu.transpose %186, [1, 0] : vector<8x64xbf16> -> vector<64x8xbf16>
    %cst_82 = arith.constant dense<0.000000e+00> : vector<8x8xf32>
    %189 = tpu.matmul %185, %188, %cst_82 {dimension_numbers = #tpu.dot_dimension_numbers<[1], [0], [0], [1], [0, 0, 1, 1], [], []>} : vector<8x64xbf16>, vector<64x8xbf16>, vector<8x8xf32> -> vector<8x8xf32>
    %cst_83 = arith.constant -1.000000e+09 : f32
    %190 = vector.broadcast %cst_83 : f32 to vector<8x8xf32>
    %191 = arith.select %9, %190, %189 : vector<8x8xi1>, vector<8x8xf32>
    %cst_84 = arith.constant dense<0xFF800000> : vector<8xf32>
    %192 = vector.multi_reduction <maximumf>, %191, %cst_84 [1] : vector<8x8xf32> to vector<8xf32>
    %193 = vector.shape_cast %192 : vector<8xf32> to vector<8x1xf32>
    %194 = vector.broadcast %193 : vector<8x1xf32> to vector<8x8xf32>
    %195 = arith.subf %191, %194 : vector<8x8xf32>
    %196 = math.exp %195 : vector<8x8xf32>
    %cst_85 = arith.constant dense<0.000000e+00> : vector<8xf32>
    %197 = vector.multi_reduction <add>, %196, %cst_85 [1] : vector<8x8xf32> to vector<8xf32>
    %198 = vector.shape_cast %197 : vector<8xf32> to vector<8x1xf32>
    %199 = tpu.reciprocal %198 {approx = true} : vector<8x1xf32> -> vector<8x1xf32>
    %200 = vector.broadcast %199 : vector<8x1xf32> to vector<8x8xf32>
    %201 = arith.mulf %196, %200 : vector<8x8xf32>
    %c0_86 = arith.constant 0 : index
    %c7 = arith.constant 7 : index
    %c0_87 = arith.constant 0 : index
    %c0_88 = arith.constant 0 : index
    %202 = vector.load %arg17[%c0_86, %c7, %c0_87, %c0_88] : memref<1x8x8x8xf32, #tpu.memory_space<vmem>>, vector<1x1x8x8xf32>
    %203 = vector.shape_cast %202 : vector<1x1x8x8xf32> to vector<8x8xf32>
    %204 = vector.shape_cast %201 : vector<8x8xf32> to vector<1x1x8x8xf32>
    tpu.vector_store %arg17[%c0_86, %c7, %c0_87, %c0_88], %204 {strides = array<i32>} : memref<1x8x8x8xf32, #tpu.memory_space<vmem>>, vector<1x1x8x8xf32>,
    %205 = arith.truncf %201 : vector<8x8xf32> to vector<8x8xbf16>
    %cst_89 = arith.constant dense<0.000000e+00> : vector<8x64xf32>
    %206 = tpu.matmul %205, %187, %cst_89 {dimension_numbers = #tpu.dot_dimension_numbers<[1], [0], [0], [1], [0, 0, 1, 1], [], []>} : vector<8x8xbf16>, vector<8x64xbf16>, vector<8x64xf32> -> vector<8x64xf32>
    %207 = tpu.concatenate %52, %74, %96, %118, %140, %162, %184, %206 in 1 : vector<8x64xf32>, vector<8x64xf32>, vector<8x64xf32>, vector<8x64xf32>, vector<8x64xf32>, vector<8x64xf32>, vector<8x64xf32>, vector<8x64xf32> -> vector<8x512xf32>
    %208 = arith.truncf %207 : vector<8x512xf32> to vector<8x512xbf16>
    %c0_90 = arith.constant 0 : index
    %c0_91 = arith.constant 0 : index
    %209 = vector.load %arg12[%c0_90, %c0_91] : memref<512x512xbf16, #tpu.memory_space<vmem>>, vector<512x512xbf16>
    %cst_92 = arith.constant dense<0.000000e+00> : vector<8x512xf32>
    %210 = tpu.matmul %208, %209, %cst_92 {dimension_numbers = #tpu.dot_dimension_numbers<[1], [0], [0], [1], [0, 0, 1, 1], [], []>} : vector<8x512xbf16>, vector<512x512xbf16>, vector<8x512xf32> -> vector<8x512xf32>
    %c0_93 = arith.constant 0 : index
    %c0_94 = arith.constant 0 : index
    %211 = vector.load %arg13[%c0_93, %c0_94] : memref<1x512xf32, #tpu.memory_space<vmem>>, vector<1x512xf32>
    %212 = vector.broadcast %211 : vector<1x512xf32> to vector<8x512xf32>
    %213 = arith.addf %210, %212 : vector<8x512xf32>
    %214 = arith.addf %213, %1 : vector<8x512xf32>
    %cst_95 = arith.constant dense<0.000000e+00> : vector<8xf32>
    %215 = vector.multi_reduction <add>, %214, %cst_95 [1] : vector<8x512xf32> to vector<8xf32>
    %216 = vector.shape_cast %215 : vector<8xf32> to vector<8x1xf32>
    %cst_96 = arith.constant 5.120000e+02 : f32
    %217 = vector.broadcast %cst_96 : f32 to vector<8x1xf32>
    %218 = arith.divf %216, %217 : vector<8x1xf32>
    %219 = vector.broadcast %218 : vector<8x1xf32> to vector<8x512xf32>
    %220 = arith.subf %214, %219 : vector<8x512xf32>
    %221 = arith.mulf %220, %220 : vector<8x512xf32>
    %cst_97 = arith.constant dense<0.000000e+00> : vector<8xf32>
    %222 = vector.multi_reduction <add>, %221, %cst_97 [1] : vector<8x512xf32> to vector<8xf32>
    %223 = vector.shape_cast %222 : vector<8xf32> to vector<8x1xf32>
    %cst_98 = arith.constant 5.120000e+02 : f32
    %224 = vector.broadcast %cst_98 : f32 to vector<8x1xf32>
    %225 = arith.divf %223, %224 : vector<8x1xf32>
    %226 = vector.broadcast %218 : vector<8x1xf32> to vector<8x512xf32>
    %227 = arith.subf %214, %226 : vector<8x512xf32>
    %cst_99 = arith.constant 9.99999974E-6 : f32
    %228 = vector.broadcast %cst_99 : f32 to vector<8x1xf32>
    %229 = arith.addf %225, %228 : vector<8x1xf32>
    %230 = math.rsqrt %229 : vector<8x1xf32>
    %231 = vector.broadcast %230 : vector<8x1xf32> to vector<8x512xf32>
    %232 = arith.mulf %227, %231 : vector<8x512xf32>
    %c0_100 = arith.constant 0 : index
    %c0_101 = arith.constant 0 : index
    %233 = vector.load %arg14[%c0_100, %c0_101] : memref<1x512xf32, #tpu.memory_space<vmem>>, vector<1x512xf32>
    %234 = vector.broadcast %233 : vector<1x512xf32> to vector<8x512xf32>
    %235 = arith.mulf %232, %234 : vector<8x512xf32>
    %c0_102 = arith.constant 0 : index
    %c0_103 = arith.constant 0 : index
    %236 = vector.load %arg15[%c0_102, %c0_103] : memref<1x512xf32, #tpu.memory_space<vmem>>, vector<1x512xf32>
    %237 = vector.broadcast %236 : vector<1x512xf32> to vector<8x512xf32>
    %238 = arith.addf %235, %237 : vector<8x512xf32>
    %c0_104 = arith.constant 0 : index
    %c0_105 = arith.constant 0 : index
    %c0_106 = arith.constant 0 : index
    %239 = vector.load %arg16[%c0_104, %c0_105, %c0_106] : memref<1x8x512xf32, #tpu.memory_space<vmem>>, vector<1x8x512xf32>
    %240 = vector.shape_cast %239 : vector<1x8x512xf32> to vector<8x512xf32>
    %241 = vector.shape_cast %238 : vector<8x512xf32> to vector<1x8x512xf32>
    tpu.vector_store %arg16[%c0_104, %c0_105, %c0_106], %241 {strides = array<i32>} : memref<1x8x512xf32, #tpu.memory_space<vmem>>, vector<1x8x512xf32>,
    return
  }
  func.func @transform_0(%arg0: i32, %arg1: i32) -> (i32, i32, i32) {
    %c0_i32 = arith.constant 0 : i32
    %c0_i32_0 = arith.constant 0 : i32
    return %arg0, %arg1, %c0_i32 : i32, i32, i32
  }
  func.func @transform_1(%arg0: i32, %arg1: i32) -> (i32, i32, i32) {
    %c0_i32 = arith.constant 0 : i32
    %c0_i32_0 = arith.constant 0 : i32
    %c0_i32_1 = arith.constant 0 : i32
    return %arg0, %c0_i32, %c0_i32_0 : i32, i32, i32
  }
  func.func @transform_2(%arg0: i32, %arg1: i32) -> (i32, i32, i32) {
    %c0_i32 = arith.constant 0 : i32
    %c0_i32_0 = arith.constant 0 : i32
    %c0_i32_1 = arith.constant 0 : i32
    return %arg0, %c0_i32, %c0_i32_0 : i32, i32, i32
  }
  func.func @transform_3(%arg0: i32, %arg1: i32) -> (i32, i32, i32) {
    %c0_i32 = arith.constant 0 : i32
    %c0_i32_0 = arith.constant 0 : i32
    return %arg0, %arg1, %c0_i32 : i32, i32, i32
  }
  func.func @transform_4(%arg0: i32, %arg1: i32) -> (i32, i32) {
    %c0_i32 = arith.constant 0 : i32
    %c0_i32_0 = arith.constant 0 : i32
    %c0_i32_1 = arith.constant 0 : i32
    return %c0_i32, %c0_i32_0 : i32, i32
  }
  func.func @transform_5(%arg0: i32, %arg1: i32) -> (i32, i32) {
    %c0_i32 = arith.constant 0 : i32
    %c0_i32_0 = arith.constant 0 : i32
    %c0_i32_1 = arith.constant 0 : i32
    return %c0_i32, %c0_i32_0 : i32, i32
  }
  func.func @transform_6(%arg0: i32, %arg1: i32) -> (i32, i32) {
    %c0_i32 = arith.constant 0 : i32
    %c0_i32_0 = arith.constant 0 : i32
    %c0_i32_1 = arith.constant 0 : i32
    return %c0_i32, %c0_i32_0 : i32, i32
  }
  func.func @transform_7(%arg0: i32, %arg1: i32) -> (i32, i32) {
    %c0_i32 = arith.constant 0 : i32
    %c0_i32_0 = arith.constant 0 : i32
    %c0_i32_1 = arith.constant 0 : i32
    return %c0_i32, %c0_i32_0 : i32, i32
  }
  func.func @transform_8(%arg0: i32, %arg1: i32) -> (i32, i32) {
    %c0_i32 = arith.constant 0 : i32
    %c0_i32_0 = arith.constant 0 : i32
    %c0_i32_1 = arith.constant 0 : i32
    return %c0_i32, %c0_i32_0 : i32, i32
  }
  func.func @transform_9(%arg0: i32, %arg1: i32) -> (i32, i32) {
    %c0_i32 = arith.constant 0 : i32
    %c0_i32_0 = arith.constant 0 : i32
    %c0_i32_1 = arith.constant 0 : i32
    return %c0_i32, %c0_i32_0 : i32, i32
  }
  func.func @transform_10(%arg0: i32, %arg1: i32) -> (i32, i32) {
    %c0_i32 = arith.constant 0 : i32
    %c0_i32_0 = arith.constant 0 : i32
    %c0_i32_1 = arith.constant 0 : i32
    return %c0_i32, %c0_i32_0 : i32, i32
  }
  func.func @transform_11(%arg0: i32, %arg1: i32) -> (i32, i32) {
    %c0_i32 = arith.constant 0 : i32
    %c0_i32_0 = arith.constant 0 : i32
    %c0_i32_1 = arith.constant 0 : i32
    return %c0_i32, %c0_i32_0 : i32, i32
  }
  func.func @transform_12(%arg0: i32, %arg1: i32) -> (i32, i32) {
    %c0_i32 = arith.constant 0 : i32
    %c0_i32_0 = arith.constant 0 : i32
    %c0_i32_1 = arith.constant 0 : i32
    return %c0_i32, %c0_i32_0 : i32, i32
  }
  func.func @transform_13(%arg0: i32, %arg1: i32) -> (i32, i32) {
    %c0_i32 = arith.constant 0 : i32
    %c0_i32_0 = arith.constant 0 : i32
    %c0_i32_1 = arith.constant 0 : i32
    return %c0_i32, %c0_i32_0 : i32, i32
  }
  func.func @transform_14(%arg0: i32, %arg1: i32) -> (i32, i32, i32) {
    %c0_i32 = arith.constant 0 : i32
    %c0_i32_0 = arith.constant 0 : i32
    return %arg0, %arg1, %c0_i32 : i32, i32, i32
  }
  func.func @transform_15(%arg0: i32, %arg1: i32) -> (i32, i32, i32, i32) {
    %c0_i32 = arith.constant 0 : i32
    %c0_i32_0 = arith.constant 0 : i32
    %c0_i32_1 = arith.constant 0 : i32
    return %arg0, %c0_i32, %arg1, %c0_i32_0 : i32, i32, i32, i32
  }
}

</mosaic_0001>

<bundles_post_ra>
// kernel: tpu_custom_call.1
= control target key start
LH: loop header
LB: loop body
LE: loop exit
PB: predicated region body
PF: predicated region fallthrough
CT: control target
= control target key end

     0   :  { %s8708_s0 = inlined_call_operand.hbm [shape: f32[2,8,512], index: 0, kind: input, shape index: {}]   ;;  %s8709_s1 = inlined_call_operand.hbm [shape: f32[2,8,512], index: 1, kind: input, shape index: {}]   ;;  %s8710_s2 = inlined_call_operand.hbm [shape: f32[2,8,512], index: 2, kind: input, shape index: {}]   ;;  %s8711_s3 = inlined_call_operand.vmem [shape: s8[2,8,8], index: 3, kind: input, shape index: {}]   ;;  %s8712_s4 = inlined_call_operand.hbm [shape: bf16[512,512], index: 4, kind: input, shape index: {}]   ;;  %s8713_s5 = inlined_call_operand.vmem [shape: f32[1,512], index: 5, kind: input, shape index: {}]   ;;  %s8714_s6 = inlined_call_operand.hbm [shape: bf16[512,512], index: 6, kind: input, shape index: {}]   ;;  %s8715_s7 = inlined_call_operand.vmem [shape: f32[1,512], index: 7, kind: input, shape index: {}]   ;;  %s8716_s8 = inlined_call_operand.hbm [shape: bf16[512,512], index: 8, kind: input, shape index: {}]   ;;  %s8717_s9 = inlined_call_operand.vmem [shape: f32[1,512], index: 9, kind: input, shape index: {}]   ;;  %s8718_s10 = inlined_call_operand.hbm [shape: bf16[512,512], index: 10, kind: input, shape index: {}]   ;;  %s8719_s11 = inlined_call_operand.vmem [shape: f32[1,512], index: 11, kind: input, shape index: {}]   ;;  %s8720_s12 = inlined_call_operand.vmem [shape: f32[1,512], index: 12, kind: input, shape index: {}]   ;;  %s8721_s13 = inlined_call_operand.vmem [shape: f32[1,512], index: 13, kind: input, shape index: {}]   ;;  %s8722_s14 = inlined_call_operand.hbm [shape: f32[2,8,512], index: 14, kind: output, shape index: {0}]   ;;  %s8723_s15 = inlined_call_operand.hbm [shape: f32[2,8,8,8], index: 15, kind: output, shape index: {1}]  }
   0x1   :  { %8752 = sst [smem:[#allocation31_spill]] %s8709_s1 }
   0x2   :  { %8753 = sst [smem:[#allocation32_spill]] %s8711_s3 }
   0x3   :  { %8754 = sst [smem:[#allocation33_spill]] %s8712_s4 }
   0x4   :  { %8755 = sst [smem:[#allocation34_spill]] %s8716_s8 }
   0x5   :  { %8756 = sst [smem:[#allocation35_spill]] %s8717_s9 }
   0x6   :  { %8757 = sst [smem:[#allocation36_spill]] %s8719_s11 }
   0x7   :  { %8758 = sst [smem:[#allocation37_spill]] %s8720_s12 }
   0x8   :  { %8759 = sst [smem:[#allocation38_spill]] %s8721_s13 }
   0x9   :  { %8760 = sst [smem:[#allocation39_spill]] %s8722_s14 }
   0xa   :  { %8761 = sst [smem:[#allocation40_spill]] %s8723_s15 }
   0xb   :  { %21 = vsyncpa [#allocation3], 0 }
   0xc   :  { %23 = vsyncpa [#allocation3 + $0x1], 0 }
   0xd   :  { %24 = vsyncpa [#allocation6], 0 }
   0xe   :  { %26 = vsyncpa [#allocation6 + $0x1], 0 }
   0xf   :  { %27 = vsyncpa [#allocation9], 0 }
  0x10   :  { %28 = vsyncpa [#allocation12], 0 }
  0x11   :  { %29 = vsyncpa [#allocation4], 0 }
  0x12   :  { %31 = vsyncpa [#allocation4 + $0x1], 0 }
  0x13   :  { %32 = vsyncpa [#allocation16], 0 }
  0x14   :  { %34 = vsyncpa [#allocation16 + $0x1], 0  ;;  %s7928_s18 = smov 0   ;;  %s7930_s19 = smov 0  }
  0x15   :  { %s7932_s20 = smov 0   ;;  %s7934_s21 = smov 0  }
  0x16   :  { %s7936_s22 = smov 0   ;;  %s7938_s23 = smov 0  }
  0x17 LB: > { %8762 = sst [smem:[#allocation23_spill]] %s7809_s18  ;;  %s7959_s24 = sadd.s32 4294967295, %s7829_s23   ;;  %s7829_s23 = sphi %s7938_s23, %s40_s23   ;;  %s7825_s22 = sphi %s7936_s22, %s8815_s22   ;;  %s7821_s21 = sphi %s7934_s21, %s8814_s21   ;;  %s7817_s20 = sphi %s7932_s20, %s8818_s20   ;;  %s7813_s19 = sphi %s7930_s19, %s8817_s19   ;;  %s7809_s18 = sphi %s7928_s18, %s8816_s18  }
  0x18   : > { %8763 = sst [smem:[#allocation24_spill]] %s7821_s21  ;;  %p5821_p0 = scmp.ge.s32.totalorder %s7829_s23, 1 }
  0x19   : > { %8764 = sst [smem:[#allocation25_spill]] %s7825_s22  ;;  %p8736_p1 = scmp.eq.s32.totalorder %s7959_s24, 0 }
  0x1a   : > { %8765 = sst [smem:[#allocation26_spill]] %s7829_s23  ;;  %p431_p2 = scmp.lt.s32.totalorder %s7829_s23, 3 }
  0x1b   : > { %s7831_s26 = smov [#allocation8]   ;;  %s7832_s29 = smov [#allocation11]  }
  0x1c   : > { %p7964_p3 = pnand %p5821_p0, %p431_p2  ;;  %s443_s27 = sshll.u32 %s7831_s26, 4  ;;  %s7968_s27 = int_to_ptr.vmem [resolvable:$true] %s443_s27 }
  0x1d   : > { %s475_s30 = sshll.u32 %s7832_s29, 4  ;;  %s8768_s4 = sld [smem:[#allocation33_spill]]  ;;  %s7979_s30 = int_to_ptr.vmem [resolvable:$true] %s475_s30 }
  0x1e   : > { %s8766_s25 = scalar_select %p7964_p3, 1, 0 }
  0x1f   : > { %p6585_p4 = pneg %p7964_p3 }
  0x21   : > { %p7975_p6 = pnand %p6585_p4, %p8736_p1 }
  0x23   : > { %s8767_s28 = scalar_select %p7975_p6, 1, 0 }
  0x24   : > { %s7501_s14 = scalar_lea.hbm %s8768_s4, 16384  ;;  %p7989_p8 = pneg %p7975_p6 }
  0x25   : > { %p7502_p7 = scmp.ne.s32.totalorder %s8768_s4, %s7501_s14  ;;  %p7508_p11 = scmp.lt.u32.totalorder %s7501_s14, %s8768_s4 }
  0x26   : > { %s8769_s12 = scalar_select %p7989_p8, 1, 0 }
  0x27   : > { %p7504_p9 = pnand %p7989_p8, %p7502_p7 }
  0x29   : > { %p7505_p10 = pneg %p7504_p9 }
  0x2b   : > { %p7510_p12 = pnand %p7508_p11, %p7505_p10 }
  0x2d   : > { %7513 = shalt.err (!%p7510_p12)
}
  0x2e   : > { %s7514_s13 = scalar_lea.vmem %s7968_s27, 16384  ;;  %p7522_p4 = scmp.lt.s32.totalorder %s7968_s27, %s7968_s27 }
  0x2f   : > { %p7515_p13 = scmp.ne.s32.totalorder %s7968_s27, %s7514_s13  ;;  %p7523_p5 = scmp.lt.s32.totalorder %s7514_s13, %s7514_s13 }
  0x31   : > { %p7517_p0 = pnand %p7515_p13, %p7989_p8  ;;  %p7524_p7 = por %p7523_p5, %p7522_p4 }
  0x33   : > { %p7518_p2 = pneg %p7517_p0 }
  0x35   : > { %p7525_p9 = pnand %p7524_p7, %p7518_p2 }
  0x37   : > { %7528 = shalt.err (!%p7525_p9)
}
  0x38   : > { %s8727_s16 = smov 256   ;;  %s8729_s14 = smov 16  }
  0x39   : > { %6588 = dma.hbm_to_vmem [thread:$0]  (!%p7975_p6), %s8768_s4, 16384, %s7968_s27, [#allocation9], %s8727_s16, %s8727_s16, %s8729_s14  }
  0x3a   : > { %s8770_s8 = sld [smem:[#allocation34_spill]] }
  0x40   : > { %s7529_s13 = scalar_lea.hbm %s8770_s8, 16384 }
  0x41   : > { %p7530_p5 = scmp.ne.s32.totalorder %s8770_s8, %s7529_s13  ;;  %p7536_p12 = scmp.lt.u32.totalorder %s7529_s13, %s8770_s8 }
  0x43   : > { %p7532_p10 = pnand %p7530_p5, %p7989_p8 }
  0x45   : > { %p7533_p11 = pneg %p7532_p10 }
  0x47   : > { %p7538_p13 = pnand %p7536_p12, %p7533_p11 }
  0x49   : > { %7541 = shalt.err (!%p7538_p13)
}
  0x4a   : > { %s7542_s27 = scalar_lea.vmem %s7979_s30, 16384  ;;  %p7550_p7 = scmp.lt.s32.totalorder %s7979_s30, %s7979_s30 }
  0x4b   : > { %p7543_p0 = scmp.ne.s32.totalorder %s7979_s30, %s7542_s27  ;;  %p7551_p9 = scmp.lt.s32.totalorder %s7542_s27, %s7542_s27 }
  0x4d   : > { %p7545_p2 = pnand %p7543_p0, %p7989_p8  ;;  %p7552_p5 = por %p7551_p9, %p7550_p7 }
  0x4f   : > { %p7546_p4 = pneg %p7545_p2 }
  0x51   : > { %p7553_p10 = pnand %p7552_p5, %p7546_p4 }
  0x53   : > { %7556 = shalt.err (!%p7553_p10)
}
  0x54   : > { %6594 = dma.hbm_to_vmem [thread:$0]  (!%p7975_p6), %s8770_s8, 16384, %s7979_s30, [#allocation12], %s8727_s16, %s8727_s16, %s8729_s14  }
  0x55   : > { %s5820_s11 = sadd.s32 4294967294, %s7829_s23   ;;  %s52_s21 = sadd.s32 1, %s7825_s22 }
  0x56   : > { %p54_p11 = scmp.ge.s32.totalorder %s52_s21, 2  ;;  %s61_s15 = sadd.s32 1, %s7817_s20 }
  0x57   : > { %p68_p12 = scmp.ne.s32.totalorder %s7817_s20, %s7813_s19  ;;  %p69_p13 = scmp.eq.s32.totalorder %s7829_s23, 0 }
  0x58   : > { %s8820_s21 = smov (%p54_p11, %s52_s21), 0  ;;  %p74_p2 = scmp.ne.s32.totalorder %s7813_s19, %s7809_s18 }
  0x59   : > { %8771 = sst [smem:[#allocation27_spill]] %s8820_s21  ;;  %p8047_p0 = por %p69_p13, %p68_p12 }
  0x5a   : > { %s56_s30 = ssub.s32 %s7825_s22, %s8820_s21  ;;  %p390_p4 = scmp.eq.s32.totalorder %s7959_s24, 1 }
  0x5b   : > { %p59_p7 = scmp.eq.s32.totalorder %s56_s30, 0  ;;  %p8058_p9 = por %p8736_p1, %p74_p2 }
  0x5c   : > { %p8062_p5 = por %p390_p4, %p68_p12  ;;  %p396_p10 = scmp.eq.s32.totalorder %s5820_s11, 1 }
  0x5d   : > { %s8773_s26 = scalar_select %p8058_p9, 1, 0 }
  0x5e   : > { %s8774_s29 = scalar_select %p8062_p5, 1, 0 }
  0x5f   : > { %s8067_s13 = scalar_select %p59_p7, %s7817_s20, %s61_s15  }
  0x60   : > { %8775 = sst [smem:[#allocation28_spill]] %s8774_s29  ;;  %p8069_p11 = por %p396_p10, %p74_p2 }
  0x61   : > { %8776 = sst [smem:[#allocation29_spill]] %s8067_s13  ;;  %p6619_p13 = scmp.lt.s32.totalorder %s7829_s23, 2 }
  0x62   : > { %s8777_s27 = scalar_select %p8069_p11, 1, 0 }
  0x63   : > { %s8731_s3 = sand.u32 1, %s7817_s20   ;;  %s8076_s9 = sshll.u32 %s7825_s22, 9 }
  0x64   : > { %8778 = sst [smem:[#allocation30_spill]] %s8777_s27  ;;  %s8080_s30 = sshll.u32 %s8731_s3, 5 }
  0x65   : > { %p8084_p12 = pnand %p6619_p13, %p8047_p0  ;;  %s535_s11 = sand.u32 1, %s7829_s23  }
  0x66   : > { %s8780_s1 = sld [smem:[#allocation31_spill]]  ;;  %s539_s8 = scalar_lea.vmem [#allocation5], %s8080_s30 }
  0x67   : > { %s8779_s16 = scalar_select %p8084_p12, 1, 0 }
  0x68   : > { %s547_s3 = sshll.u32 %s539_s8, 4  ;;  %s8098_s17 = scalar_lea.sflag [#allocation6], %s535_s11  ;;  %s8096_s3 = int_to_ptr.vmem [resolvable:$true] %s547_s3 }
  0x69   : > { %p8104_p2 = pneg %p8084_p12 }
  0x6b   : > { %s8781_s22 = scalar_select %p8104_p2, 1, 0 }
  0x6c   : > { %s8093_s4 = scalar_lea.hbm %s8780_s1, %s8076_s9  ;;  %s7562_s13 = scalar_lea.hbm %s8780_s1, 1024 }
  0x6d   : > { %s7557_s21 = scalar_lea.hbm %s8093_s4, 512  ;;  %p7563_p10 = scmp.lt.u32.totalorder %s8093_s4, %s8780_s1 }
  0x6e   : > { %p7558_p0 = scmp.ne.s32.totalorder %s8093_s4, %s7557_s21  ;;  %p7564_p13 = scmp.lt.u32.totalorder %s7562_s13, %s7557_s21 }
  0x6f   : > { %p7566_p11 = scmp.lt.u32.totalorder %s7557_s21, %s8093_s4 }
  0x70   : > { %p7560_p4 = pnand %p8104_p2, %p7558_p0  ;;  %p7565_p1 = por %p7564_p13, %p7563_p10 }
  0x72   : > { %p7561_p7 = pneg %p7560_p4  ;;  %p7567_p5 = por %p7566_p11, %p7565_p1 }
  0x74   : > { %p7568_p9 = pnand %p7567_p5, %p7561_p7 }
  0x76   : > { %7571 = shalt.err (!%p7568_p9)
}
  0x77   : > { %s7572_s11 = scalar_lea.vmem %s8096_s3, 512  ;;  %s7835_s14 = smov [#allocation5]  }
  0x78   : > { %p7573_p0 = scmp.ne.s32.totalorder %s8096_s3, %s7572_s11  ;;  %s7577_s15 = sshll.u32 %s7835_s14, 4  ;;  %s7578_s15 = int_to_ptr.vmem [resolvable:$false] %s7577_s15 }
  0x79   : > { %s7579_s23 = scalar_lea.vmem %s7578_s15, 1024  ;;  %p7580_p6 = scmp.lt.s32.totalorder %s8096_s3, %s7578_s15 }
  0x7a   : > { %p7575_p4 = pnand %p7573_p0, %p8104_p2  ;;  %p7581_p8 = scmp.lt.s32.totalorder %s7579_s23, %s7572_s11 }
  0x7c   : > { %p7576_p3 = pneg %p7575_p4  ;;  %p7582_p10 = por %p7581_p8, %p7580_p6 }
  0x7e   : > { %p7583_p13 = pnand %p7582_p10, %p7576_p3 }
  0x80   : > { %7586 = shalt.err (!%p7583_p13)
}
  0x81   : > { %6604 = dma.hbm_to_vmem [thread:$0]  (!%p8084_p12), %s8093_s4, 512, %s8096_s3, %s8098_s17  }
  0x82   : > { %s7836_s21 = smov [#allocation10]   ;;  %s7837_s8 = smov [#allocation13]  }
  0x83   : > { %s459_s13 = sshll.u32 %s7836_s21, 4  ;;  %s491_s1 = sshll.u32 %s7837_s8, 4  ;;  %s460_s13 = int_to_ptr.vmem [resolvable:$true] %s459_s13  ;;  %s492_s1 = int_to_ptr.vmem [resolvable:$true] %s491_s1 }
  0x84   : > { %s7587_s15 = scalar_lea.hbm %s8714_s6, 16384  ;;  %p8782_p3 = scmp.ne.s32.totalorder %s8769_s12, 0 }
  0x85   : > { %p7588_p1 = scmp.ne.s32.totalorder %s8714_s6, %s7587_s15  ;;  %p7594_p9 = scmp.lt.u32.totalorder %s7587_s15, %s8714_s6 }
  0x87   : > { %p7590_p6 = pnand %p7588_p1, %p8782_p3 }
  0x89   : > { %p7591_p8 = pneg %p7590_p6 }
  0x8b   : > { %p7596_p5 = pnand %p7594_p9, %p7591_p8 }
  0x8d   : > { %7599 = shalt.err (!%p7596_p5)
}
  0x8e   : > { %s7600_s4 = scalar_lea.vmem %s460_s13, 16384  ;;  %p7608_p4 = scmp.lt.s32.totalorder %s460_s13, %s460_s13 }
  0x8f   : > { %p7601_p11 = scmp.ne.s32.totalorder %s460_s13, %s7600_s4  ;;  %p7609_p10 = scmp.lt.s32.totalorder %s7600_s4, %s7600_s4 }
  0x91   : > { %p7603_p7 = pnand %p7601_p11, %p8782_p3  ;;  %p7610_p13 = por %p7609_p10, %p7608_p4 }
  0x93   : > { %p7604_p0 = pneg %p7603_p7 }
  0x95   : > { %p7611_p12 = pnand %p7610_p13, %p7604_p0 }
  0x97   : > { %7614 = shalt.err (!%p7611_p12)
}
  0x98   : > { %p8783_p1 = scmp.ne.s32.totalorder %s8767_s28, 0  ;;  %s8784_s27 = smov 16  }
  0x99   : > { %s8785_s3 = smov 256   ;;  %s7615_s14 = scalar_lea.hbm %s8718_s10, 16384 }
  0x9a   : > { %6591 = dma.hbm_to_vmem [thread:$0]  (!%p8783_p1), %s8714_s6, 16384, %s460_s13, [#allocation9], %s8785_s3, %s8785_s3, %s8784_s27  }
  0x9b   : > { %p7616_p6 = scmp.ne.s32.totalorder %s8718_s10, %s7615_s14  ;;  %p7622_p9 = scmp.lt.u32.totalorder %s7615_s14, %s8718_s10 }
  0x9d   : > { %p7618_p12 = pnand %p7616_p6, %p8782_p3 }
  0x9f   : > { %p7619_p8 = pneg %p7618_p12 }
  0xa1   : > { %p7624_p5 = pnand %p7622_p9, %p7619_p8 }
  0xa3   : > { %7627 = shalt.err (!%p7624_p5)
}
  0xa4   : > { %s7628_s18 = scalar_lea.vmem %s492_s1, 16384  ;;  %p7636_p4 = scmp.lt.s32.totalorder %s492_s1, %s492_s1 }
  0xa5   : > { %p7629_p11 = scmp.ne.s32.totalorder %s492_s1, %s7628_s18  ;;  %p7637_p10 = scmp.lt.s32.totalorder %s7628_s18, %s7628_s18 }
  0xa7   : > { %p7631_p7 = pnand %p7629_p11, %p8782_p3  ;;  %p7638_p13 = por %p7637_p10, %p7636_p4 }
  0xa9   : > { %p7632_p0 = pneg %p7631_p7 }
  0xab   : > { %p7639_p2 = pnand %p7638_p13, %p7632_p0 }
  0xad   : > { %7642 = shalt.err (!%p7639_p2)
}
  0xae   : > { %6597 = dma.hbm_to_vmem [thread:$0]  (!%p8783_p1), %s8718_s10, 16384, %s492_s1, [#allocation12], %s8785_s3, %s8785_s3, %s8784_s27  }
  0xaf   : > { %s8174_s8 = scalar_lea.hbm %s8708_s0, %s8076_s9  ;;  %s518_s28 = scalar_lea.vmem [#allocation2], %s8080_s30 }
  0xb0   : > { %s528_s14 = sshll.u32 %s518_s28, 4  ;;  %s8183_s23 = scalar_lea.hbm %s8710_s2, %s8076_s9  ;;  %s8177_s14 = int_to_ptr.vmem [resolvable:$true] %s528_s14 }
  0xb1   : > { %s8786_s4 = sand.u32 1, %s7817_s20   ;;  %s7643_s27 = scalar_lea.hbm %s8174_s8, 512 }
  0xb2   : > { %s515_s1 = scalar_lea.sflag [#allocation3], %s8786_s4  ;;  %p7644_p2 = scmp.ne.s32.totalorder %s8174_s8, %s7643_s27 }
  0xb3   : > { %p8787_p3 = scmp.ne.s32.totalorder %s8781_s22, 0  ;;  %s7648_s13 = scalar_lea.hbm %s8708_s0, 1024 }
  0xb4   : > { %p7649_p12 = scmp.lt.u32.totalorder %s8174_s8, %s8708_s0  ;;  %p7650_p8 = scmp.lt.u32.totalorder %s7648_s13, %s7643_s27 }
  0xb5   : > { %p7646_p1 = pnand %p7644_p2, %p8787_p3  ;;  %p7652_p5 = scmp.lt.u32.totalorder %s7643_s27, %s8174_s8 }
  0xb6   : > { %p7651_p9 = por %p7650_p8, %p7649_p12 }
  0xb7   : > { %p7647_p6 = pneg %p7646_p1 }
  0xb8   : > { %p7653_p11 = por %p7652_p5, %p7651_p9 }
  0xba   : > { %p7654_p7 = pnand %p7653_p11, %p7647_p6 }
  0xbc   : > { %7657 = shalt.err (!%p7654_p7)
}
  0xbd   : > { %s7658_s9 = scalar_lea.vmem %s8177_s14, 512  ;;  %s7838_s21 = smov [#allocation2]  }
  0xbe   : > { %p7659_p0 = scmp.ne.s32.totalorder %s8177_s14, %s7658_s9  ;;  %s7663_s28 = sshll.u32 %s7838_s21, 4  ;;  %s7664_s28 = int_to_ptr.vmem [resolvable:$false] %s7663_s28 }
  0xbf   : > { %s7665_s15 = scalar_lea.vmem %s7664_s28, 1024  ;;  %p7666_p13 = scmp.lt.s32.totalorder %s8177_s14, %s7664_s28 }
  0xc0   : > { %p7661_p4 = pnand %p7659_p0, %p8787_p3  ;;  %p7667_p2 = scmp.lt.s32.totalorder %s7665_s15, %s7658_s9 }
  0xc2   : > { %p7662_p10 = pneg %p7661_p4  ;;  %p7668_p1 = por %p7667_p2, %p7666_p13 }
  0xc4   : > { %p7669_p12 = pnand %p7668_p1, %p7662_p10 }
  0xc6   : > { %7672 = shalt.err (!%p7669_p12)
}
  0xc7   : > { %p8788_p6 = scmp.ne.s32.totalorder %s8779_s16, 0  ;;  %s558_s11 = scalar_lea.vmem [#allocation7], %s8080_s30 }
  0xc8   : > { %s566_s4 = sshll.u32 %s558_s11, 4  ;;  %s7673_s27 = scalar_lea.hbm %s8183_s23, 512  ;;  %s567_s4 = int_to_ptr.vmem [resolvable:$true] %s566_s4 }
  0xc9   : > { %6601 = dma.hbm_to_vmem [thread:$0]  (!%p8788_p6), %s8174_s8, 512, %s8177_s14, %s515_s1  }
  0xca   : > { %p7674_p8 = scmp.ne.s32.totalorder %s8183_s23, %s7673_s27  ;;  %s7678_s13 = scalar_lea.hbm %s8710_s2, 1024 }
  0xcb   : > { %p7679_p11 = scmp.lt.u32.totalorder %s8183_s23, %s8710_s2  ;;  %p7680_p7 = scmp.lt.u32.totalorder %s7678_s13, %s7673_s27 }
  0xcc   : > { %p7676_p9 = pnand %p7674_p8, %p8787_p3  ;;  %p7682_p4 = scmp.lt.u32.totalorder %s7673_s27, %s8183_s23 }
  0xcd   : > { %p7681_p0 = por %p7680_p7, %p7679_p11 }
  0xce   : > { %p7677_p5 = pneg %p7676_p9 }
  0xcf   : > { %p7683_p10 = por %p7682_p4, %p7681_p0 }
  0xd1   : > { %p7684_p13 = pnand %p7683_p10, %p7677_p5 }
  0xd3   : > { %7687 = shalt.err (!%p7684_p13)
}
  0xd4   : > { %s7688_s30 = scalar_lea.vmem %s567_s4, 512  ;;  %s7839_s8 = smov [#allocation7]  }
  0xd5   : > { %p7689_p2 = scmp.ne.s32.totalorder %s567_s4, %s7688_s30  ;;  %s7693_s14 = sshll.u32 %s7839_s8, 4  ;;  %s7694_s14 = int_to_ptr.vmem [resolvable:$false] %s7693_s14 }
  0xd6   : > { %s7695_s1 = scalar_lea.vmem %s7694_s14, 1024  ;;  %p7696_p8 = scmp.lt.s32.totalorder %s567_s4, %s7694_s14 }
  0xd7   : > { %p7691_p1 = pnand %p7689_p2, %p8787_p3  ;;  %p7697_p9 = scmp.lt.s32.totalorder %s7695_s1, %s7688_s30 }
  0xd9   : > { %p7692_p12 = pneg %p7691_p1  ;;  %p7698_p6 = por %p7697_p9, %p7696_p8 }
  0xdb   : > { %p7699_p7 = pnand %p7698_p6, %p7692_p12 }
  0xdd   : > { %7702 = shalt.err (!%p7699_p7)
}
  0xde   : > { %p8789_p11 = scmp.ne.s32.totalorder %s8779_s16, 0  ;;  %p8790_p5 = scmp.ne.s32.totalorder %s8766_s25, 0 }
  0xdf   : > { %s8230_s22 = sand.u32 (!%p8790_p5), 1, %s7813_s19   ;;  %p8791_p3 = scmp.ne.s32.totalorder (!%p8790_p5), %s8773_s26, 0 }
  0xe0   : > { %6607 = dma.hbm_to_vmem [thread:$0]  (!%p8789_p11), %s8183_s23, 512, %s567_s4, %s8098_s17  }
  0xe1   : > { %585 = sbr.rel (%p8790_p5) target bundleno = 2404 (0x964), region = 76  ;;  %s8233_s9 = sshll.u32 (!%p8790_p5), %s8230_s22, 5 }
  0xe2   : > { %s588_s21 = scalar_lea.sflag (!%p8790_p5), [#allocation3], %s8230_s22  ;;  %s8237_s28 = scalar_lea.vmem (!%p8790_p5), [#allocation2], %s8233_s9 }
  0xe8   : > { %7784 = dma.done.wait (%p8791_p3), %s588_s21, 512  }
  0xe9   : > { %7786 = vsyncadd (%p8791_p3), %s588_s21, 4294966784  ;;  %s596_s25 = sand.u32 1, %s7959_s24   ;;  %s8245_s17 = scalar_lea.vmem [#allocation5], %s8233_s9 }
  0xea   : > { %s597_s16 = scalar_lea.sflag [#allocation6], %s596_s25 }
  0xeb   : > { %7788 = dma.done.wait (%p8791_p3), %s597_s16, 1024  }
  0xec   : > { %7790 = vsyncadd (%p8791_p3), %s597_s16, 4294966272  ;;  %s8252_s23 = scalar_lea.vmem [#allocation7], %s8233_s9  ;;  %p8792_p6 = scmp.eq.s32.totalorder %s7959_s24, 0 }
  0xee   : > { %7792 = dma.done.wait (%p8792_p6), [#allocation9], 32768   ;;  %p8793_p0 = pmov %p8792_p6 }
  0xf0   : > { %7794 = vsyncadd (%p8793_p0), [#allocation9], 4294934528  ;;  %p8794_p4 = pmov %p8793_p0 }
  0xf1   : > { %p8795_p10 = pmov %p8793_p0 }
  0xf2   : > { %7796 = dma.done.wait (%p8794_p4), [#allocation12], 32768  }
  0xf3   : > { %7798 = vsyncadd (%p8795_p10), [#allocation12], 4294934528  ;;  %v6695_v0 = vld [vmem:[#allocation8 + $0x4] ss:$16 sps:$4 sm:$0xff]   ;;  %v6697_v1 = vld [vmem:[#allocation8 + $0xc] ss:$16 sps:$4 sm:$0xff]  }
  0xf4   : > { %1520 = vmatprep.subr.bf16.mxu0 %v6695_v0  ;;  %v6699_v2 = vld [vmem:[#allocation8] ss:$16 sps:$4 sm:$0xff]   ;;  %v6700_v3 = vld [vmem:[#allocation8 + $0x8] ss:$16 sps:$4 sm:$0xff]   ;;  %1602 = vmatprep.subr.bf16.mxu1 %v6697_v1  ;;  %v6701_v4 = vld [vmem:[#allocation8 + $0x24] ss:$16 sps:$4 sm:$0xff]  }
  0xf5   : > { %1521 = vmatpush1.bf16.msra.mxu0 %v6699_v2  ;;  %1603 = vmatpush1.bf16.msra.mxu1 %v6700_v3  ;;  %v6703_v5 = vld [vmem:[#allocation8 + $0x2c] ss:$16 sps:$4 sm:$0xff]   ;;  %v6705_v6 = vld [vmem:[#allocation8 + $0x20] ss:$16 sps:$4 sm:$0xff]   ;;  %v6706_v7 = vld [vmem:[#allocation8 + $0x28] ss:$16 sps:$4 sm:$0xff]  }
  0xf6   : > { %1522 = vmatprep.subr.bf16.mxu0 %v6701_v4  ;;  %1604 = vmatprep.subr.bf16.mxu1 %v6703_v5  ;;  %v6707_v8 = vld [vmem:[#allocation8 + $0x44] ss:$16 sps:$4 sm:$0xff]   ;;  %v6709_v9 = vld [vmem:[#allocation8 + $0x4c] ss:$16 sps:$4 sm:$0xff]   ;;  %v6711_v10 = vld [vmem:[#allocation8 + $0x40] ss:$16 sps:$4 sm:$0xff]  }
  0xf7   : > { %v6712_v11 = vld [vmem:[#allocation8 + $0x48] ss:$16 sps:$4 sm:$0xff]   ;;  %v6713_v12 = vld [vmem:[#allocation8 + $0x64] ss:$16 sps:$4 sm:$0xff]   ;;  %v6715_v13 = vld [vmem:[#allocation8 + $0x6c] ss:$16 sps:$4 sm:$0xff]  }
  0xf8   : > { %v6717_v14 = vld [vmem:[#allocation8 + $0x60] ss:$16 sps:$4 sm:$0xff]   ;;  %v6718_v15 = vld [vmem:[#allocation8 + $0x68] ss:$16 sps:$4 sm:$0xff]   ;;  %v6719_v16 = vld [vmem:[#allocation8 + $0x84] ss:$16 sps:$4 sm:$0xff]  }
  0xf9   : > { %1523 = vmatpush1.bf16.msra.mxu0 %v6705_v6  ;;  %1605 = vmatpush1.bf16.msra.mxu1 %v6706_v7  ;;  %v6721_v17 = vld [vmem:[#allocation8 + $0x8c] ss:$16 sps:$4 sm:$0xff]   ;;  %v6723_v18 = vld [vmem:[#allocation8 + $0x80] ss:$16 sps:$4 sm:$0xff]   ;;  %v6724_v19 = vld [vmem:[#allocation8 + $0x88] ss:$16 sps:$4 sm:$0xff]  }
  0xfa   : > { %1524 = vmatprep.subr.bf16.mxu0 %v6707_v8  ;;  %1606 = vmatprep.subr.bf16.mxu1 %v6709_v9  ;;  %v6725_v20 = vld [vmem:[#allocation8 + $0xa4] ss:$16 sps:$4 sm:$0xff]   ;;  %v6727_v21 = vld [vmem:[#allocation8 + $0xac] ss:$16 sps:$4 sm:$0xff]   ;;  %v6729_v22 = vld [vmem:[#allocation8 + $0xa0] ss:$16 sps:$4 sm:$0xff]  }
  0xfb   : > { %v6730_v23 = vld [vmem:[#allocation8 + $0xa8] ss:$16 sps:$4 sm:$0xff]   ;;  %v6731_v24 = vld [vmem:[#allocation8 + $0xc4] ss:$16 sps:$4 sm:$0xff]   ;;  %v6733_v25 = vld [vmem:[#allocation8 + $0xcc] ss:$16 sps:$4 sm:$0xff]  }
  0xfc   : > { %v6735_v26 = vld [vmem:[#allocation8 + $0xc0] ss:$16 sps:$4 sm:$0xff]   ;;  %v6736_v27 = vld [vmem:[#allocation8 + $0xc8] ss:$16 sps:$4 sm:$0xff]   ;;  %v6737_v28 = vld [vmem:[#allocation8 + $0xe4] ss:$16 sps:$4 sm:$0xff]  }
  0xfd   : > { %1525 = vmatpush1.bf16.msra.mxu0 %v6711_v10  ;;  %1607 = vmatpush1.bf16.msra.mxu1 %v6712_v11  ;;  %v6739_v29 = vld [vmem:[#allocation8 + $0xec] ss:$16 sps:$4 sm:$0xff]   ;;  %v6741_v30 = vld [vmem:[#allocation8 + $0xe0] ss:$16 sps:$4 sm:$0xff]   ;;  %v6742_v31 = vld [vmem:[#allocation8 + $0xe8] ss:$16 sps:$4 sm:$0xff]  }
  0xfe   : > { %1526 = vmatprep.subr.bf16.mxu0 %v6713_v12  ;;  %1608 = vmatprep.subr.bf16.mxu1 %v6715_v13  ;;  %v6743_v32 = vld [vmem:[#allocation8 + $0x104] ss:$16 sps:$4 sm:$0xff]   ;;  %v6745_v33 = vld [vmem:[#allocation8 + $0x10c] ss:$16 sps:$4 sm:$0xff]   ;;  %v6747_v34 = vld [vmem:[#allocation8 + $0x100] ss:$16 sps:$4 sm:$0xff]  }
  0xff   : > { %v6748_v35 = vld [vmem:[#allocation8 + $0x108] ss:$16 sps:$4 sm:$0xff]   ;;  %v6749_v36 = vld [vmem:[#allocation8 + $0x124] ss:$16 sps:$4 sm:$0xff]   ;;  %v6751_v37 = vld [vmem:[#allocation8 + $0x12c] ss:$16 sps:$4 sm:$0xff]  }
 0x100   : > { %v6753_v38 = vld [vmem:[#allocation8 + $0x120] ss:$16 sps:$4 sm:$0xff]   ;;  %v6754_v39 = vld [vmem:[#allocation8 + $0x128] ss:$16 sps:$4 sm:$0xff]   ;;  %v6755_v40 = vld [vmem:[#allocation8 + $0x144] ss:$16 sps:$4 sm:$0xff]  }
 0x101   : > { %1527 = vmatpush1.bf16.msra.mxu0 %v6717_v14  ;;  %1609 = vmatpush1.bf16.msra.mxu1 %v6718_v15  ;;  %v6757_v41 = vld [vmem:[#allocation8 + $0x14c] ss:$16 sps:$4 sm:$0xff]   ;;  %v6759_v42 = vld [vmem:[#allocation8 + $0x140] ss:$16 sps:$4 sm:$0xff]   ;;  %v6760_v43 = vld [vmem:[#allocation8 + $0x148] ss:$16 sps:$4 sm:$0xff]  }
 0x102   : > { %1528 = vmatprep.subr.bf16.mxu0 %v6719_v16  ;;  %1610 = vmatprep.subr.bf16.mxu1 %v6721_v17  ;;  %v6761_v44 = vld [vmem:[#allocation8 + $0x164] ss:$16 sps:$4 sm:$0xff]   ;;  %v6763_v45 = vld [vmem:[#allocation8 + $0x16c] ss:$16 sps:$4 sm:$0xff]   ;;  %v6765_v47 = vld [vmem:[#allocation8 + $0x160] ss:$16 sps:$4 sm:$0xff]  }
 0x103   : > { %v705_v46 = vld [vmem:[%s8237_s28 + $0x8] sm:$0xff]  ;;  %v6767_v50 = vld [vmem:[#allocation8 + $0x184] ss:$16 sps:$4 sm:$0xff]   ;;  %v6771_v52 = vld [vmem:[#allocation8 + $0x180] ss:$16 sps:$4 sm:$0xff]   ;;  %vm7841_vm0 = vmmov 0  }
 0x104   : > { %v719_v48 = vpack.c.bf16 %v705_v46, %v705_v46  ;;  %v6766_v49 = vld [vmem:[#allocation8 + $0x168] ss:$16 sps:$4 sm:$0xff]   ;;  %v6769_v51 = vld [vmem:[#allocation8 + $0x18c] ss:$16 sps:$4 sm:$0xff]   ;;  %v6773_v54 = vld [vmem:[#allocation8 + $0x1a4] ss:$16 sps:$4 sm:$0xff]  }
 0x105   : > { %1529 = vmatpush1.bf16.msra.mxu0 %v6723_v18  ;;  %1611 = vmatpush1.bf16.msra.mxu1 %v6724_v19  ;;  %v6772_v53 = vld [vmem:[#allocation8 + $0x188] ss:$16 sps:$4 sm:$0xff]   ;;  %v6775_v55 = vld [vmem:[#allocation8 + $0x1ac] ss:$16 sps:$4 sm:$0xff]   ;;  %v6777_v56 = vld [vmem:[#allocation8 + $0x1a0] ss:$16 sps:$4 sm:$0xff]  }
 0x106   : > { %1530 = vmatprep.subr.bf16.mxu0 %v6725_v20  ;;  %1612 = vmatprep.subr.bf16.mxu1 %v6727_v21  ;;  %v6778_v57 = vld [vmem:[#allocation8 + $0x1a8] ss:$16 sps:$4 sm:$0xff]   ;;  %v6779_v58 = vld [vmem:[#allocation8 + $0x1c4] ss:$16 sps:$4 sm:$0xff]   ;;  %v6781_v59 = vld [vmem:[#allocation8 + $0x1cc] ss:$16 sps:$4 sm:$0xff]  }
 0x107   : > { %1552 = vmatprep.mubr.bf16.mxu0 %v719_v48  ;;  %1634 = vmatprep.mubr.bf16.mxu1 %v719_v48  ;;  %v6783_v60 = vld [vmem:[#allocation8 + $0x1c0] ss:$16 sps:$4 sm:$0xff]   ;;  %v6784_v61 = vld [vmem:[#allocation8 + $0x1c8] ss:$16 sps:$4 sm:$0xff]   ;;  %v6785_v62 = vld [vmem:[#allocation8 + $0x1e4] ss:$16 sps:$4 sm:$0xff]  }
 0x108   : > { %v6787_v63 = vld [vmem:[#allocation8 + $0x1ec] ss:$16 sps:$4 sm:$0xff]   ;;  %v6789_v0 = vld [vmem:[#allocation8 + $0x1e0] ss:$16 sps:$4 sm:$0xff]   ;;  %v6790_v1 = vld [vmem:[#allocation8 + $0x1e8] ss:$16 sps:$4 sm:$0xff]  }
 0x109   : > { %1531 = vmatpush1.bf16.msra.mxu0 %v6729_v22  ;;  %1613 = vmatpush1.bf16.msra.mxu1 %v6730_v23  ;;  %v704_v2 = vld [vmem:[%s8237_s28] sm:$0xff]  ;;  %v6796_v4 = vld [vmem:[#allocation8 + $0x20c] ss:$16 sps:$4 sm:$0xff]   ;;  %v6794_v7 = vld [vmem:[#allocation8 + $0x208] ss:$16 sps:$4 sm:$0xff]   ;;  %vm3604_vm1 = vcmask 523264  }
 0x10a   : > { %1532 = vmatprep.subr.bf16.mxu0 %v6731_v24  ;;  %1614 = vmatprep.subr.bf16.mxu1 %v6733_v25  ;;  %v6793_v3 = vld [vmem:[#allocation8 + $0x204] ss:$16 sps:$4 sm:$0xff]   ;;  %v718_v5 = vpack.c.bf16 %v704_v2, %v704_v2  ;;  %v6791_v6 = vld [vmem:[#allocation8 + $0x200] ss:$16 sps:$4 sm:$0xff]   ;;  %v6802_v9 = vld [vmem:[#allocation8 + $0x22c] ss:$16 sps:$4 sm:$0xff]  }
 0x10b   : > { %v6799_v8 = vld [vmem:[#allocation8 + $0x224] ss:$16 sps:$4 sm:$0xff]   ;;  %v6797_v10 = vld [vmem:[#allocation8 + $0x220] ss:$16 sps:$4 sm:$0xff]   ;;  %v6800_v11 = vld [vmem:[#allocation8 + $0x228] ss:$16 sps:$4 sm:$0xff]  }
 0x10c   : > { %v6805_v12 = vld [vmem:[#allocation8 + $0x244] ss:$16 sps:$4 sm:$0xff]   ;;  %v6808_v13 = vld [vmem:[#allocation8 + $0x24c] ss:$16 sps:$4 sm:$0xff]   ;;  %v6803_v14 = vld [vmem:[#allocation8 + $0x240] ss:$16 sps:$4 sm:$0xff]  }
 0x10d   : > { %1533 = vmatpush1.bf16.msra.mxu0 %v6735_v26  ;;  %1615 = vmatpush1.bf16.msra.mxu1 %v6736_v27  ;;  %v6806_v15 = vld [vmem:[#allocation8 + $0x248] ss:$16 sps:$4 sm:$0xff]   ;;  %v6811_v16 = vld [vmem:[#allocation8 + $0x264] ss:$16 sps:$4 sm:$0xff]   ;;  %v6814_v17 = vld [vmem:[#allocation8 + $0x26c] ss:$16 sps:$4 sm:$0xff]  }
 0x10e   : > { %1534 = vmatprep.subr.bf16.mxu0 %v6737_v28  ;;  %1616 = vmatprep.subr.bf16.mxu1 %v6739_v29  ;;  %v6809_v18 = vld [vmem:[#allocation8 + $0x260] ss:$16 sps:$4 sm:$0xff]   ;;  %v6812_v19 = vld [vmem:[#allocation8 + $0x268] ss:$16 sps:$4 sm:$0xff]   ;;  %v6817_v20 = vld [vmem:[#allocation8 + $0x284] ss:$16 sps:$4 sm:$0xff]  }
 0x10f   : > { %v6820_v21 = vld [vmem:[#allocation8 + $0x28c] ss:$16 sps:$4 sm:$0xff]   ;;  %v6815_v22 = vld [vmem:[#allocation8 + $0x280] ss:$16 sps:$4 sm:$0xff]   ;;  %v6818_v23 = vld [vmem:[#allocation8 + $0x288] ss:$16 sps:$4 sm:$0xff]  }
 0x110   : > { %v6823_v24 = vld [vmem:[#allocation8 + $0x2a4] ss:$16 sps:$4 sm:$0xff]   ;;  %v6826_v25 = vld [vmem:[#allocation8 + $0x2ac] ss:$16 sps:$4 sm:$0xff]   ;;  %v6821_v26 = vld [vmem:[#allocation8 + $0x2a0] ss:$16 sps:$4 sm:$0xff]  }
 0x111   : > { %1535 = vmatpush1.bf16.msra.mxu0 %v6741_v30  ;;  %1617 = vmatpush1.bf16.msra.mxu1 %v6742_v31  ;;  %v6824_v27 = vld [vmem:[#allocation8 + $0x2a8] ss:$16 sps:$4 sm:$0xff]   ;;  %v6829_v28 = vld [vmem:[#allocation8 + $0x2c4] ss:$16 sps:$4 sm:$0xff]   ;;  %v6832_v29 = vld [vmem:[#allocation8 + $0x2cc] ss:$16 sps:$4 sm:$0xff]  }
 0x112   : > { %1536 = vmatprep.subr.bf16.mxu0 %v6743_v32  ;;  %1618 = vmatprep.subr.bf16.mxu1 %v6745_v33  ;;  %v707_v30 = vld [vmem:[%s8237_s28 + $0x18] sm:$0xff]  ;;  %v6827_v31 = vld [vmem:[#allocation8 + $0x2c0] ss:$16 sps:$4 sm:$0xff]   ;;  %v6853_v46 = vld [vmem:[#allocation8 + $0x344] ss:$16 sps:$4 sm:$0xff]   ;;  %s7842_s4 = smov 64  }
 0x113   : > { %v6830_v32 = vld [vmem:[#allocation8 + $0x2c8] ss:$16 sps:$4 sm:$0xff]   ;;  %v721_v33 = vpack.c.bf16 %v707_v30, %v707_v30  ;;  %v6851_v48 = vld [vmem:[#allocation8 + $0x340] ss:$16 sps:$4 sm:$0xff]   ;;  %v6883_v2 = vld [vmem:[#allocation8 + $0x3e4] ss:$16 sps:$4 sm:$0xff]  }
 0x114   : > { %v6919_v30 = vld [vmem:[#allocation10 + $0xa4] ss:$16 sps:$4 sm:$0xff]   ;;  %s8796_s18 = sld [smem:[#allocation35_spill]]  ;;  %vm3672_vm2 = vcmask 1043456   ;;  %s8797_s13 = sld [smem:[#allocation24_spill]]  ;;  %vm3655_vm5 = vcmask 64512  }
 0x115   : > { %1537 = vmatpush1.bf16.msra.mxu0 %v6747_v34  ;;  %1619 = vmatpush1.bf16.msra.mxu1 %v6748_v35  ;;  %v6835_v34 = vld [vmem:[#allocation8 + $0x2e4] ss:$16 sps:$4 sm:$0xff]   ;;  %v6838_v35 = vld [vmem:[#allocation8 + $0x2ec] ss:$16 sps:$4 sm:$0xff]   ;;  %s8798_s14 = sld [smem:[#allocation32_spill]]  ;;  %s5845_s21 = sshll.u32 %s8230_s22, 6 }
 0x116   : > { %1538 = vmatprep.subr.bf16.mxu0 %v6749_v36  ;;  %1620 = vmatprep.subr.bf16.mxu1 %v6751_v37  ;;  %v6833_v36 = vld [vmem:[#allocation8 + $0x2e0] ss:$16 sps:$4 sm:$0xff]   ;;  %v6836_v37 = vld [vmem:[#allocation8 + $0x2e8] ss:$16 sps:$4 sm:$0xff]   ;;  %s8479_s25 = scalar_lea.vmem [#allocation15], %s5845_s21  ;;  %s8802_s24 = sld [smem:[#allocation28_spill]] }
 0x117   : > { %s5602_s26 = sshll.u32 %s8479_s25, 4  ;;  %s5572_s3 = scalar_lea.sflag [#allocation16], %s8230_s22  ;;  %s8614_s26 = int_to_ptr.vmem [resolvable:$true] %s5602_s26 }
 0x119   : > { %1539 = vmatpush1.bf16.msra.mxu0 %v6753_v38  ;;  %1621 = vmatpush1.bf16.msra.mxu1 %v6754_v39  ;;  %v6841_v38 = vld [vmem:[#allocation8 + $0x304] ss:$16 sps:$4 sm:$0xff]   ;;  %v6844_v39 = vld [vmem:[#allocation8 + $0x30c] ss:$16 sps:$4 sm:$0xff]  }
 0x11a   : > { %1540 = vmatprep.subr.bf16.mxu0 %v6755_v40  ;;  %1622 = vmatprep.subr.bf16.mxu1 %v6757_v41  ;;  %v6839_v40 = vld [vmem:[#allocation8 + $0x300] ss:$16 sps:$4 sm:$0xff]   ;;  %v6842_v41 = vld [vmem:[#allocation8 + $0x308] ss:$16 sps:$4 sm:$0xff]   ;;  %p694_p13 = scmp.lt.s32.totalorder %s8797_s13, 1 }
 0x11c   : > { %s695_s29 = scalar_select %p694_p13, %s8797_s13, 1 }
 0x11d   : > { %1541 = vmatpush1.bf16.msra.mxu0 %v6759_v42  ;;  %1623 = vmatpush1.bf16.msra.mxu1 %v6760_v43  ;;  %v6847_v42 = vld [vmem:[#allocation8 + $0x324] ss:$16 sps:$4 sm:$0xff]   ;;  %v6850_v43 = vld [vmem:[#allocation8 + $0x32c] ss:$16 sps:$4 sm:$0xff]   ;;  %p8804_p1 = scmp.ne.s32.totalorder %s8802_s24, 0 }
 0x11e   : > { %1542 = vmatprep.subr.bf16.mxu0 %v6761_v44  ;;  %1624 = vmatprep.subr.bf16.mxu1 %v6763_v45  ;;  %v6845_v44 = vld [vmem:[#allocation8 + $0x320] ss:$16 sps:$4 sm:$0xff]   ;;  %v6848_v45 = vld [vmem:[#allocation8 + $0x328] ss:$16 sps:$4 sm:$0xff]   ;;  %s5846_s12 = sshll.u32 %s695_s29, 1  ;;  %s7844_s29 = smov [#allocation15]  }
 0x11f   : > { %s700_s1 = scalar_lea.vmem %s8798_s14, %s5846_s12  ;;  %s7707_s12 = sshll.u32 %s7844_s29, 4  ;;  %s7708_s12 = int_to_ptr.vmem [resolvable:$false] %s7707_s12 }
 0x120   : > { %s7709_s30 = scalar_lea.vmem %s7708_s12, 2048  ;;  %p7710_p9 = scmp.lt.s32.totalorder %s8614_s26, %s7708_s12 }
 0x121   : > { %1543 = vmatpush1.bf16.msra.mxu0 %v6765_v47  ;;  %1625 = vmatpush1.bf16.msra.mxu1 %v6766_v49  ;;  %v6856_v47 = vld [vmem:[#allocation8 + $0x34c] ss:$16 sps:$4 sm:$0xff]   ;;  %v6854_v49 = vld [vmem:[#allocation8 + $0x348] ss:$16 sps:$4 sm:$0xff]  }
 0x122   : > { %1544 = vmatprep.subr.bf16.mxu0 %v6767_v50  ;;  %1626 = vmatprep.subr.bf16.mxu1 %v6769_v51  ;;  %v6859_v50 = vld [vmem:[#allocation8 + $0x364] ss:$16 sps:$4 sm:$0xff]   ;;  %v6862_v51 = vld [vmem:[#allocation8 + $0x36c] ss:$16 sps:$4 sm:$0xff]  }
 0x125   : > { %1545 = vmatpush1.bf16.msra.mxu0 %v6771_v52  ;;  %1627 = vmatpush1.bf16.msra.mxu1 %v6772_v53  ;;  %v6857_v52 = vld [vmem:[#allocation8 + $0x360] ss:$16 sps:$4 sm:$0xff]   ;;  %v6860_v53 = vld [vmem:[#allocation8 + $0x368] ss:$16 sps:$4 sm:$0xff]  }
 0x126   : > { %1546 = vmatprep.subr.bf16.mxu0 %v6773_v54  ;;  %1628 = vmatprep.subr.bf16.mxu1 %v6775_v55  ;;  %v6865_v54 = vld [vmem:[#allocation8 + $0x384] ss:$16 sps:$4 sm:$0xff]   ;;  %v6868_v55 = vld [vmem:[#allocation8 + $0x38c] ss:$16 sps:$4 sm:$0xff]  }
 0x129   : > { %1547 = vmatpush1.bf16.msra.mxu0 %v6777_v56  ;;  %1629 = vmatpush1.bf16.msra.mxu1 %v6778_v57  ;;  %v6863_v56 = vld [vmem:[#allocation8 + $0x380] ss:$16 sps:$4 sm:$0xff]   ;;  %v6866_v57 = vld [vmem:[#allocation8 + $0x388] ss:$16 sps:$4 sm:$0xff]  }
 0x12a   : > { %1548 = vmatprep.subr.bf16.mxu0 %v6779_v58  ;;  %1630 = vmatprep.subr.bf16.mxu1 %v6781_v59  ;;  %v6871_v58 = vld [vmem:[#allocation8 + $0x3a4] ss:$16 sps:$4 sm:$0xff]   ;;  %v6874_v59 = vld [vmem:[#allocation8 + $0x3ac] ss:$16 sps:$4 sm:$0xff]  }
 0x12d   : > { %1549 = vmatpush1.bf16.msra.mxu0 %v6783_v60  ;;  %1631 = vmatpush1.bf16.msra.mxu1 %v6784_v61  ;;  %v6869_v60 = vld [vmem:[#allocation8 + $0x3a0] ss:$16 sps:$4 sm:$0xff]   ;;  %v6872_v61 = vld [vmem:[#allocation8 + $0x3a8] ss:$16 sps:$4 sm:$0xff]  }
 0x12e   : > { %1550 = vmatprep.subr.bf16.mxu0 %v6785_v62  ;;  %1632 = vmatprep.subr.bf16.mxu1 %v6787_v63  ;;  %v6877_v62 = vld [vmem:[#allocation8 + $0x3c4] ss:$16 sps:$4 sm:$0xff]   ;;  %v6880_v63 = vld [vmem:[#allocation8 + $0x3cc] ss:$16 sps:$4 sm:$0xff]  }
 0x131   : > { %1551 = vmatpush1.bf16.msra.mxu0 %v6789_v0  ;;  %1633 = vmatpush1.bf16.msra.mxu1 %v6790_v1  ;;  %v6875_v0 = vld [vmem:[#allocation8 + $0x3c0] ss:$16 sps:$4 sm:$0xff]   ;;  %v6878_v1 = vld [vmem:[#allocation8 + $0x3c8] ss:$16 sps:$4 sm:$0xff]  }
 0x132   : > { %1561 = vmatprep.subr.bf16.mxu0 %v6793_v3  ;;  %1643 = vmatprep.subr.bf16.mxu1 %v6796_v4  ;;  %v6886_v3 = vld [vmem:[#allocation8 + $0x3ec] ss:$16 sps:$4 sm:$0xff]   ;;  %v6881_v4 = vld [vmem:[#allocation8 + $0x3e0] ss:$16 sps:$4 sm:$0xff]  }
 0x134   : > { %1553 = vmatmul.mubr.bf16.vlgmr.msra.gmra.mrb[0].mxu0 %v718_v5  ;;  %1635 = vmatmul.mubr.bf16.vlgmr.msra.gmra.mrb[0].mxu1 %v718_v5  ;;  %v6884_v5 = vld [vmem:[#allocation8 + $0x3e8] ss:$16 sps:$4 sm:$0xff]  }
 0x135   : > { %1562 = vmatpush1.bf16.msra.mxu0 %v6791_v6  ;;  %1644 = vmatpush1.bf16.msra.mxu1 %v6794_v7  ;;  %v706_v6 = vld [vmem:[%s8237_s28 + $0x10] sm:$0xff] }
 0x136   : > { %1563 = vmatprep.subr.bf16.mxu0 %v6799_v8  ;;  %1645 = vmatprep.subr.bf16.mxu1 %v6802_v9  ;;  %v6889_v7 = vld [vmem:[#allocation10 + $0x4] ss:$16 sps:$4 sm:$0xff]   ;;  %v6892_v8 = vld [vmem:[#allocation10 + $0xc] ss:$16 sps:$4 sm:$0xff]   ;;  %v720_v9 = vpack.c.bf16 %v706_v6, %v706_v6 }
 0x137   : > { %1593 = vmatprep.mubr.bf16.mxu0 %v721_v33  ;;  %1675 = vmatprep.mubr.bf16.mxu1 %v721_v33  ;;  %v6920_v33 = vld [vmem:[#allocation10 + $0xa8] ss:$16 sps:$4 sm:$0xff]   ;;  %v6979_v6 = vld [vmem:[#allocation10 + $0x1e4] ss:$16 sps:$4 sm:$0xff]  }
 0x139   : > { %1564 = vmatpush1.bf16.msra.mxu0 %v6797_v10  ;;  %1646 = vmatpush1.bf16.msra.mxu1 %v6800_v11  ;;  %v6887_v10 = vld [vmem:[#allocation10] ss:$16 sps:$4 sm:$0xff]   ;;  %v6890_v11 = vld [vmem:[#allocation10 + $0x8] ss:$16 sps:$4 sm:$0xff]  }
 0x13a   : > { %1565 = vmatprep.subr.bf16.mxu0 %v6805_v12  ;;  %1647 = vmatprep.subr.bf16.mxu1 %v6808_v13  ;;  %v6895_v12 = vld [vmem:[#allocation10 + $0x24] ss:$16 sps:$4 sm:$0xff]   ;;  %v6898_v13 = vld [vmem:[#allocation10 + $0x2c] ss:$16 sps:$4 sm:$0xff]  }
 0x13d   : > { %1566 = vmatpush1.bf16.msra.mxu0 %v6803_v14  ;;  %1648 = vmatpush1.bf16.msra.mxu1 %v6806_v15  ;;  %v709_v14 = vld [vmem:[%s8245_s17 + $0x8] sm:$0xff] }
 0x13e   : > { %1567 = vmatprep.subr.bf16.mxu0 %v6811_v16  ;;  %1649 = vmatprep.subr.bf16.mxu1 %v6814_v17  ;;  %v723_v15 = vpack.c.bf16 %v709_v14, %v709_v14  ;;  %v6893_v16 = vld [vmem:[#allocation10 + $0x20] ss:$16 sps:$4 sm:$0xff]   ;;  %v6896_v17 = vld [vmem:[#allocation10 + $0x28] ss:$16 sps:$4 sm:$0xff]  }
 0x13f   : > { %v6983_v14 = vld [vmem:[#allocation10 + $0x200] ss:$16 sps:$4 sm:$0xff]  }
 0x141   : > { %1568 = vmatpush1.bf16.msra.mxu0 %v6809_v18  ;;  %1650 = vmatpush1.bf16.msra.mxu1 %v6812_v19  ;;  %v6901_v18 = vld [vmem:[#allocation10 + $0x44] ss:$16 sps:$4 sm:$0xff]   ;;  %v6904_v19 = vld [vmem:[#allocation10 + $0x4c] ss:$16 sps:$4 sm:$0xff]  }
 0x142   : > { %1569 = vmatprep.subr.bf16.mxu0 %v6817_v20  ;;  %1651 = vmatprep.subr.bf16.mxu1 %v6820_v21  ;;  %v6899_v20 = vld [vmem:[#allocation10 + $0x40] ss:$16 sps:$4 sm:$0xff]   ;;  %v6902_v21 = vld [vmem:[#allocation10 + $0x48] ss:$16 sps:$4 sm:$0xff]  }
 0x145   : > { %1570 = vmatpush1.bf16.msra.mxu0 %v6815_v22  ;;  %1652 = vmatpush1.bf16.msra.mxu1 %v6818_v23  ;;  %v6907_v22 = vld [vmem:[#allocation10 + $0x64] ss:$16 sps:$4 sm:$0xff]   ;;  %v6910_v23 = vld [vmem:[#allocation10 + $0x6c] ss:$16 sps:$4 sm:$0xff]  }
 0x146   : > { %1571 = vmatprep.subr.bf16.mxu0 %v6823_v24  ;;  %1653 = vmatprep.subr.bf16.mxu1 %v6826_v25  ;;  %v6905_v24 = vld [vmem:[#allocation10 + $0x60] ss:$16 sps:$4 sm:$0xff]   ;;  %v6908_v25 = vld [vmem:[#allocation10 + $0x68] ss:$16 sps:$4 sm:$0xff]  }
 0x149   : > { %1572 = vmatpush1.bf16.msra.mxu0 %v6821_v26  ;;  %1654 = vmatpush1.bf16.msra.mxu1 %v6824_v27  ;;  %v6913_v26 = vld [vmem:[#allocation10 + $0x84] ss:$16 sps:$4 sm:$0xff]   ;;  %v6916_v27 = vld [vmem:[#allocation10 + $0x8c] ss:$16 sps:$4 sm:$0xff]  }
 0x14a   : > { %1573 = vmatprep.subr.bf16.mxu0 %v6829_v28  ;;  %1655 = vmatprep.subr.bf16.mxu1 %v6832_v29  ;;  %v6911_v28 = vld [vmem:[#allocation10 + $0x80] ss:$16 sps:$4 sm:$0xff]   ;;  %v6914_v29 = vld [vmem:[#allocation10 + $0x88] ss:$16 sps:$4 sm:$0xff]  }
 0x14d   : > { %1574 = vmatpush1.bf16.msra.mxu0 %v6827_v31  ;;  %1656 = vmatpush1.bf16.msra.mxu1 %v6830_v32  ;;  %v6922_v31 = vld [vmem:[#allocation10 + $0xac] ss:$16 sps:$4 sm:$0xff]   ;;  %v6917_v32 = vld [vmem:[#allocation10 + $0xa0] ss:$16 sps:$4 sm:$0xff]  }
 0x14e   : > { %1575 = vmatprep.subr.bf16.mxu0 %v6835_v34  ;;  %1657 = vmatprep.subr.bf16.mxu1 %v6838_v35  ;;  %v6925_v34 = vld [vmem:[#allocation10 + $0xc4] ss:$16 sps:$4 sm:$0xff]   ;;  %v6928_v35 = vld [vmem:[#allocation10 + $0xcc] ss:$16 sps:$4 sm:$0xff]  }
 0x151   : > { %1576 = vmatpush1.bf16.msra.mxu0 %v6833_v36  ;;  %1658 = vmatpush1.bf16.msra.mxu1 %v6836_v37  ;;  %v6923_v36 = vld [vmem:[#allocation10 + $0xc0] ss:$16 sps:$4 sm:$0xff]   ;;  %v6926_v37 = vld [vmem:[#allocation10 + $0xc8] ss:$16 sps:$4 sm:$0xff]  }
 0x152   : > { %1577 = vmatprep.subr.bf16.mxu0 %v6841_v38  ;;  %1659 = vmatprep.subr.bf16.mxu1 %v6844_v39  ;;  %v6931_v38 = vld [vmem:[#allocation10 + $0xe4] ss:$16 sps:$4 sm:$0xff]   ;;  %v6934_v39 = vld [vmem:[#allocation10 + $0xec] ss:$16 sps:$4 sm:$0xff]  }
 0x155   : > { %1578 = vmatpush1.bf16.msra.mxu0 %v6839_v40  ;;  %1660 = vmatpush1.bf16.msra.mxu1 %v6842_v41  ;;  %v6929_v40 = vld [vmem:[#allocation10 + $0xe0] ss:$16 sps:$4 sm:$0xff]   ;;  %v6932_v41 = vld [vmem:[#allocation10 + $0xe8] ss:$16 sps:$4 sm:$0xff]  }
 0x156   : > { %1579 = vmatprep.subr.bf16.mxu0 %v6847_v42  ;;  %1661 = vmatprep.subr.bf16.mxu1 %v6850_v43  ;;  %v6937_v42 = vld [vmem:[#allocation10 + $0x104] ss:$16 sps:$4 sm:$0xff]   ;;  %v6940_v43 = vld [vmem:[#allocation10 + $0x10c] ss:$16 sps:$4 sm:$0xff]  }
 0x159   : > { %1580 = vmatpush1.bf16.msra.mxu0 %v6845_v44  ;;  %1662 = vmatpush1.bf16.msra.mxu1 %v6848_v45  ;;  %v6935_v44 = vld [vmem:[#allocation10 + $0x100] ss:$16 sps:$4 sm:$0xff]   ;;  %v6938_v45 = vld [vmem:[#allocation10 + $0x108] ss:$16 sps:$4 sm:$0xff]  }
 0x15a   : > { %1581 = vmatprep.subr.bf16.mxu0 %v6853_v46  ;;  %1663 = vmatprep.subr.bf16.mxu1 %v6856_v47  ;;  %v6943_v46 = vld [vmem:[#allocation10 + $0x124] ss:$16 sps:$4 sm:$0xff]   ;;  %v6946_v47 = vld [vmem:[#allocation10 + $0x12c] ss:$16 sps:$4 sm:$0xff]  }
 0x15d   : > { %1582 = vmatpush1.bf16.msra.mxu0 %v6851_v48  ;;  %1664 = vmatpush1.bf16.msra.mxu1 %v6854_v49  ;;  %v6941_v48 = vld [vmem:[#allocation10 + $0x120] ss:$16 sps:$4 sm:$0xff]   ;;  %v6944_v49 = vld [vmem:[#allocation10 + $0x128] ss:$16 sps:$4 sm:$0xff]  }
 0x15e   : > { %1583 = vmatprep.subr.bf16.mxu0 %v6859_v50  ;;  %1665 = vmatprep.subr.bf16.mxu1 %v6862_v51  ;;  %v6949_v50 = vld [vmem:[#allocation10 + $0x144] ss:$16 sps:$4 sm:$0xff]   ;;  %v6952_v51 = vld [vmem:[#allocation10 + $0x14c] ss:$16 sps:$4 sm:$0xff]  }
 0x161   : > { %1584 = vmatpush1.bf16.msra.mxu0 %v6857_v52  ;;  %1666 = vmatpush1.bf16.msra.mxu1 %v6860_v53  ;;  %v6947_v52 = vld [vmem:[#allocation10 + $0x140] ss:$16 sps:$4 sm:$0xff]   ;;  %v6950_v53 = vld [vmem:[#allocation10 + $0x148] ss:$16 sps:$4 sm:$0xff]  }
 0x162   : > { %1585 = vmatprep.subr.bf16.mxu0 %v6865_v54  ;;  %1667 = vmatprep.subr.bf16.mxu1 %v6868_v55  ;;  %v6955_v54 = vld [vmem:[#allocation10 + $0x164] ss:$16 sps:$4 sm:$0xff]   ;;  %v6958_v55 = vld [vmem:[#allocation10 + $0x16c] ss:$16 sps:$4 sm:$0xff]  }
 0x165   : > { %1586 = vmatpush1.bf16.msra.mxu0 %v6863_v56  ;;  %1668 = vmatpush1.bf16.msra.mxu1 %v6866_v57  ;;  %v6953_v56 = vld [vmem:[#allocation10 + $0x160] ss:$16 sps:$4 sm:$0xff]   ;;  %v6956_v57 = vld [vmem:[#allocation10 + $0x168] ss:$16 sps:$4 sm:$0xff]  }
 0x166   : > { %1587 = vmatprep.subr.bf16.mxu0 %v6871_v58  ;;  %1669 = vmatprep.subr.bf16.mxu1 %v6874_v59  ;;  %v6961_v58 = vld [vmem:[#allocation10 + $0x184] ss:$16 sps:$4 sm:$0xff]   ;;  %v6964_v59 = vld [vmem:[#allocation10 + $0x18c] ss:$16 sps:$4 sm:$0xff]  }
 0x169   : > { %1588 = vmatpush1.bf16.msra.mxu0 %v6869_v60  ;;  %1670 = vmatpush1.bf16.msra.mxu1 %v6872_v61  ;;  %v6959_v60 = vld [vmem:[#allocation10 + $0x180] ss:$16 sps:$4 sm:$0xff]   ;;  %v6962_v61 = vld [vmem:[#allocation10 + $0x188] ss:$16 sps:$4 sm:$0xff]  }
 0x16a   : > { %1589 = vmatprep.subr.bf16.mxu0 %v6877_v62  ;;  %1671 = vmatprep.subr.bf16.mxu1 %v6880_v63  ;;  %v6967_v62 = vld [vmem:[#allocation10 + $0x1a4] ss:$16 sps:$4 sm:$0xff]   ;;  %v6970_v63 = vld [vmem:[#allocation10 + $0x1ac] ss:$16 sps:$4 sm:$0xff]  }
 0x16d   : > { %1590 = vmatpush1.bf16.msra.mxu0 %v6875_v0  ;;  %1672 = vmatpush1.bf16.msra.mxu1 %v6878_v1  ;;  %v6965_v0 = vld [vmem:[#allocation10 + $0x1a0] ss:$16 sps:$4 sm:$0xff]   ;;  %v6968_v1 = vld [vmem:[#allocation10 + $0x1a8] ss:$16 sps:$4 sm:$0xff]  }
 0x16e   : > { %1591 = vmatprep.subr.bf16.mxu0 %v6883_v2  ;;  %1673 = vmatprep.subr.bf16.mxu1 %v6886_v3  ;;  %v6973_v2 = vld [vmem:[#allocation10 + $0x1c4] ss:$16 sps:$4 sm:$0xff]   ;;  %v6976_v3 = vld [vmem:[#allocation10 + $0x1cc] ss:$16 sps:$4 sm:$0xff]  }
 0x171   : > { %1592 = vmatpush1.bf16.msra.mxu0 %v6881_v4  ;;  %1674 = vmatpush1.bf16.msra.mxu1 %v6884_v5  ;;  %v6971_v4 = vld [vmem:[#allocation10 + $0x1c0] ss:$16 sps:$4 sm:$0xff]   ;;  %v6974_v5 = vld [vmem:[#allocation10 + $0x1c8] ss:$16 sps:$4 sm:$0xff]  }
 0x172   : > { %2474 = vmatprep.subr.bf16.mxu0 %v6889_v7  ;;  %2556 = vmatprep.subr.bf16.mxu1 %v6892_v8  ;;  %v6982_v7 = vld [vmem:[#allocation10 + $0x1ec] ss:$16 sps:$4 sm:$0xff]   ;;  %v6977_v8 = vld [vmem:[#allocation10 + $0x1e0] ss:$16 sps:$4 sm:$0xff]  }
 0x174   : > { %1594 = vmatmul.mubr.bf16.vlgmr.msra.gmra.mrb[0].mxu0 %v720_v9  ;;  %1676 = vmatmul.mubr.bf16.vlgmr.msra.gmra.mrb[0].mxu1 %v720_v9  ;;  %v6980_v9 = vld [vmem:[#allocation10 + $0x1e8] ss:$16 sps:$4 sm:$0xff]  }
 0x175   : > { %2475 = vmatpush1.bf16.msra.mxu0 %v6887_v10  ;;  %2557 = vmatpush1.bf16.msra.mxu1 %v6890_v11  ;;  %v708_v10 = vld [vmem:[%s8245_s17] sm:$0xff] }
 0x176   : > { %2476 = vmatprep.subr.bf16.mxu0 %v6895_v12  ;;  %2558 = vmatprep.subr.bf16.mxu1 %v6898_v13  ;;  %v6985_v11 = vld [vmem:[#allocation10 + $0x204] ss:$16 sps:$4 sm:$0xff]   ;;  %v6988_v12 = vld [vmem:[#allocation10 + $0x20c] ss:$16 sps:$4 sm:$0xff]  }
 0x177   : > { %2506 = vmatprep.mubr.bf16.mxu0 %v723_v15  ;;  %2588 = vmatprep.mubr.bf16.mxu1 %v723_v15  ;;  %v711_v13 = vld [vmem:[%s8245_s17 + $0x18] sm:$0xff] }
 0x178   : > { %v6986_v15 = vld [vmem:[#allocation10 + $0x208] ss:$16 sps:$4 sm:$0xff]  }
 0x179   : > { %2477 = vmatpush1.bf16.msra.mxu0 %v6893_v16  ;;  %2559 = vmatpush1.bf16.msra.mxu1 %v6896_v17  ;;  %v722_v16 = vpack.c.bf16 %v708_v10, %v708_v10  ;;  %v6991_v17 = vld [vmem:[#allocation10 + $0x224] ss:$16 sps:$4 sm:$0xff]  }
 0x17a   : > { %2478 = vmatprep.subr.bf16.mxu0 %v6901_v18  ;;  %2560 = vmatprep.subr.bf16.mxu1 %v6904_v19  ;;  %v6994_v18 = vld [vmem:[#allocation10 + $0x22c] ss:$16 sps:$4 sm:$0xff]   ;;  %v6989_v19 = vld [vmem:[#allocation10 + $0x220] ss:$16 sps:$4 sm:$0xff]   ;;  %v7075_v10 = vld [vmem:[#allocation10 + $0x3e4] ss:$16 sps:$4 sm:$0xff]  }
 0x17d   : > { %2479 = vmatpush1.bf16.msra.mxu0 %v6899_v20  ;;  %2561 = vmatpush1.bf16.msra.mxu1 %v6902_v21  ;;  %v6992_v20 = vld [vmem:[#allocation10 + $0x228] ss:$16 sps:$4 sm:$0xff]   ;;  %v725_v21 = vpack.c.bf16 %v711_v13, %v711_v13 }
 0x17e   : > { %2480 = vmatprep.subr.bf16.mxu0 %v6907_v22  ;;  %2562 = vmatprep.subr.bf16.mxu1 %v6910_v23  ;;  %v6997_v22 = vld [vmem:[#allocation10 + $0x244] ss:$16 sps:$4 sm:$0xff]   ;;  %v7000_v23 = vld [vmem:[#allocation10 + $0x24c] ss:$16 sps:$4 sm:$0xff]   ;;  %v7076_v13 = vld [vmem:[#allocation10 + $0x3e8] ss:$16 sps:$4 sm:$0xff]  }
 0x181   : > { %2481 = vmatpush1.bf16.msra.mxu0 %v6905_v24  ;;  %2563 = vmatpush1.bf16.msra.mxu1 %v6908_v25  ;;  %v6995_v24 = vld [vmem:[#allocation10 + $0x240] ss:$16 sps:$4 sm:$0xff]   ;;  %v6998_v25 = vld [vmem:[#allocation10 + $0x248] ss:$16 sps:$4 sm:$0xff]  }
 0x182   : > { %2482 = vmatprep.subr.bf16.mxu0 %v6913_v26  ;;  %2564 = vmatprep.subr.bf16.mxu1 %v6916_v27  ;;  %v7003_v26 = vld [vmem:[#allocation10 + $0x264] ss:$16 sps:$4 sm:$0xff]   ;;  %v7006_v27 = vld [vmem:[#allocation10 + $0x26c] ss:$16 sps:$4 sm:$0xff]  }
 0x185   : > { %2483 = vmatpush1.bf16.msra.mxu0 %v6911_v28  ;;  %2565 = vmatpush1.bf16.msra.mxu1 %v6914_v29  ;;  %v7001_v28 = vld [vmem:[#allocation10 + $0x260] ss:$16 sps:$4 sm:$0xff]   ;;  %v7004_v29 = vld [vmem:[#allocation10 + $0x268] ss:$16 sps:$4 sm:$0xff]  }
 0x186   : > { %2484 = vmatprep.subr.bf16.mxu0 %v6919_v30  ;;  %2566 = vmatprep.subr.bf16.mxu1 %v6922_v31  ;;  %v7009_v30 = vld [vmem:[#allocation10 + $0x284] ss:$16 sps:$4 sm:$0xff]   ;;  %v7012_v31 = vld [vmem:[#allocation10 + $0x28c] ss:$16 sps:$4 sm:$0xff]  }
 0x189   : > { %2485 = vmatpush1.bf16.msra.mxu0 %v6917_v32  ;;  %2567 = vmatpush1.bf16.msra.mxu1 %v6920_v33  ;;  %v7007_v32 = vld [vmem:[#allocation10 + $0x280] ss:$16 sps:$4 sm:$0xff]   ;;  %v7010_v33 = vld [vmem:[#allocation10 + $0x288] ss:$16 sps:$4 sm:$0xff]  }
 0x18a   : > { %2486 = vmatprep.subr.bf16.mxu0 %v6925_v34  ;;  %2568 = vmatprep.subr.bf16.mxu1 %v6928_v35  ;;  %v7015_v34 = vld [vmem:[#allocation10 + $0x2a4] ss:$16 sps:$4 sm:$0xff]   ;;  %v7018_v35 = vld [vmem:[#allocation10 + $0x2ac] ss:$16 sps:$4 sm:$0xff]  }
 0x18d   : > { %2487 = vmatpush1.bf16.msra.mxu0 %v6923_v36  ;;  %2569 = vmatpush1.bf16.msra.mxu1 %v6926_v37  ;;  %v7013_v36 = vld [vmem:[#allocation10 + $0x2a0] ss:$16 sps:$4 sm:$0xff]   ;;  %v7016_v37 = vld [vmem:[#allocation10 + $0x2a8] ss:$16 sps:$4 sm:$0xff]  }
 0x18e   : > { %2488 = vmatprep.subr.bf16.mxu0 %v6931_v38  ;;  %2570 = vmatprep.subr.bf16.mxu1 %v6934_v39  ;;  %v7021_v38 = vld [vmem:[#allocation10 + $0x2c4] ss:$16 sps:$4 sm:$0xff]   ;;  %v7024_v39 = vld [vmem:[#allocation10 + $0x2cc] ss:$16 sps:$4 sm:$0xff]  }
 0x191   : > { %2489 = vmatpush1.bf16.msra.mxu0 %v6929_v40  ;;  %2571 = vmatpush1.bf16.msra.mxu1 %v6932_v41  ;;  %v7019_v40 = vld [vmem:[#allocation10 + $0x2c0] ss:$16 sps:$4 sm:$0xff]   ;;  %v7022_v41 = vld [vmem:[#allocation10 + $0x2c8] ss:$16 sps:$4 sm:$0xff]  }
 0x192   : > { %2490 = vmatprep.subr.bf16.mxu0 %v6937_v42  ;;  %2572 = vmatprep.subr.bf16.mxu1 %v6940_v43  ;;  %v7027_v42 = vld [vmem:[#allocation10 + $0x2e4] ss:$16 sps:$4 sm:$0xff]   ;;  %v7030_v43 = vld [vmem:[#allocation10 + $0x2ec] ss:$16 sps:$4 sm:$0xff]  }
 0x195   : > { %2491 = vmatpush1.bf16.msra.mxu0 %v6935_v44  ;;  %2573 = vmatpush1.bf16.msra.mxu1 %v6938_v45  ;;  %v7025_v44 = vld [vmem:[#allocation10 + $0x2e0] ss:$16 sps:$4 sm:$0xff]   ;;  %v7028_v45 = vld [vmem:[#allocation10 + $0x2e8] ss:$16 sps:$4 sm:$0xff]  }
 0x196   : > { %2492 = vmatprep.subr.bf16.mxu0 %v6943_v46  ;;  %2574 = vmatprep.subr.bf16.mxu1 %v6946_v47  ;;  %v7033_v46 = vld [vmem:[#allocation10 + $0x304] ss:$16 sps:$4 sm:$0xff]   ;;  %v7036_v47 = vld [vmem:[#allocation10 + $0x30c] ss:$16 sps:$4 sm:$0xff]  }
 0x199   : > { %2493 = vmatpush1.bf16.msra.mxu0 %v6941_v48  ;;  %2575 = vmatpush1.bf16.msra.mxu1 %v6944_v49  ;;  %v7031_v48 = vld [vmem:[#allocation10 + $0x300] ss:$16 sps:$4 sm:$0xff]   ;;  %v7034_v49 = vld [vmem:[#allocation10 + $0x308] ss:$16 sps:$4 sm:$0xff]  }
 0x19a   : > { %2494 = vmatprep.subr.bf16.mxu0 %v6949_v50  ;;  %2576 = vmatprep.subr.bf16.mxu1 %v6952_v51  ;;  %v7039_v50 = vld [vmem:[#allocation10 + $0x324] ss:$16 sps:$4 sm:$0xff]   ;;  %v7042_v51 = vld [vmem:[#allocation10 + $0x32c] ss:$16 sps:$4 sm:$0xff]  }
 0x19d   : > { %2495 = vmatpush1.bf16.msra.mxu0 %v6947_v52  ;;  %2577 = vmatpush1.bf16.msra.mxu1 %v6950_v53  ;;  %v7037_v52 = vld [vmem:[#allocation10 + $0x320] ss:$16 sps:$4 sm:$0xff]   ;;  %v7040_v53 = vld [vmem:[#allocation10 + $0x328] ss:$16 sps:$4 sm:$0xff]  }
 0x19e   : > { %2496 = vmatprep.subr.bf16.mxu0 %v6955_v54  ;;  %2578 = vmatprep.subr.bf16.mxu1 %v6958_v55  ;;  %v7045_v54 = vld [vmem:[#allocation10 + $0x344] ss:$16 sps:$4 sm:$0xff]   ;;  %v7048_v55 = vld [vmem:[#allocation10 + $0x34c] ss:$16 sps:$4 sm:$0xff]  }
 0x1a1   : > { %2497 = vmatpush1.bf16.msra.mxu0 %v6953_v56  ;;  %2579 = vmatpush1.bf16.msra.mxu1 %v6956_v57  ;;  %v7043_v56 = vld [vmem:[#allocation10 + $0x340] ss:$16 sps:$4 sm:$0xff]   ;;  %v7046_v57 = vld [vmem:[#allocation10 + $0x348] ss:$16 sps:$4 sm:$0xff]  }
 0x1a2   : > { %2498 = vmatprep.subr.bf16.mxu0 %v6961_v58  ;;  %2580 = vmatprep.subr.bf16.mxu1 %v6964_v59  ;;  %v7051_v58 = vld [vmem:[#allocation10 + $0x364] ss:$16 sps:$4 sm:$0xff]   ;;  %v7054_v59 = vld [vmem:[#allocation10 + $0x36c] ss:$16 sps:$4 sm:$0xff]  }
 0x1a5   : > { %2499 = vmatpush1.bf16.msra.mxu0 %v6959_v60  ;;  %2581 = vmatpush1.bf16.msra.mxu1 %v6962_v61  ;;  %v7049_v60 = vld [vmem:[#allocation10 + $0x360] ss:$16 sps:$4 sm:$0xff]   ;;  %v7052_v61 = vld [vmem:[#allocation10 + $0x368] ss:$16 sps:$4 sm:$0xff]  }
 0x1a6   : > { %2500 = vmatprep.subr.bf16.mxu0 %v6967_v62  ;;  %2582 = vmatprep.subr.bf16.mxu1 %v6970_v63  ;;  %v7057_v62 = vld [vmem:[#allocation10 + $0x384] ss:$16 sps:$4 sm:$0xff]   ;;  %v7060_v63 = vld [vmem:[#allocation10 + $0x38c] ss:$16 sps:$4 sm:$0xff]  }
 0x1a9   : > { %2501 = vmatpush1.bf16.msra.mxu0 %v6965_v0  ;;  %2583 = vmatpush1.bf16.msra.mxu1 %v6968_v1  ;;  %v7055_v0 = vld [vmem:[#allocation10 + $0x380] ss:$16 sps:$4 sm:$0xff]   ;;  %v7058_v1 = vld [vmem:[#allocation10 + $0x388] ss:$16 sps:$4 sm:$0xff]  }
 0x1aa   : > { %2502 = vmatprep.subr.bf16.mxu0 %v6973_v2  ;;  %2584 = vmatprep.subr.bf16.mxu1 %v6976_v3  ;;  %v7063_v2 = vld [vmem:[#allocation10 + $0x3a4] ss:$16 sps:$4 sm:$0xff]   ;;  %v7066_v3 = vld [vmem:[#allocation10 + $0x3ac] ss:$16 sps:$4 sm:$0xff]  }
 0x1ad   : > { %2503 = vmatpush1.bf16.msra.mxu0 %v6971_v4  ;;  %2585 = vmatpush1.bf16.msra.mxu1 %v6974_v5  ;;  %v7061_v4 = vld [vmem:[#allocation10 + $0x3a0] ss:$16 sps:$4 sm:$0xff]   ;;  %v7064_v5 = vld [vmem:[#allocation10 + $0x3a8] ss:$16 sps:$4 sm:$0xff]  }
 0x1ae   : > { %2504 = vmatprep.subr.bf16.mxu0 %v6979_v6  ;;  %2586 = vmatprep.subr.bf16.mxu1 %v6982_v7  ;;  %v7069_v6 = vld [vmem:[#allocation10 + $0x3c4] ss:$16 sps:$4 sm:$0xff]   ;;  %v7072_v7 = vld [vmem:[#allocation10 + $0x3cc] ss:$16 sps:$4 sm:$0xff]  }
 0x1b1   : > { %2505 = vmatpush1.bf16.msra.mxu0 %v6977_v8  ;;  %2587 = vmatpush1.bf16.msra.mxu1 %v6980_v9  ;;  %v7067_v8 = vld [vmem:[#allocation10 + $0x3c0] ss:$16 sps:$4 sm:$0xff]   ;;  %v7070_v9 = vld [vmem:[#allocation10 + $0x3c8] ss:$16 sps:$4 sm:$0xff]  }
 0x1b2   : > { %2515 = vmatprep.subr.bf16.mxu0 %v6985_v11  ;;  %2597 = vmatprep.subr.bf16.mxu1 %v6988_v12  ;;  %v7078_v11 = vld [vmem:[#allocation10 + $0x3ec] ss:$16 sps:$4 sm:$0xff]   ;;  %v7073_v12 = vld [vmem:[#allocation10 + $0x3e0] ss:$16 sps:$4 sm:$0xff]  }
 0x1b4   : > { %2507 = vmatmul.mubr.bf16.vlgmr.msra.gmra.mrb[4].mxu0 %v722_v16  ;;  %2589 = vmatmul.mubr.bf16.vlgmr.msra.gmra.mrb[4].mxu1 %v722_v16  ;;  %v713_v16 = vld [vmem:[%s8252_s23 + $0x8] sm:$0xff] }
 0x1b5   : > { %2516 = vmatpush1.bf16.msra.mxu0 %v6983_v14  ;;  %2598 = vmatpush1.bf16.msra.mxu1 %v6986_v15  ;;  %v710_v14 = vld [vmem:[%s8245_s17 + $0x10] sm:$0xff] }
 0x1b6   : > { %2517 = vmatprep.subr.bf16.mxu0 %v6991_v17  ;;  %2599 = vmatprep.subr.bf16.mxu1 %v6994_v18  ;;  %v7081_v15 = vld [vmem:[#allocation11 + $0x4] ss:$16 sps:$4 sm:$0xff]   ;;  %v7079_v17 = vld [vmem:[#allocation11] ss:$16 sps:$4 sm:$0xff]   ;;  %v724_v18 = vpack.c.bf16 %v710_v14, %v710_v14 }
 0x1b7   : > { %2547 = vmatprep.mubr.bf16.mxu0 %v725_v21  ;;  %2629 = vmatprep.mubr.bf16.mxu1 %v725_v21  ;;  %v7082_v21 = vld [vmem:[#allocation11 + $0x20] ss:$16 sps:$4 sm:$0xff]   ;;  %v7153_v14 = vld [vmem:[#allocation11 + $0x304] ss:$16 sps:$4 sm:$0xff]  }
 0x1b9   : > { %2518 = vmatpush1.bf16.msra.mxu0 %v6989_v19  ;;  %2600 = vmatpush1.bf16.msra.mxu1 %v6992_v20  ;;  %v7084_v19 = vld [vmem:[#allocation11 + $0x24] ss:$16 sps:$4 sm:$0xff]   ;;  %v727_v20 = vpack.c.bf16 %v713_v16, %v713_v16 }
 0x1ba   : > { %2519 = vmatprep.subr.bf16.mxu0 %v6997_v22  ;;  %2601 = vmatprep.subr.bf16.mxu1 %v7000_v23  ;;  %v7087_v22 = vld [vmem:[#allocation11 + $0x44] ss:$16 sps:$4 sm:$0xff]   ;;  %v7085_v23 = vld [vmem:[#allocation11 + $0x40] ss:$16 sps:$4 sm:$0xff]  }
 0x1bb   : > { %v7156_v16 = vld [vmem:[#allocation11 + $0x324] ss:$16 sps:$4 sm:$0xff]  }
 0x1bd   : > { %2520 = vmatpush1.bf16.msra.mxu0 %v6995_v24  ;;  %2602 = vmatpush1.bf16.msra.mxu1 %v6998_v25  ;;  %v7090_v24 = vld [vmem:[#allocation11 + $0x64] ss:$16 sps:$4 sm:$0xff]   ;;  %v7088_v25 = vld [vmem:[#allocation11 + $0x60] ss:$16 sps:$4 sm:$0xff]  }
 0x1be   : > { %2521 = vmatprep.subr.bf16.mxu0 %v7003_v26  ;;  %2603 = vmatprep.subr.bf16.mxu1 %v7006_v27  ;;  %v7093_v26 = vld [vmem:[#allocation11 + $0x84] ss:$16 sps:$4 sm:$0xff]   ;;  %v7091_v27 = vld [vmem:[#allocation11 + $0x80] ss:$16 sps:$4 sm:$0xff]  }
 0x1c1   : > { %2522 = vmatpush1.bf16.msra.mxu0 %v7001_v28  ;;  %2604 = vmatpush1.bf16.msra.mxu1 %v7004_v29  ;;  %v7096_v28 = vld [vmem:[#allocation11 + $0xa4] ss:$16 sps:$4 sm:$0xff]   ;;  %v7094_v29 = vld [vmem:[#allocation11 + $0xa0] ss:$16 sps:$4 sm:$0xff]  }
 0x1c2   : > { %2523 = vmatprep.subr.bf16.mxu0 %v7009_v30  ;;  %2605 = vmatprep.subr.bf16.mxu1 %v7012_v31  ;;  %v7099_v30 = vld [vmem:[#allocation11 + $0xc4] ss:$16 sps:$4 sm:$0xff]   ;;  %v7097_v31 = vld [vmem:[#allocation11 + $0xc0] ss:$16 sps:$4 sm:$0xff]  }
 0x1c5   : > { %2524 = vmatpush1.bf16.msra.mxu0 %v7007_v32  ;;  %2606 = vmatpush1.bf16.msra.mxu1 %v7010_v33  ;;  %v7102_v32 = vld [vmem:[#allocation11 + $0xe4] ss:$16 sps:$4 sm:$0xff]   ;;  %v7100_v33 = vld [vmem:[#allocation11 + $0xe0] ss:$16 sps:$4 sm:$0xff]  }
 0x1c6   : > { %2525 = vmatprep.subr.bf16.mxu0 %v7015_v34  ;;  %2607 = vmatprep.subr.bf16.mxu1 %v7018_v35  ;;  %v7105_v34 = vld [vmem:[#allocation11 + $0x104] ss:$16 sps:$4 sm:$0xff]   ;;  %v7103_v35 = vld [vmem:[#allocation11 + $0x100] ss:$16 sps:$4 sm:$0xff]  }
 0x1c9   : > { %2526 = vmatpush1.bf16.msra.mxu0 %v7013_v36  ;;  %2608 = vmatpush1.bf16.msra.mxu1 %v7016_v37  ;;  %v7108_v36 = vld [vmem:[#allocation11 + $0x124] ss:$16 sps:$4 sm:$0xff]   ;;  %v7106_v37 = vld [vmem:[#allocation11 + $0x120] ss:$16 sps:$4 sm:$0xff]  }
 0x1ca   : > { %2527 = vmatprep.subr.bf16.mxu0 %v7021_v38  ;;  %2609 = vmatprep.subr.bf16.mxu1 %v7024_v39  ;;  %v7111_v38 = vld [vmem:[#allocation11 + $0x144] ss:$16 sps:$4 sm:$0xff]   ;;  %v7109_v39 = vld [vmem:[#allocation11 + $0x140] ss:$16 sps:$4 sm:$0xff]  }
 0x1cd   : > { %2528 = vmatpush1.bf16.msra.mxu0 %v7019_v40  ;;  %2610 = vmatpush1.bf16.msra.mxu1 %v7022_v41  ;;  %v7114_v40 = vld [vmem:[#allocation11 + $0x164] ss:$16 sps:$4 sm:$0xff]   ;;  %v7112_v41 = vld [vmem:[#allocation11 + $0x160] ss:$16 sps:$4 sm:$0xff]  }
 0x1ce   : > { %2529 = vmatprep.subr.bf16.mxu0 %v7027_v42  ;;  %2611 = vmatprep.subr.bf16.mxu1 %v7030_v43  ;;  %v7117_v42 = vld [vmem:[#allocation11 + $0x184] ss:$16 sps:$4 sm:$0xff]   ;;  %v7115_v43 = vld [vmem:[#allocation11 + $0x180] ss:$16 sps:$4 sm:$0xff]  }
 0x1d1   : > { %2530 = vmatpush1.bf16.msra.mxu0 %v7025_v44  ;;  %2612 = vmatpush1.bf16.msra.mxu1 %v7028_v45  ;;  %v7120_v44 = vld [vmem:[#allocation11 + $0x1a4] ss:$16 sps:$4 sm:$0xff]   ;;  %v7118_v45 = vld [vmem:[#allocation11 + $0x1a0] ss:$16 sps:$4 sm:$0xff]  }
 0x1d2   : > { %2531 = vmatprep.subr.bf16.mxu0 %v7033_v46  ;;  %2613 = vmatprep.subr.bf16.mxu1 %v7036_v47  ;;  %v7123_v46 = vld [vmem:[#allocation11 + $0x1c4] ss:$16 sps:$4 sm:$0xff]   ;;  %v7121_v47 = vld [vmem:[#allocation11 + $0x1c0] ss:$16 sps:$4 sm:$0xff]  }
 0x1d5   : > { %2532 = vmatpush1.bf16.msra.mxu0 %v7031_v48  ;;  %2614 = vmatpush1.bf16.msra.mxu1 %v7034_v49  ;;  %v7126_v48 = vld [vmem:[#allocation11 + $0x1e4] ss:$16 sps:$4 sm:$0xff]   ;;  %v7124_v49 = vld [vmem:[#allocation11 + $0x1e0] ss:$16 sps:$4 sm:$0xff]  }
 0x1d6   : > { %2533 = vmatprep.subr.bf16.mxu0 %v7039_v50  ;;  %2615 = vmatprep.subr.bf16.mxu1 %v7042_v51  ;;  %v712_v50 = vld [vmem:[%s8252_s23] sm:$0xff] }
 0x1d7   : > { %v7129_v51 = vld [vmem:[#allocation11 + $0x204] ss:$16 sps:$4 sm:$0xff]  }
 0x1d9   : > { %2534 = vmatpush1.bf16.msra.mxu0 %v7037_v52  ;;  %2616 = vmatpush1.bf16.msra.mxu1 %v7040_v53  ;;  %v8272_v52 = vpack.c.bf16 %v712_v50, %v712_v50  ;;  %v7127_v53 = vld [vmem:[#allocation11 + $0x200] ss:$16 sps:$4 sm:$0xff]  }
 0x1da   : > { %2535 = vmatprep.subr.bf16.mxu0 %v7045_v54  ;;  %2617 = vmatprep.subr.bf16.mxu1 %v7048_v55  ;;  %v7132_v54 = vld [vmem:[#allocation11 + $0x224] ss:$16 sps:$4 sm:$0xff]   ;;  %v7130_v55 = vld [vmem:[#allocation11 + $0x220] ss:$16 sps:$4 sm:$0xff]  }
 0x1dd   : > { %2536 = vmatpush1.bf16.msra.mxu0 %v7043_v56  ;;  %2618 = vmatpush1.bf16.msra.mxu1 %v7046_v57  ;;  %v7135_v56 = vld [vmem:[#allocation11 + $0x244] ss:$16 sps:$4 sm:$0xff]   ;;  %v7133_v57 = vld [vmem:[#allocation11 + $0x240] ss:$16 sps:$4 sm:$0xff]  }
 0x1de   : > { %2537 = vmatprep.subr.bf16.mxu0 %v7051_v58  ;;  %2619 = vmatprep.subr.bf16.mxu1 %v7054_v59  ;;  %v7138_v58 = vld [vmem:[#allocation11 + $0x264] ss:$16 sps:$4 sm:$0xff]   ;;  %v7136_v59 = vld [vmem:[#allocation11 + $0x260] ss:$16 sps:$4 sm:$0xff]  }
 0x1e1   : > { %2538 = vmatpush1.bf16.msra.mxu0 %v7049_v60  ;;  %2620 = vmatpush1.bf16.msra.mxu1 %v7052_v61  ;;  %v7141_v60 = vld [vmem:[#allocation11 + $0x284] ss:$16 sps:$4 sm:$0xff]   ;;  %v7139_v61 = vld [vmem:[#allocation11 + $0x280] ss:$16 sps:$4 sm:$0xff]  }
 0x1e2   : > { %2539 = vmatprep.subr.bf16.mxu0 %v7057_v62  ;;  %2621 = vmatprep.subr.bf16.mxu1 %v7060_v63  ;;  %v7144_v62 = vld [vmem:[#allocation11 + $0x2a4] ss:$16 sps:$4 sm:$0xff]   ;;  %v7142_v63 = vld [vmem:[#allocation11 + $0x2a0] ss:$16 sps:$4 sm:$0xff]  }
 0x1e5   : > { %2540 = vmatpush1.bf16.msra.mxu0 %v7055_v0  ;;  %2622 = vmatpush1.bf16.msra.mxu1 %v7058_v1  ;;  %v7147_v0 = vld [vmem:[#allocation11 + $0x2c4] ss:$16 sps:$4 sm:$0xff]  }
 0x1e6   : > { %2541 = vmatprep.subr.bf16.mxu0 %v7063_v2  ;;  %2623 = vmatprep.subr.bf16.mxu1 %v7066_v3 }
 0x1e9   : > { %2542 = vmatpush1.bf16.msra.mxu0 %v7061_v4  ;;  %2624 = vmatpush1.bf16.msra.mxu1 %v7064_v5  ;;  %v715_v5 = vld [vmem:[%s8252_s23 + $0x18] sm:$0xff] }
 0x1ea   : > { %2543 = vmatprep.subr.bf16.mxu0 %v7069_v6  ;;  %2625 = vmatprep.subr.bf16.mxu1 %v7072_v7 }
 0x1ed   : > { %2544 = vmatpush1.bf16.msra.mxu0 %v7067_v8  ;;  %2626 = vmatpush1.bf16.msra.mxu1 %v7070_v9  ;;  %v7145_v8 = vld [vmem:[#allocation11 + $0x2c0] ss:$16 sps:$4 sm:$0xff]   ;;  %v8284_v9 = vpack.c.bf16 %v715_v5, %v715_v5 }
 0x1ee   : > { %2545 = vmatprep.subr.bf16.mxu0 %v7075_v10  ;;  %2627 = vmatprep.subr.bf16.mxu1 %v7078_v11 }
 0x1f1   : > { %2546 = vmatpush1.bf16.msra.mxu0 %v7073_v12  ;;  %2628 = vmatpush1.bf16.msra.mxu1 %v7076_v13  ;;  %v7150_v12 = vld [vmem:[#allocation11 + $0x2e4] ss:$16 sps:$4 sm:$0xff]   ;;  %v7148_v13 = vld [vmem:[#allocation11 + $0x2e0] ss:$16 sps:$4 sm:$0xff]  }
 0x1f2   : > { %3428 = vmatprep.subr.bf16.mxu0 %v7081_v15  ;;  %v7151_v15 = vld [vmem:[#allocation11 + $0x300] ss:$16 sps:$4 sm:$0xff]  }
 0x1f4   : > { %2548 = vmatmul.mubr.bf16.vlgmr.msra.gmra.mrb[4].mxu0 %v724_v18  ;;  %2630 = vmatmul.mubr.bf16.vlgmr.msra.gmra.mrb[4].mxu1 %v724_v18  ;;  %v7159_v18 = vld [vmem:[#allocation11 + $0x344] ss:$16 sps:$4 sm:$0xff]  }
 0x1f5   : > { %3429 = vmatpush1.bf16.msra.mxu0 %v7079_v17  ;;  %3460 = vmatprep.mubr.bf16.mxu0 %v727_v20  ;;  %v7154_v17 = vld [vmem:[#allocation11 + $0x320] ss:$16 sps:$4 sm:$0xff]  }
 0x1f6   : > { %3430 = vmatprep.subr.bf16.mxu0 %v7084_v19  ;;  %3542 = vmatprep.mubr.bf16.mxu1 %v727_v20  ;;  %v7157_v19 = vld [vmem:[#allocation11 + $0x340] ss:$16 sps:$4 sm:$0xff]   ;;  %v7162_v20 = vld [vmem:[#allocation11 + $0x364] ss:$16 sps:$4 sm:$0xff]  }
 0x1f9   : > { %3431 = vmatpush1.bf16.msra.mxu0 %v7082_v21  ;;  %v7160_v21 = vld [vmem:[#allocation11 + $0x360] ss:$16 sps:$4 sm:$0xff]  }
 0x1fa   : > { %3432 = vmatprep.subr.bf16.mxu0 %v7087_v22  ;;  %v7165_v22 = vld [vmem:[#allocation11 + $0x384] ss:$16 sps:$4 sm:$0xff]  }
 0x1fd   : > { %3433 = vmatpush1.bf16.msra.mxu0 %v7085_v23  ;;  %v7163_v23 = vld [vmem:[#allocation11 + $0x380] ss:$16 sps:$4 sm:$0xff]  }
 0x1fe   : > { %3434 = vmatprep.subr.bf16.mxu0 %v7090_v24  ;;  %v7168_v24 = vld [vmem:[#allocation11 + $0x3a4] ss:$16 sps:$4 sm:$0xff]  }
 0x201   : > { %3435 = vmatpush1.bf16.msra.mxu0 %v7088_v25  ;;  %v7166_v25 = vld [vmem:[#allocation11 + $0x3a0] ss:$16 sps:$4 sm:$0xff]  }
 0x202   : > { %3436 = vmatprep.subr.bf16.mxu0 %v7093_v26  ;;  %v7171_v26 = vld [vmem:[#allocation11 + $0x3c4] ss:$16 sps:$4 sm:$0xff]  }
 0x205   : > { %3437 = vmatpush1.bf16.msra.mxu0 %v7091_v27  ;;  %v7169_v27 = vld [vmem:[#allocation11 + $0x3c0] ss:$16 sps:$4 sm:$0xff]  }
 0x206   : > { %3438 = vmatprep.subr.bf16.mxu0 %v7096_v28  ;;  %v7174_v28 = vld [vmem:[#allocation11 + $0x3e4] ss:$16 sps:$4 sm:$0xff]  }
 0x209   : > { %3439 = vmatpush1.bf16.msra.mxu0 %v7094_v29  ;;  %v7172_v29 = vld [vmem:[#allocation11 + $0x3e0] ss:$16 sps:$4 sm:$0xff]  }
 0x20a   : > { %3440 = vmatprep.subr.bf16.mxu0 %v7099_v30  ;;  %v714_v30 = vld [vmem:[%s8252_s23 + $0x10] sm:$0xff]  ;;  %s8801_s23 = sld [smem:[#allocation36_spill]] }
 0x20d   : > { %3441 = vmatpush1.bf16.msra.mxu0 %v7097_v31  ;;  %v8288_v31 = vpack.c.bf16 %v714_v30, %v714_v30  ;;  %v7204_v30 = vld [vmem:[#allocation11 + $0x12c] ss:$16 sps:$4 sm:$0xff]  }
 0x20e   : > { %3442 = vmatprep.subr.bf16.mxu0 %v7102_v32  ;;  %v7840_v32 = vmov 0.0  }
 0x211   : > { %3443 = vmatpush1.bf16.msra.mxu0 %v7100_v33  ;;  %v860_v33 = vlaneseq }
 0x212   : > { %3444 = vmatprep.subr.bf16.mxu0 %v7105_v34 }
 0x213   : > { %v861_v34 = vshrl.u32 %v860_v33, 7  ;;  %v7202_v33 = vld [vmem:[#allocation11 + $0x128] ss:$16 sps:$4 sm:$0xff]  }
 0x215   : > { %3445 = vmatpush1.bf16.msra.mxu0 %v7103_v35  ;;  %v1812_v35 = vld [vmem:[%s8715_s7] sm:$0xf] }
 0x216   : > { %3446 = vmatprep.subr.bf16.mxu0 %v7108_v36  ;;  %v8297_v36 = vsub.s32 0, %v861_v34 }
 0x219   : > { %3447 = vmatpush1.bf16.msra.mxu0 %v7106_v37  ;;  %v858_v37 = vld [vmem:[%s8713_s5] sm:$0xf] }
 0x21a   : > { %3448 = vmatprep.subr.bf16.mxu0 %v7111_v38  ;;  %v8302_v38 = vsub.s32 1, %v861_v34 }
 0x21d   : > { %3449 = vmatpush1.bf16.msra.mxu0 %v7109_v39  ;;  %v1817_v39 = vrot.slane %v1812_v35, %v8297_v36 }
 0x21e   : > { %3450 = vmatprep.subr.bf16.mxu0 %v7114_v40  ;;  %v1821_v40 = vrot.slane %v1812_v35, %v8302_v38 }
 0x221   : > { %3451 = vmatpush1.bf16.msra.mxu0 %v7112_v41  ;;  %v863_v41 = vrot.slane %v858_v37, %v8297_v36 }
 0x222   : > { %3452 = vmatprep.subr.bf16.mxu0 %v7117_v42  ;;  %v8307_v42 = vsub.s32 2, %v861_v34 }
 0x225   : > { %3453 = vmatpush1.bf16.msra.mxu0 %v7115_v43  ;;  %v867_v43 = vrot.slane %v858_v37, %v8302_v38 }
 0x226   : > { %3454 = vmatprep.subr.bf16.mxu0 %v7120_v44 }
 0x229   : > { %3455 = vmatpush1.bf16.msra.mxu0 %v7118_v45 }
 0x22a   : > { %3456 = vmatprep.subr.bf16.mxu0 %v7123_v46 }
 0x22d   : > { %3457 = vmatpush1.bf16.msra.mxu0 %v7121_v47 }
 0x22e   : > { %3458 = vmatprep.subr.bf16.mxu0 %v7126_v48 }
 0x231   : > { %3459 = vmatpush1.bf16.msra.mxu0 %v7124_v49 }
 0x232   : > { %3469 = vmatprep.subr.bf16.mxu0 %v7129_v51 }
 0x234   : > { %3461 = vmatmul.mubr.bf16.vlgmr.msra.gmra.mrb[8].mxu0 %v8272_v52 }
 0x235   : > { %3470 = vmatpush1.bf16.msra.mxu0 %v7127_v53  ;;  %3501 = vmatprep.mubr.bf16.mxu0 %v8284_v9  ;;  %v7177_v53 = vld [vmem:[#allocation11 + $0xc] ss:$16 sps:$4 sm:$0xff]  }
 0x236   : > { %3471 = vmatprep.subr.bf16.mxu0 %v7132_v54  ;;  %3510 = vmatprep.subr.bf16.mxu1 %v7177_v53  ;;  %v7226_v53 = vld [vmem:[#allocation11 + $0x228] ss:$16 sps:$4 sm:$0xff]  }
 0x239   : > { %3472 = vmatpush1.bf16.msra.mxu0 %v7130_v55 }
 0x23a   : > { %3473 = vmatprep.subr.bf16.mxu0 %v7135_v56  ;;  %v1825_v56 = vrot.slane %v1812_v35, %v8307_v42 }
 0x23d   : > { %3474 = vmatpush1.bf16.msra.mxu0 %v7133_v57 }
 0x23e   : > { %3475 = vmatprep.subr.bf16.mxu0 %v7138_v58 }
 0x241   : > { %3476 = vmatpush1.bf16.msra.mxu0 %v7136_v59  ;;  %v7175_v59 = vld [vmem:[#allocation11 + $0x8] ss:$16 sps:$4 sm:$0xff]  }
 0x242   : > { %3477 = vmatprep.subr.bf16.mxu0 %v7141_v60  ;;  %v871_v60 = vrot.slane %v858_v37, %v8307_v42  ;;  %3511 = vmatpush1.bf16.msra.mxu1 %v7175_v59  ;;  %v7235_v59 = vld [vmem:[#allocation11 + $0x288] ss:$16 sps:$4 sm:$0xff]  }
 0x245   : > { %3478 = vmatpush1.bf16.msra.mxu0 %v7139_v61 }
 0x246   : > { %3479 = vmatprep.subr.bf16.mxu0 %v7144_v62  ;;  %v8314_v62 = vsub.s32 3, %v861_v34  ;;  %v7207_v34 = vld [vmem:[#allocation11 + $0x14c] ss:$16 sps:$4 sm:$0xff]  }
 0x247   : > { %v8275_v1 = vpop.f32.mrb[0].mxu0  ;;  %v8277_v2 = vpop.f32.mrb[0].mxu1 }
 0x248   : > { %v8279_v3 = vpop.f32.mrb[1].mxu0  ;;  %v8281_v4 = vpop.f32.mrb[1].mxu1  ;;  %v6523_v54 = vadd.f32 %v8275_v1, %v863_v41  ;;  %v7178_v1 = vld [vmem:[#allocation11 + $0x28] ss:$16 sps:$4 sm:$0xff]  }
 0x249   : > { %v1599_v6 = vpop.f32.mrb[2].mxu0  ;;  %v1681_v7 = vpop.f32.mrb[2].mxu1  ;;  %3480 = vmatpush1.bf16.msra.mxu0 %v7142_v63  ;;  %v6524_v61 = vadd.f32 %v8279_v3, %v867_v43  ;;  %v1829_v3 = vrot.slane %v1812_v35, %v8314_v62  ;;  %v7205_v35 = vld [vmem:[#allocation11 + $0x148] ss:$16 sps:$4 sm:$0xff]   ;;  %v7216_v43 = vld [vmem:[#allocation11 + $0x1ac] ss:$16 sps:$4 sm:$0xff]  }
 0x24a   : > { %v1600_v10 = vpop.f32.mrb[3].mxu0  ;;  %v1682_v11 = vpop.f32.mrb[3].mxu1  ;;  %3481 = vmatprep.subr.bf16.mxu0 %v7147_v0  ;;  %v7180_v0 = vld [vmem:[#allocation11 + $0x2c] ss:$16 sps:$4 sm:$0xff]   ;;  %v3592_v6 = vpack.c.bf16 %v6523_v54, %v6523_v54  ;;  %v7211_v41 = vld [vmem:[#allocation11 + $0x188] ss:$16 sps:$4 sm:$0xff]  }
 0x24b   : > { %3512 = vmatprep.subr.bf16.mxu1 %v7180_v0  ;;  %v8325_v10 = vpack.c.bf16 %v6524_v61, %v6524_v61  ;;  %v875_v11 = vrot.slane %v858_v37, %v8314_v62  ;;  %v7210_v37 = vld [vmem:[#allocation11 + $0x16c] ss:$16 sps:$4 sm:$0xff]  }
 0x24c   : > { %3513 = vmatpush1.bf16.msra.mxu1 %v7178_v1  ;;  %v7231_v54 = vld [vmem:[#allocation11 + $0x24c] ss:$16 sps:$4 sm:$0xff]  }
 0x24d   : > { %3482 = vmatpush1.bf16.msra.mxu0 %v7145_v8  ;;  %v6525_v8 = vadd.f32 %v8277_v2, %v871_v60  ;;  %v6526_v2 = vadd.f32 %v8281_v4, %v875_v11  ;;  %v7189_v4 = vld [vmem:[#allocation11 + $0x8c] ss:$16 sps:$4 sm:$0xff]   ;;  %v7253_v11 = vld [vmem:[#allocation11 + $0x348] ss:$16 sps:$4 sm:$0xff]  }
 0x24e   : > { %3483 = vmatprep.subr.bf16.mxu0 %v7150_v12  ;;  %v7183_v12 = vld [vmem:[#allocation11 + $0x4c] ss:$16 sps:$4 sm:$0xff]  }
 0x24f   : > { %3514 = vmatprep.subr.bf16.mxu1 %v7183_v12  ;;  %v7240_v60 = vld [vmem:[#allocation11 + $0x2ac] ss:$16 sps:$4 sm:$0xff]  }
 0x250   : > { %v7243_v61 = vld [vmem:[#allocation11 + $0x2cc] ss:$16 sps:$4 sm:$0xff]  }
 0x251   : > { %3484 = vmatpush1.bf16.msra.mxu0 %v7148_v13  ;;  %v7246_v0 = vld [vmem:[#allocation11 + $0x2ec] ss:$16 sps:$4 sm:$0xff]  }
 0x252   : > { %3485 = vmatprep.subr.bf16.mxu0 %v7153_v14  ;;  %v7249_v1 = vld [vmem:[#allocation11 + $0x30c] ss:$16 sps:$4 sm:$0xff]  }
 0x253   : > { %v7258_v12 = vld [vmem:[#allocation11 + $0x36c] ss:$16 sps:$4 sm:$0xff]  }
 0x255   : > { %3486 = vmatpush1.bf16.msra.mxu0 %v7151_v15  ;;  %v7181_v15 = vld [vmem:[#allocation11 + $0x48] ss:$16 sps:$4 sm:$0xff]  }
 0x256   : > { %3487 = vmatprep.subr.bf16.mxu0 %v7156_v16  ;;  %v8333_v16 = vpack.c.bf16 %v6525_v8, %v6525_v8  ;;  %3515 = vmatpush1.bf16.msra.mxu1 %v7181_v15  ;;  %v7255_v8 = vld [vmem:[#allocation11 + $0x34c] ss:$16 sps:$4 sm:$0xff]  }
 0x257   : > { %v7261_v15 = vld [vmem:[#allocation11 + $0x38c] ss:$16 sps:$4 sm:$0xff]  }
 0x259   : > { %3488 = vmatpush1.bf16.msra.mxu0 %v7154_v17  ;;  %v7186_v17 = vld [vmem:[#allocation11 + $0x6c] ss:$16 sps:$4 sm:$0xff]  }
 0x25a   : > { %3489 = vmatprep.subr.bf16.mxu0 %v7159_v18  ;;  %3516 = vmatprep.subr.bf16.mxu1 %v7186_v17  ;;  %v7264_v17 = vld [vmem:[#allocation11 + $0x3ac] ss:$16 sps:$4 sm:$0xff]  }
 0x25d   : > { %3490 = vmatpush1.bf16.msra.mxu0 %v7157_v19  ;;  %v7184_v19 = vld [vmem:[#allocation11 + $0x68] ss:$16 sps:$4 sm:$0xff]  }
 0x25e   : > { %3491 = vmatprep.subr.bf16.mxu0 %v7162_v20  ;;  %v8345_v20 = vpack.c.bf16 %v6526_v2, %v6526_v2  ;;  %3517 = vmatpush1.bf16.msra.mxu1 %v7184_v19  ;;  %v7259_v2 = vld [vmem:[#allocation11 + $0x388] ss:$16 sps:$4 sm:$0xff]  }
 0x25f   : > { %3518 = vmatprep.subr.bf16.mxu1 %v7189_v4  ;;  %v7262_v4 = vld [vmem:[#allocation11 + $0x3a8] ss:$16 sps:$4 sm:$0xff]  }
 0x261   : > { %3492 = vmatpush1.bf16.msra.mxu0 %v7160_v21  ;;  %v7187_v21 = vld [vmem:[#allocation11 + $0x88] ss:$16 sps:$4 sm:$0xff]  }
 0x262   : > { %3493 = vmatprep.subr.bf16.mxu0 %v7165_v22  ;;  %v7192_v22 = vld [vmem:[#allocation11 + $0xac] ss:$16 sps:$4 sm:$0xff]   ;;  %3519 = vmatpush1.bf16.msra.mxu1 %v7187_v21 }
 0x263   : > { %3520 = vmatprep.subr.bf16.mxu1 %v7192_v22  ;;  %v7267_v22 = vld [vmem:[#allocation11 + $0x3cc] ss:$16 sps:$4 sm:$0xff]  }
 0x265   : > { %3494 = vmatpush1.bf16.msra.mxu0 %v7163_v23  ;;  %v7190_v23 = vld [vmem:[#allocation11 + $0xa8] ss:$16 sps:$4 sm:$0xff]  }
 0x266   : > { %3495 = vmatprep.subr.bf16.mxu0 %v7168_v24  ;;  %v7195_v24 = vld [vmem:[#allocation11 + $0xcc] ss:$16 sps:$4 sm:$0xff]   ;;  %3521 = vmatpush1.bf16.msra.mxu1 %v7190_v23  ;;  %v8358_v23 = vld [vmem:[%s8796_s18] sm:$0xf]  ;;  %s7703_s18 = scalar_lea.vmem %s8614_s26, 1024 }
 0x267   : > { %3522 = vmatprep.subr.bf16.mxu1 %v7195_v24  ;;  %v7265_v24 = vld [vmem:[#allocation11 + $0x3c8] ss:$16 sps:$4 sm:$0xff]   ;;  %p7704_p2 = scmp.ne.s32.totalorder %s8614_s26, %s7703_s18  ;;  %p7711_p7 = scmp.lt.s32.totalorder %s7709_s30, %s7703_s18 }
 0x269   : > { %3496 = vmatpush1.bf16.msra.mxu0 %v7166_v25  ;;  %v7193_v25 = vld [vmem:[#allocation11 + $0xc8] ss:$16 sps:$4 sm:$0xff]   ;;  %p7705_p12 = pnand %p7704_p2, %p8804_p1  ;;  %p7712_p11 = por %p7711_p7, %p7710_p9 }
 0x26a   : > { %3497 = vmatprep.subr.bf16.mxu0 %v7171_v26  ;;  %v7198_v26 = vld [vmem:[#allocation11 + $0xec] ss:$16 sps:$4 sm:$0xff]   ;;  %3523 = vmatpush1.bf16.msra.mxu1 %v7193_v25 }
 0x26b   : > { %3524 = vmatprep.subr.bf16.mxu1 %v7198_v26  ;;  %v7270_v25 = vld [vmem:[#allocation11 + $0x3ec] ss:$16 sps:$4 sm:$0xff]   ;;  %v2771_v26 = vrot.slane %v8358_v23, %v8297_v36  ;;  %p7706_p8 = pneg %p7705_p12 }
 0x26d   : > { %3498 = vmatpush1.bf16.msra.mxu0 %v7169_v27  ;;  %v7196_v27 = vld [vmem:[#allocation11 + $0xe8] ss:$16 sps:$4 sm:$0xff]   ;;  %p7713_p5 = pnand %p7712_p11, %p7706_p8 }
 0x26e   : > { %3499 = vmatprep.subr.bf16.mxu0 %v7174_v28  ;;  %v7201_v28 = vld [vmem:[#allocation11 + $0x10c] ss:$16 sps:$4 sm:$0xff]   ;;  %3525 = vmatpush1.bf16.msra.mxu1 %v7196_v27 }
 0x26f   : > { %3526 = vmatprep.subr.bf16.mxu1 %v7201_v28  ;;  %v7268_v28 = vld [vmem:[#allocation11 + $0x3e8] ss:$16 sps:$4 sm:$0xff]  }
 0x271   : > { %3500 = vmatpush1.bf16.msra.mxu0 %v7172_v29  ;;  %v7199_v29 = vld [vmem:[#allocation11 + $0x108] ss:$16 sps:$4 sm:$0xff]  }
 0x272   : > { %6427 = vmatprep.subr.bf16.mxu0 %v7840_v32  ;;  %3527 = vmatpush1.bf16.msra.mxu1 %v7199_v29 }
 0x273   : > { %3528 = vmatprep.subr.bf16.mxu1 %v7204_v30 }
 0x274   : > { %3502 = vmatmul.mubr.bf16.vlgmr.msra.gmra.mrb[8].mxu0 %v8288_v31 }
 0x275   : > { %6429 = vmatprep.mubr.msk.bf16.mxu0 %vm7841_vm0, %v7840_v32 }
 0x276   : > { %3529 = vmatpush1.bf16.msra.mxu1 %v7202_v33 }
 0x277   : > { %3530 = vmatprep.subr.bf16.mxu1 %v7207_v34 }
 0x27a   : > { %3531 = vmatpush1.bf16.msra.mxu1 %v7205_v35 }
 0x27b   : > { %3532 = vmatprep.subr.bf16.mxu1 %v7210_v37 }
 0x2c7   : > { %v2549_v44 = vpop.f32.mrb[4].mxu0  ;;  %v2631_v45 = vpop.f32.mrb[4].mxu1 }
 0x2c8   : > { %v6527_v46 = vadd.f32 %v2549_v44, %v1817_v39  ;;  %v2551_v47 = vpop.f32.mrb[5].mxu0  ;;  %v2633_v48 = vpop.f32.mrb[5].mxu1  ;;  %v6529_v7 = vadd.f32 %v2631_v45, %v1825_v56  ;;  %v7208_v39 = vld [vmem:[#allocation11 + $0x168] ss:$16 sps:$4 sm:$0xff]   ;;  %v7219_v45 = vld [vmem:[#allocation11 + $0x1cc] ss:$16 sps:$4 sm:$0xff]  }
 0x2c9   : > { %v6528_v49 = vadd.f32 %v2551_v47, %v1821_v40  ;;  %v2553_v50 = vpop.f32.mrb[6].mxu0  ;;  %v2635_v51 = vpop.f32.mrb[6].mxu1  ;;  %v6530_v14 = vadd.f32 %v2633_v48, %v1829_v3  ;;  %v7213_v40 = vld [vmem:[#allocation11 + $0x18c] ss:$16 sps:$4 sm:$0xff]   ;;  %3533 = vmatpush1.bf16.msra.mxu1 %v7208_v39  ;;  %v7214_v44 = vld [vmem:[#allocation11 + $0x1a8] ss:$16 sps:$4 sm:$0xff]  }
 0x2ca   : > { %v3596_v55 = vpack.c.bf16 %v6527_v46, %v6527_v46  ;;  %v2554_v57 = vpop.f32.mrb[7].mxu0  ;;  %v2636_v58 = vpop.f32.mrb[7].mxu1  ;;  %v8331_v13 = vpack.c.bf16 %v6529_v7, %v6529_v7  ;;  %3534 = vmatprep.subr.bf16.mxu1 %v7213_v40  ;;  %v7217_v46 = vld [vmem:[#allocation11 + $0x1c8] ss:$16 sps:$4 sm:$0xff]   ;;  %v7222_v47 = vld [vmem:[#allocation11 + $0x1ec] ss:$16 sps:$4 sm:$0xff]  }
 0x2cb   : > { %v8316_v63 = vpack.c.bf16 %v6528_v49, %v6528_v49  ;;  %v8343_v18 = vpack.c.bf16 %v6530_v14, %v6530_v14  ;;  %v7220_v48 = vld [vmem:[#allocation11 + $0x1e8] ss:$16 sps:$4 sm:$0xff]   ;;  %v7225_v49 = vld [vmem:[#allocation11 + $0x20c] ss:$16 sps:$4 sm:$0xff]  }
 0x2cc   : > { %v3609_v5 = vsel %vm3604_vm1, %v3596_v55, 0  ;;  %3720 = vrot.lane.b32.xlu0 %v3596_v55, %s7842_s4  ;;  %v7223_v50 = vld [vmem:[#allocation11 + $0x208] ss:$16 sps:$4 sm:$0xff]   ;;  %v7228_v51 = vld [vmem:[#allocation11 + $0x22c] ss:$16 sps:$4 sm:$0xff]  }
 0x2cd   : > { %3943 = vrot.lane.b32.xlu1 %v8316_v63, %s7842_s4  ;;  %6428 = vmatpush3.bf16.xpose.msra.mxu0 %v3609_v5  ;;  %v7229_v55 = vld [vmem:[#allocation11 + $0x248] ss:$16 sps:$4 sm:$0xff]   ;;  %v7234_v56 = vld [vmem:[#allocation11 + $0x26c] ss:$16 sps:$4 sm:$0xff]   ;;  %v3836_v29 = vsel %vm3604_vm1, %v8316_v63, 0 }
 0x2ce   : > { %6439 = vmatprep.subr.bf16.mxu0 %v7840_v32  ;;  %3535 = vmatpush1.bf16.msra.mxu1 %v7211_v41  ;;  %v7232_v57 = vld [vmem:[#allocation11 + $0x268] ss:$16 sps:$4 sm:$0xff]   ;;  %v7237_v58 = vld [vmem:[#allocation11 + $0x28c] ss:$16 sps:$4 sm:$0xff]  }
 0x2cf   : > { %3536 = vmatprep.subr.bf16.mxu1 %v7216_v43  ;;  %v7244_v5 = vld [vmem:[#allocation11 + $0x2e8] ss:$16 sps:$4 sm:$0xff]   ;;  %v7252_v7 = vld [vmem:[#allocation11 + $0x32c] ss:$16 sps:$4 sm:$0xff]  }
 0x2d0   : > { %3717 = vrot.lane.b32.xlu0 %v3592_v6, %s7842_s4  ;;  %v7250_v3 = vld [vmem:[#allocation11 + $0x328] ss:$16 sps:$4 sm:$0xff]  }
 0x2d1   : > { %3940 = vrot.lane.b32.xlu1 %v8325_v10, %s7842_s4  ;;  %v7256_v14 = vld [vmem:[#allocation11 + $0x368] ss:$16 sps:$4 sm:$0xff]  }
 0x2d2   : > { %3537 = vmatpush1.bf16.msra.mxu1 %v7214_v44 }
 0x2d3   : > { %3538 = vmatprep.subr.bf16.mxu1 %v7219_v45  ;;  %v4282_v45 = vsel %vm3604_vm1, %v8343_v18, 0 }
 0x2d4   : > { %4166 = vrot.lane.b32.xlu0 %v8331_v13, %s7842_s4  ;;  %6430 = vmatmul.mubr.msk.bf16.vlgmr.msra.gmra.mrb[12].mxu0 %vm3604_vm1, %v3592_v6  ;;  %v7247_v6 = vld [vmem:[#allocation11 + $0x308] ss:$16 sps:$4 sm:$0xff]  }
 0x2d5   : > { %4163 = vrot.lane.b32.xlu1 %v8333_v16, %s7842_s4  ;;  %6441 = vmatprep.mubr.msk.bf16.mxu0 %vm7841_vm0, %v7840_v32 }
 0x2d6   : > { %3539 = vmatpush1.bf16.msra.mxu1 %v7217_v46 }
 0x2d7   : > { %3540 = vmatprep.subr.bf16.mxu1 %v7222_v47 }
 0x2d8   : > { %4389 = vrot.lane.b32.xlu0 %v8343_v18, %s7842_s4  ;;  %v716_v18 = vld [vmem:[%s700_s1] sm:$0x3] }
 0x2d9   : > { %4386 = vrot.lane.b32.xlu1 %v8345_v20, %s7842_s4  ;;  %vm717_vm3 = vnez %v716_v18 }
 0x2da   : > { %3541 = vmatpush1.bf16.msra.mxu1 %v7220_v48  ;;  %v7843_v48 = vmov 0  }
 0x2db   : > { %3551 = vmatprep.subr.bf16.mxu1 %v7225_v49  ;;  %v3651_v49 = vsel %vm717_vm3, 16843009, %v7843_v48 }
 0x2dd   : > { %3543 = vmatmul.mubr.bf16.vlgmr.msra.gmra.mrb[8].mxu1 %v8272_v52  ;;  %v7238_v52 = vld [vmem:[#allocation11 + $0x2a8] ss:$16 sps:$4 sm:$0xff]  }
 0x2de   : > { %3552 = vmatpush1.bf16.msra.mxu1 %v7223_v50  ;;  %3583 = vmatprep.mubr.bf16.mxu1 %v8284_v9  ;;  %v7241_v9 = vld [vmem:[#allocation11 + $0x2c8] ss:$16 sps:$4 sm:$0xff]   ;;  %v3652_v50 = vunpack.c.0.s8 %v3651_v49 }
 0x2df   : > { %3553 = vmatprep.subr.bf16.mxu1 %v7228_v51 }
 0x2e0   : > { %vm8414_vm4 = vcmp.ne.s32.totalorder %v3652_v50, 0 }
 0x2e2   : > { %3554 = vmatpush1.bf16.msra.mxu1 %v7226_v53 }
 0x2e3   : > { %3555 = vmatprep.subr.bf16.mxu1 %v7231_v54 }
 0x2e6   : > { %3556 = vmatpush1.bf16.msra.mxu1 %v7229_v55 }
 0x2e7   : > { %3557 = vmatprep.subr.bf16.mxu1 %v7234_v56 }
 0x2ea   : > { %3558 = vmatpush1.bf16.msra.mxu1 %v7232_v57 }
 0x2eb   : > { %3559 = vmatprep.subr.bf16.mxu1 %v7237_v58 }
 0x2ee   : > { %3560 = vmatpush1.bf16.msra.mxu1 %v7235_v59 }
 0x2ef   : > { %3561 = vmatprep.subr.bf16.mxu1 %v7240_v60 }
 0x2f2   : > { %3562 = vmatpush1.bf16.msra.mxu1 %v7238_v52 }
 0x2f3   : > { %3563 = vmatprep.subr.bf16.mxu1 %v7243_v61 }
 0x2f6   : > { %3564 = vmatpush1.bf16.msra.mxu1 %v7241_v9 }
 0x2f7   : > { %3565 = vmatprep.subr.bf16.mxu1 %v7246_v0 }
 0x2fa   : > { %3566 = vmatpush1.bf16.msra.mxu1 %v7244_v5 }
 0x2fb   : > { %3567 = vmatprep.subr.bf16.mxu1 %v7249_v1 }
 0x2fe   : > { %3568 = vmatpush1.bf16.msra.mxu1 %v7247_v6 }
 0x2ff   : > { %3569 = vmatprep.subr.bf16.mxu1 %v7252_v7 }
 0x302   : > { %3570 = vmatpush1.bf16.msra.mxu1 %v7250_v3 }
 0x303   : > { %3571 = vmatprep.subr.bf16.mxu1 %v7255_v8 }
 0x306   : > { %3572 = vmatpush1.bf16.msra.mxu1 %v7253_v11 }
 0x307   : > { %3573 = vmatprep.subr.bf16.mxu1 %v7258_v12 }
 0x30a   : > { %3574 = vmatpush1.bf16.msra.mxu1 %v7256_v14 }
 0x30b   : > { %3575 = vmatprep.subr.bf16.mxu1 %v7261_v15 }
 0x30e   : > { %3576 = vmatpush1.bf16.msra.mxu1 %v7259_v2 }
 0x30f   : > { %3577 = vmatprep.subr.bf16.mxu1 %v7264_v17 }
 0x312   : > { %3578 = vmatpush1.bf16.msra.mxu1 %v7262_v4 }
 0x313   : > { %3579 = vmatprep.subr.bf16.mxu1 %v7267_v22 }
 0x316   : > { %3580 = vmatpush1.bf16.msra.mxu1 %v7265_v24 }
 0x317   : > { %3581 = vmatprep.subr.bf16.mxu1 %v7270_v25 }
 0x31a   : > { %3582 = vmatpush1.bf16.msra.mxu1 %v7268_v28 }
 0x31b   : > { %6433 = vmatprep.subr.bf16.mxu1 %v7840_v32 }
 0x31d   : > { %3584 = vmatmul.mubr.bf16.vlgmr.msra.gmra.mrb[8].mxu1 %v8288_v31  ;;  %v4059_v31 = vsel %vm3604_vm1, %v8331_v13, 0 }
 0x31e   : > { %6435 = vmatprep.mubr.msk.bf16.mxu1 %vm7841_vm0, %v7840_v32 }
 0x33e   : > { %v3721_v19 = vpop.permute.xlu0 %3720 }
 0x33f   : > { %v3726_v21 = vsel %vm3604_vm1, %v3721_v19, 0  ;;  %v3944_v63 = vpop.permute.xlu1 %3943 }
 0x340   : > { %6440 = vmatpush3.bf16.xpose.msra.mxu0 %v3726_v21  ;;  %v3949_v41 = vsel %vm3604_vm1, %v3944_v63, 0 }
 0x341   : > { %6451 = vmatprep.subr.bf16.mxu0 %v7840_v32 }
 0x342   : > { %v3718_v27 = vpop.permute.xlu0 %3717 }
 0x343   : > { %v3941_v43 = vpop.permute.xlu1 %3940 }
 0x347   : > { %6442 = vmatmul.mubr.msk.bf16.vlgmr.msra.gmra.mrb[16].mxu0 %vm3604_vm1, %v3718_v27  ;;  %v3503_v30 = vpop.f32.mrb[8].mxu0  ;;  %v4164_v13 = vpop.permute.xlu1 %4163 }
 0x348   : > { %6452 = vmatpush3.bf16.xpose.msra.mxu0 %v3836_v29  ;;  %6453 = vmatprep.mubr.msk.bf16.mxu0 %vm7841_vm0, %v7840_v32  ;;  %v6531_v33 = vadd.f32 %v3503_v30, %v2771_v26  ;;  %v8367_v34 = vpop.f32.mrb[9].mxu0 }
 0x349   : > { %6463 = vmatprep.subr.bf16.mxu0 %v7840_v32  ;;  %v3507_v35 = vpop.f32.mrb[10].mxu0 }
 0x34a   : > { %v8370_v37 = vpack.c.bf16 %v6531_v33, %v6531_v33  ;;  %v3508_v39 = vpop.f32.mrb[11].mxu0 }
 0x34b   : > { %v4387_v47 = vpop.permute.xlu1 %4386 }
 0x34c   : > { %v3674_v40 = vsel %vm3672_vm2, %v8370_v37, 0 }
 0x34d   : > { %6434 = vmatpush3.bf16.msra.mxu1 %v3674_v40 }
 0x34e   : > { %6445 = vmatprep.subr.bf16.mxu1 %v7840_v32 }
 0x34f   : > { %6454 = vmatmul.mubr.msk.bf16.vlgmr.msra.gmra.mrb[20].mxu0 %vm3604_vm1, %v8325_v10  ;;  %v4167_v10 = vpop.permute.xlu0 %4166 }
 0x350   : > { %6464 = vmatpush3.bf16.xpose.msra.mxu0 %v3949_v41  ;;  %6465 = vmatprep.mubr.msk.bf16.mxu0 %vm7841_vm0, %v7840_v32  ;;  %v4172_v44 = vsel %vm3604_vm1, %v4167_v10, 0 }
 0x351   : > { %6475 = vmatprep.subr.bf16.mxu0 %v7840_v32 }
 0x357   : > { %6466 = vmatmul.mubr.msk.bf16.vlgmr.msra.gmra.mrb[24].mxu0 %vm3604_vm1, %v3941_v43 }
 0x358   : > { %6476 = vmatpush3.bf16.xpose.msra.mxu0 %v4059_v31  ;;  %6477 = vmatprep.mubr.msk.bf16.mxu0 %vm7841_vm0, %v7840_v32 }
 0x359   : > { %6487 = vmatprep.subr.bf16.mxu0 %v7840_v32 }
 0x35f   : > { %6478 = vmatmul.mubr.msk.bf16.vlgmr.msra.gmra.mrb[28].mxu0 %vm3604_vm1, %v8333_v16  ;;  %v4390_v16 = vpop.permute.xlu0 %4389 }
 0x360   : > { %6488 = vmatpush3.bf16.xpose.msra.mxu0 %v4172_v44  ;;  %6489 = vmatprep.mubr.msk.bf16.mxu0 %vm7841_vm0, %v7840_v32  ;;  %v4395_v46 = vsel %vm3604_vm1, %v4390_v16, 0 }
 0x361   : > { %6499 = vmatprep.subr.bf16.mxu0 %v7840_v32 }
 0x367   : > { %6490 = vmatmul.mubr.msk.bf16.vlgmr.msra.gmra.mrb[32].mxu0 %vm3604_vm1, %v4164_v13 }
 0x368   : > { %6500 = vmatpush3.bf16.xpose.msra.mxu0 %v4282_v45  ;;  %6501 = vmatprep.mubr.msk.bf16.mxu0 %vm7841_vm0, %v7840_v32 }
 0x369   : > { %6511 = vmatprep.subr.bf16.mxu0 %v7840_v32 }
 0x36f   : > { %6502 = vmatmul.mubr.msk.bf16.vlgmr.msra.gmra.mrb[36].mxu0 %vm3604_vm1, %v8345_v20 }
 0x370   : > { %6512 = vmatpush3.bf16.xpose.msra.mxu0 %v4395_v46  ;;  %6513 = vmatprep.mubr.msk.bf16.mxu0 %vm7841_vm0, %v7840_v32 }
 0x377   : > { %6514 = vmatmul.mubr.msk.bf16.vlgmr.msra.gmra.mrb[40].mxu0 %vm3604_vm1, %v4387_v47 }
 0x3a7   : > { %v3645_v51 = vpop.f32.mrb[12].mxu0 }
 0x3a8   : > { %v3654_v53 = vsel %vm8414_vm4, -1e+09, %v3645_v51  ;;  %v6431_v54 = vpop.f32.mrb[13].mxu0 }
 0x3a9   : > { %v3648_v55 = vpop.f32.mrb[14].mxu0  ;;  %v3656_v56 = vsel %vm3655_vm5, %v3654_v53, -inf }
 0x3aa   : > { %3657 = vmax.xlane.f32.xlu0 %v3656_v56  ;;  %v6432_v57 = vpop.f32.mrb[15].mxu0 }
 0x3f0   : > { %v8452_v49 = vpop.f32.mrb[8].mxu1 }
 0x3f1   : > { %v8454_v50 = vpop.f32.mrb[9].mxu1 }
 0x3f2   : > { %v3589_v51 = vpop.f32.mrb[10].mxu1 }
 0x41a   : > { %v3762_v58 = vpop.f32.mrb[16].mxu0 }
 0x41b   : > { %v3768_v59 = vsel %vm8414_vm4, -1e+09, %v3762_v58  ;;  %v6443_v60 = vpop.f32.mrb[17].mxu0 }
 0x41c   : > { %v3765_v52 = vpop.f32.mrb[18].mxu0  ;;  %v3769_v61 = vsel %vm3655_vm5, %v3768_v59, -inf }
 0x41d   : > { %3770 = vmax.xlane.f32.xlu1 %v3769_v61  ;;  %v6444_v9 = vpop.f32.mrb[19].mxu0 }
 0x422   : > { %v3872_v0 = vpop.f32.mrb[20].mxu0 }
 0x423   : > { %v3878_v5 = vsel %vm8414_vm4, -1e+09, %v3872_v0  ;;  %v6455_v1 = vpop.f32.mrb[21].mxu0 }
 0x424   : > { %v3875_v6 = vpop.f32.mrb[22].mxu0  ;;  %v3879_v7 = vsel %vm3655_vm5, %v3878_v5, -inf }
 0x425   : > { %3880 = vmax.xlane.f32.xlu0 %v3879_v7  ;;  %v6456_v3 = vpop.f32.mrb[23].mxu0  ;;  %v2775_v6 = vrot.slane %v8358_v23, %v8302_v38 }
 0x427   : > { %v6532_v3 = vadd.f32 %v8367_v34, %v2775_v6 }
 0x42a   : > { %v3985_v8 = vpop.f32.mrb[24].mxu0 }
 0x42b   : > { %v3991_v11 = vsel %vm8414_vm4, -1e+09, %v3985_v8  ;;  %v6467_v12 = vpop.f32.mrb[25].mxu0 }
 0x42c   : > { %v3988_v14 = vpop.f32.mrb[26].mxu0  ;;  %v3992_v15 = vsel %vm3655_vm5, %v3991_v11, -inf }
 0x42d   : > { %3993 = vmax.xlane.f32.xlu0 %v3992_v15  ;;  %v6468_v2 = vpop.f32.mrb[27].mxu0 }
 0x432   : > { %v4095_v17 = vpop.f32.mrb[28].mxu0 }
 0x433   : > { %v8432_v19 = vsel %vm8414_vm4, -1e+09, %v4095_v17  ;;  %v6479_v4 = vpop.f32.mrb[29].mxu0 }
 0x434   : > { %v4098_v21 = vpop.f32.mrb[30].mxu0  ;;  %v4102_v22 = vsel %vm3655_vm5, %v8432_v19, -inf }
 0x435   : > { %4103 = vmax.xlane.f32.xlu1 %v4102_v22  ;;  %v6480_v24 = vpop.f32.mrb[31].mxu0 }
 0x437   : > { %v3658_v25 = vpop.xlane.xlu0 %3657 }
 0x438   : > { %v3659_v26 = vsub.f32 %v3654_v53, %v3658_v25  ;;  %v3590_v53 = vpop.f32.mrb[11].mxu1 }
 0x43a   : > { %v3660_v27 = vmul.f32 1.442695, %v3659_v26  ;;  %v4208_v28 = vpop.f32.mrb[32].mxu0 }
 0x43b   : > { %v8438_v29 = vsel %vm8414_vm4, -1e+09, %v4208_v28  ;;  %v6491_v30 = vpop.f32.mrb[33].mxu0 }
 0x43c   : > { %7463 = vpow2.f32 %v3660_v27  ;;  %v4211_v33 = vpop.f32.mrb[34].mxu0  ;;  %v4215_v35 = vsel %vm3655_vm5, %v8438_v29, -inf }
 0x43d   : > { %4216 = vmax.xlane.f32.xlu0 %v4215_v35  ;;  %v6492_v39 = vpop.f32.mrb[35].mxu0 }
 0x442   : > { %v4318_v63 = vpop.f32.mrb[36].mxu0 }
 0x443   : > { %v8444_v40 = vsel %vm8414_vm4, -1e+09, %v4318_v63  ;;  %v6503_v41 = vpop.f32.mrb[37].mxu0 }
 0x444   : > { %v4321_v43 = vpop.f32.mrb[38].mxu0  ;;  %v4325_v31 = vsel %vm3655_vm5, %v8444_v40, -inf  ;;  %v2779_v41 = vrot.slane %v8358_v23, %v8307_v42 }
 0x445   : > { %4326 = vmax.xlane.f32.xlu1 %v4325_v31  ;;  %v6504_v10 = vpop.f32.mrb[39].mxu0  ;;  %v2783_v31 = vrot.slane %v8358_v23, %v8314_v62 }
 0x446   : > { %v7464_v44 = vpop.eup %7463  ;;  %v6533_v43 = vadd.f32 %v8452_v49, %v2779_v41  ;;  %v7286_v41 = vld [vmem:[#allocation13 + $0xa0] ss:$16 sps:$4 sm:$0xff]  }
 0x447   : > { %v3662_v13 = vsel %vm3655_vm5, %v7464_v44, 0.0 }
 0x448   : > { %v3602_v10 = vpack.c.bf16 %v6533_v43, %v6533_v43  ;;  %v7291_v43 = vld [vmem:[#allocation13 + $0xc4] ss:$16 sps:$4 sm:$0xff]  }
 0x449   : > { %3663 = vadd.xlane.f32.xlu1 %v3662_v13 }
 0x44a   : > { %v4431_v45 = vpop.f32.mrb[40].mxu0 }
 0x44b   : > { %v4437_v16 = vsel %vm8414_vm4, -1e+09, %v4431_v45  ;;  %v6515_v46 = vpop.f32.mrb[41].mxu0 }
 0x44c   : > { %v4434_v47 = vpop.f32.mrb[42].mxu0  ;;  %v4438_v18 = vsel %vm3655_vm5, %v4437_v16, -inf }
 0x44d   : > { %4439 = vmax.xlane.f32.xlu0 %v4438_v18  ;;  %v6516_v48 = vpop.f32.mrb[43].mxu0 }
 0x4aa   : > { %v3771_v54 = vpop.xlane.xlu1 %3770 }
 0x4ab   : > { %v3772_v55 = vsub.f32 %v3768_v59, %v3771_v54 }
 0x4ad   : > { %v3773_v56 = vmul.f32 1.442695, %v3772_v55 }
 0x4af   : > { %7465 = vpow2.f32 %v3773_v56 }
 0x4b2   : > { %v3881_v57 = vpop.xlane.xlu0 %3880 }
 0x4b3   : > { %v3882_v58 = vsub.f32 %v3878_v5, %v3881_v57 }
 0x4b5   : > { %v3883_v20 = vmul.f32 1.442695, %v3882_v58 }
 0x4b7   : > { %7467 = vpow2.f32 %v3883_v20 }
 0x4b9   : > { %v8456_v60 = vpop.eup %7465 }
 0x4ba   : > { %v3994_v52 = vpop.xlane.xlu0 %3993  ;;  %v3775_v61 = vsel %vm3655_vm5, %v8456_v60, 0.0 }
 0x4bb   : > { %v3995_v9 = vsub.f32 %v3991_v11, %v3994_v52  ;;  %3776 = vadd.xlane.f32.xlu0 %v3775_v61  ;;  %v8471_v11 = vpack.c.bf16 %v6532_v3, %v6532_v3 }
 0x4bd   : > { %v3996_v0 = vmul.f32 1.442695, %v3995_v9  ;;  %v3897_v53 = vsel %vm3672_vm2, %v8471_v11, 0 }
 0x4bf   : > { %7469 = vpow2.f32 %v3996_v0 }
 0x4c1   : > { %v8460_v1 = vpop.eup %7467 }
 0x4c2   : > { %v3885_v59 = vsel %vm3655_vm5, %v8460_v1, 0.0  ;;  %v4104_v8 = vpop.xlane.xlu1 %4103 }
 0x4c3   : > { %3886 = vadd.xlane.f32.xlu1 %v3885_v59  ;;  %v4105_v2 = vsub.f32 %v8432_v19, %v4104_v8 }
 0x4c5   : > { %v4106_v21 = vmul.f32 1.442695, %v4105_v2 }
 0x4c9   : > { %v8464_v5 = vpop.eup %7469 }
 0x4ca   : > { %v3998_v7 = vsel %vm3655_vm5, %v8464_v5, 0.0  ;;  %v4217_v17 = vpop.xlane.xlu0 %4216 }
 0x4cb   : > { %3999 = vadd.xlane.f32.xlu0 %v3998_v7  ;;  %v4218_v22 = vsub.f32 %v8438_v29, %v4217_v17 }
 0x4cd   : > { %v4219_v19 = vmul.f32 1.442695, %v4218_v22 }
 0x4d2   : > { %v4327_v12 = vpop.xlane.xlu1 %4326 }
 0x4d4   : > { %4007 = vrot.lane.b32.xlu1 %v8471_v11, %s7842_s4 }
 0x4d6   : > { %v3664_v14 = vpop.xlane.xlu1 %3663 }
 0x4d7   : > { %7471 = vrcp.f32 %v3664_v14 }
 0x4d8   : > { %7473 = vpow2.f32 %v4106_v21 }
 0x4d9   : > { %7475 = vpow2.f32 %v4219_v19 }
 0x4da   : > { %v4440_v24 = vpop.xlane.xlu0 %4439 }
 0x4db   : > { %v4441_v25 = vsub.f32 %v4437_v16, %v4440_v24 }
 0x4dd   : > { %v4442_v27 = vmul.f32 1.442695, %v4441_v25 }
 0x4e1   : > { %3784 = vrot.lane.b32.xlu0 %v8370_v37, %s7842_s4  ;;  %v7472_v15 = vpop.eup %7471  ;;  %v4328_v37 = vsub.f32 %v8444_v40, %v4327_v12 }
 0x4e2   : > { %v3666_v4 = vmul.f32 %v7472_v15, %v7464_v44  ;;  %v8488_v28 = vpop.eup %7473  ;;  %v6534_v44 = vadd.f32 %v8454_v50, %v2783_v31  ;;  %v7289_v31 = vld [vmem:[#allocation13 + $0xc0] ss:$16 sps:$4 sm:$0xff]  }
 0x4e3   : > { %v4329_v26 = vmul.f32 1.442695, %v4328_v37  ;;  %v4108_v29 = vsel %vm3655_vm5, %v8488_v28, 0.0  ;;  %v8492_v30 = vpop.eup %7475 }
 0x4e4   : > { %3667 = vst.msk [vmem:[%s8479_s25] sm:$0xff] %vm3655_vm5, %v3666_v4  ;;  %v3668_v34 = vpack.c.bf16 %v3666_v4, %v3666_v4  ;;  %v4221_v35 = vsel %vm3655_vm5, %v8492_v30, 0.0  ;;  %v8511_v13 = vpack.c.bf16 %v6534_v44, %v6534_v44  ;;  %v7292_v44 = vld [vmem:[#allocation13 + $0xe0] ss:$16 sps:$4 sm:$0xff]  }
 0x4e5   : > { %7477 = vpow2.f32 %v4329_v26  ;;  %v7271_v26 = vld [vmem:[#allocation13] ss:$16 sps:$4 sm:$0xff]  }
 0x4e6   : > { %6436 = vmatmul.mubr.msk.bf16.vlgmr.msra.gmra.mrb[12].mxu1 %vm3655_vm5, %v3668_v34  ;;  %7479 = vpow2.f32 %v4442_v27  ;;  %v4343_v17 = vsel %vm3672_vm2, %v8511_v13, 0  ;;  %v7273_v27 = vld [vmem:[#allocation13 + $0x4] ss:$16 sps:$4 sm:$0xff]  }
 0x4e7   : > { %6447 = vmatprep.mubr.msk.bf16.mxu1 %vm7841_vm0, %v7840_v32  ;;  %5315 = vmatprep.subr.bf16.mxu0 %v7273_v27  ;;  %v7358_v27 = vld [vmem:[#allocation13 + $0x2e0] ss:$16 sps:$4 sm:$0xff]  }
 0x4e8   : > { %5316 = vmatpush1.bf16.msra.mxu0 %v7271_v26  ;;  %v7354_v26 = vld [vmem:[#allocation13 + $0x2c4] ss:$16 sps:$4 sm:$0xff]  }
 0x4ef   : > { %v8494_v33 = vpop.eup %7477 }
 0x4f0   : > { %v8498_v39 = vpop.eup %7479  ;;  %v4331_v63 = vsel %vm3655_vm5, %v8494_v33, 0.0 }
 0x4f1   : > { %v4444_v40 = vsel %vm3655_vm5, %v8498_v39, 0.0 }
 0x4f8   : > { %4109 = vadd.xlane.f32.xlu1 %v4108_v29  ;;  %v7276_v29 = vld [vmem:[#allocation13 + $0x24] ss:$16 sps:$4 sm:$0xff]  }
 0x4f9   : > { %5317 = vmatprep.subr.bf16.mxu0 %v7276_v29  ;;  %v7364_v29 = vld [vmem:[#allocation13 + $0x300] ss:$16 sps:$4 sm:$0xff]  }
 0x4fc   : > { %4222 = vadd.xlane.f32.xlu1 %v4221_v35  ;;  %v7280_v35 = vld [vmem:[#allocation13 + $0x60] ss:$16 sps:$4 sm:$0xff]  }
 0x500   : > { %4332 = vadd.xlane.f32.xlu1 %v4331_v63  ;;  %4445 = vadd.xlane.f32.xlu0 %v4444_v40  ;;  %v7283_v63 = vld [vmem:[#allocation13 + $0x80] ss:$16 sps:$4 sm:$0xff]   ;;  %v7288_v40 = vld [vmem:[#allocation13 + $0xa4] ss:$16 sps:$4 sm:$0xff]  }
 0x511   : > { %4230 = vrot.lane.b32.xlu1 %v3602_v10, %s7842_s4 }
 0x515   : > { %4453 = vrot.lane.b32.xlu1 %v8511_v13, %s7842_s4  ;;  %v7297_v13 = vld [vmem:[#allocation13 + $0x104] ss:$16 sps:$4 sm:$0xff]  }
 0x548   : > { %v3777_v45 = vpop.xlane.xlu0 %3776 }
 0x549   : > { %7481 = vrcp.f32 %v3777_v45  ;;  %v7295_v45 = vld [vmem:[#allocation13 + $0x100] ss:$16 sps:$4 sm:$0xff]  }
 0x550   : > { %v3887_v16 = vpop.xlane.xlu1 %3886 }
 0x551   : > { %7483 = vrcp.f32 %v3887_v16  ;;  %v7300_v16 = vld [vmem:[#allocation13 + $0x124] ss:$16 sps:$4 sm:$0xff]  }
 0x553   : > { %v7482_v46 = vpop.eup %7481 }
 0x554   : > { %v3779_v47 = vmul.f32 %v7482_v46, %v8456_v60  ;;  %v4008_v56 = vpop.permute.xlu1 %4007  ;;  %v4120_v60 = vsel %vm3672_vm2, %v3602_v10, 0  ;;  %v7294_v10 = vld [vmem:[#allocation13 + $0xe4] ss:$16 sps:$4 sm:$0xff]   ;;  %v7298_v46 = vld [vmem:[#allocation13 + $0x120] ss:$16 sps:$4 sm:$0xff]  }
 0x555   : > { %v4013_v58 = vsel %vm3672_vm2, %v4008_v56, 0 }
 0x556   : > { %6234 = vst.msk [vmem:[%s8479_s25 + $0x8] sm:$0xff] %vm3655_vm5, %v3779_v47  ;;  %v3782_v51 = vpack.c.bf16 %v3779_v47, %v3779_v47  ;;  %v7303_v47 = vld [vmem:[#allocation13 + $0x144] ss:$16 sps:$4 sm:$0xff]  }
 0x558   : > { %v4000_v23 = vpop.xlane.xlu0 %3999 }
 0x559   : > { %7485 = vrcp.f32 %v4000_v23  ;;  %v7301_v23 = vld [vmem:[#allocation13 + $0x140] ss:$16 sps:$4 sm:$0xff]  }
 0x55b   : > { %v7484_v18 = vpop.eup %7483 }
 0x55c   : > { %v3889_v48 = vmul.f32 %v7484_v18, %v8460_v1  ;;  %v3785_v49 = vpop.permute.xlu0 %3784  ;;  %v7306_v18 = vld [vmem:[#allocation13 + $0x164] ss:$16 sps:$4 sm:$0xff]  }
 0x55d   : > { %v3790_v50 = vsel %vm3672_vm2, %v3785_v49, 0  ;;  %v7309_v49 = vld [vmem:[#allocation13 + $0x184] ss:$16 sps:$4 sm:$0xff]  }
 0x55e   : > { %6237 = vst.msk [vmem:[%s8479_s25 + $0x10] sm:$0xff] %vm3655_vm5, %v3889_v48  ;;  %6446 = vmatpush3.bf16.msra.mxu1 %v3790_v50  ;;  %v3892_v57 = vpack.c.bf16 %v3889_v48, %v3889_v48  ;;  %v7304_v48 = vld [vmem:[#allocation13 + $0x160] ss:$16 sps:$4 sm:$0xff]  }
 0x55f   : > { %6457 = vmatprep.subr.bf16.mxu1 %v7840_v32  ;;  %v7307_v50 = vld [vmem:[#allocation13 + $0x180] ss:$16 sps:$4 sm:$0xff]  }
 0x561   : > { %6448 = vmatmul.mubr.msk.bf16.vlgmr.msra.gmra.mrb[16].mxu1 %vm3655_vm5, %v3782_v51  ;;  %v7312_v51 = vld [vmem:[#allocation13 + $0x1a4] ss:$16 sps:$4 sm:$0xff]  }
 0x562   : > { %6458 = vmatpush3.bf16.msra.mxu1 %v3897_v53  ;;  %6459 = vmatprep.mubr.msk.bf16.mxu1 %vm7841_vm0, %v7840_v32  ;;  %v7310_v53 = vld [vmem:[#allocation13 + $0x1a0] ss:$16 sps:$4 sm:$0xff]  }
 0x563   : > { %v7486_v54 = vpop.eup %7485  ;;  %6469 = vmatprep.subr.bf16.mxu1 %v7840_v32 }
 0x564   : > { %v4002_v55 = vmul.f32 %v7486_v54, %v8464_v5  ;;  %v7315_v54 = vld [vmem:[#allocation13 + $0x1c4] ss:$16 sps:$4 sm:$0xff]  }
 0x566   : > { %6240 = vst.msk [vmem:[%s8479_s25 + $0x18] sm:$0xff] %vm3655_vm5, %v4002_v55  ;;  %v4005_v20 = vpack.c.bf16 %v4002_v55, %v4002_v55 }
 0x569   : > { %6460 = vmatmul.mubr.msk.bf16.vlgmr.msra.gmra.mrb[20].mxu1 %vm3655_vm5, %v3892_v57  ;;  %v7313_v57 = vld [vmem:[#allocation13 + $0x1c0] ss:$16 sps:$4 sm:$0xff]  }
 0x56a   : > { %6470 = vmatpush3.bf16.msra.mxu1 %v4013_v58  ;;  %6471 = vmatprep.mubr.msk.bf16.mxu1 %vm7841_vm0, %v7840_v32 }
 0x56b   : > { %6481 = vmatprep.subr.bf16.mxu1 %v7840_v32 }
 0x571   : > { %6472 = vmatmul.mubr.msk.bf16.vlgmr.msra.gmra.mrb[24].mxu1 %vm3655_vm5, %v4005_v20 }
 0x572   : > { %6482 = vmatpush3.bf16.msra.mxu1 %v4120_v60  ;;  %6483 = vmatprep.mubr.msk.bf16.mxu1 %vm7841_vm0, %v7840_v32  ;;  %v7318_v60 = vld [vmem:[#allocation13 + $0x1e4] ss:$16 sps:$4 sm:$0xff]  }
 0x573   : > { %6493 = vmatprep.subr.bf16.mxu1 %v7840_v32 }
 0x585   : > { %v4110_v52 = vpop.xlane.xlu1 %4109 }
 0x586   : > { %7487 = vrcp.f32 %v4110_v52  ;;  %v7321_v52 = vld [vmem:[#allocation13 + $0x204] ss:$16 sps:$4 sm:$0xff]  }
 0x589   : > { %v4223_v61 = vpop.xlane.xlu1 %4222 }
 0x58a   : > { %7489 = vrcp.f32 %v4223_v61  ;;  %v7316_v61 = vld [vmem:[#allocation13 + $0x1e0] ss:$16 sps:$4 sm:$0xff]  }
 0x58d   : > { %v4333_v9 = vpop.xlane.xlu1 %4332  ;;  %v4446_v0 = vpop.xlane.xlu0 %4445 }
 0x58e   : > { %7491 = vrcp.f32 %v4333_v9  ;;  %v7319_v9 = vld [vmem:[#allocation13 + $0x200] ss:$16 sps:$4 sm:$0xff]  }
 0x58f   : > { %7493 = vrcp.f32 %v4446_v0 }
 0x590   : > { %v7488_v1 = vpop.eup %7487 }
 0x591   : > { %v4112_v59 = vmul.f32 %v7488_v1, %v8488_v28  ;;  %v4231_v5 = vpop.permute.xlu1 %4230  ;;  %v7274_v28 = vld [vmem:[#allocation13 + $0x20] ss:$16 sps:$4 sm:$0xff]  }
 0x592   : > { %v4236_v8 = vsel %vm3672_vm2, %v4231_v5, 0  ;;  %5318 = vmatpush1.bf16.msra.mxu0 %v7274_v28  ;;  %v7324_v5 = vld [vmem:[#allocation13 + $0x224] ss:$16 sps:$4 sm:$0xff]  }
 0x593   : > { %6243 = vst.msk [vmem:[%s8479_s25 + $0x20] sm:$0xff] %vm3655_vm5, %v4112_v59  ;;  %v4115_v6 = vpack.c.bf16 %v4112_v59, %v4112_v59  ;;  %v7360_v28 = vld [vmem:[#allocation13 + $0x2e4] ss:$16 sps:$4 sm:$0xff]  }
 0x594   : > { %v7490_v7 = vpop.eup %7489 }
 0x595   : > { %v4225_v3 = vmul.f32 %v7490_v7, %v8492_v30  ;;  %6484 = vmatmul.mubr.msk.bf16.vlgmr.msra.gmra.mrb[28].mxu1 %vm3655_vm5, %v4115_v6  ;;  %v4454_v4 = vpop.permute.xlu1 %4453  ;;  %v7279_v30 = vld [vmem:[#allocation13 + $0x44] ss:$16 sps:$4 sm:$0xff]   ;;  %v7327_v6 = vld [vmem:[#allocation13 + $0xc] ss:$16 sps:$4 sm:$0xff]  }
 0x596   : > { %6494 = vmatpush3.bf16.msra.mxu1 %v4236_v8  ;;  %6495 = vmatprep.mubr.msk.bf16.mxu1 %vm7841_vm0, %v7840_v32  ;;  %v4459_v21 = vsel %vm3672_vm2, %v4454_v4, 0  ;;  %v7328_v8 = vld [vmem:[#allocation13 + $0x240] ss:$16 sps:$4 sm:$0xff]  }
 0x597   : > { %6246 = vst.msk [vmem:[%s8479_s25 + $0x28] sm:$0xff] %vm3655_vm5, %v4225_v3  ;;  %6505 = vmatprep.subr.bf16.mxu1 %v7840_v32  ;;  %v4228_v2 = vpack.c.bf16 %v4225_v3, %v4225_v3  ;;  %5319 = vmatprep.subr.bf16.mxu0 %v7279_v30  ;;  %v7322_v3 = vld [vmem:[#allocation13 + $0x220] ss:$16 sps:$4 sm:$0xff]   ;;  %v7366_v30 = vld [vmem:[#allocation13 + $0x304] ss:$16 sps:$4 sm:$0xff]  }
 0x598   : > { %v7492_v11 = vpop.eup %7491 }
 0x599   : > { %v7494_v12 = vpop.eup %7493  ;;  %v4335_v14 = vmul.f32 %v7492_v11, %v8494_v33  ;;  %v7277_v33 = vld [vmem:[#allocation13 + $0x40] ss:$16 sps:$4 sm:$0xff]   ;;  %v7330_v11 = vld [vmem:[#allocation13 + $0x244] ss:$16 sps:$4 sm:$0xff]  }
 0x59a   : > { %v4448_v15 = vmul.f32 %v7494_v12, %v8498_v39  ;;  %5320 = vmatpush1.bf16.msra.mxu0 %v7277_v33  ;;  %v7285_v39 = vld [vmem:[#allocation13 + $0x84] ss:$16 sps:$4 sm:$0xff]   ;;  %v7370_v33 = vld [vmem:[#allocation13 + $0x320] ss:$16 sps:$4 sm:$0xff]  }
 0x59b   : > { %6249 = vst.msk [vmem:[%s8479_s25 + $0x30] sm:$0xff] %vm3655_vm5, %v4335_v14  ;;  %v4338_v34 = vpack.c.bf16 %v4335_v14, %v4335_v14 }
 0x59c   : > { %6252 = vst.msk [vmem:[%s8479_s25 + $0x38] sm:$0xff] %vm3655_vm5, %v4448_v15  ;;  %v4451_v22 = vpack.c.bf16 %v4448_v15, %v4448_v15 }
 0x59d   : > { %6496 = vmatmul.mubr.msk.bf16.vlgmr.msra.gmra.mrb[32].mxu1 %vm3655_vm5, %v4228_v2  ;;  %v7334_v2 = vld [vmem:[#allocation13 + $0x260] ss:$16 sps:$4 sm:$0xff]  }
 0x59e   : > { %6506 = vmatpush3.bf16.msra.mxu1 %v4343_v17  ;;  %6507 = vmatprep.mubr.msk.bf16.mxu1 %vm7841_vm0, %v7840_v32  ;;  %v7336_v17 = vld [vmem:[#allocation13 + $0x264] ss:$16 sps:$4 sm:$0xff]  }
 0x59f   : > { %6517 = vmatprep.subr.bf16.mxu1 %v7840_v32 }
 0x5a5   : > { %6508 = vmatmul.mubr.msk.bf16.vlgmr.msra.gmra.mrb[36].mxu1 %vm3655_vm5, %v4338_v34 }
 0x5a6   : > { %6518 = vmatpush3.bf16.msra.mxu1 %v4459_v21  ;;  %6519 = vmatprep.mubr.msk.bf16.mxu1 %vm7841_vm0, %v7840_v32  ;;  %v7282_v32 = vld [vmem:[#allocation13 + $0x64] ss:$16 sps:$4 sm:$0xff]   ;;  %v7340_v21 = vld [vmem:[#allocation13 + $0x280] ss:$16 sps:$4 sm:$0xff]  }
 0x5a7   : > { %5321 = vmatprep.subr.bf16.mxu0 %v7282_v32  ;;  %5356 = vmatprep.subr.bf16.mxu1 %v7321_v52  ;;  %v7372_v32 = vld [vmem:[#allocation13 + $0x324] ss:$16 sps:$4 sm:$0xff]  }
 0x5a8   : > { %5322 = vmatpush1.bf16.msra.mxu0 %v7280_v35  ;;  %v7376_v35 = vld [vmem:[#allocation13 + $0x340] ss:$16 sps:$4 sm:$0xff]  }
 0x5a9   : > { %5323 = vmatprep.subr.bf16.mxu0 %v7285_v39  ;;  %v7378_v39 = vld [vmem:[#allocation13 + $0x344] ss:$16 sps:$4 sm:$0xff]  }
 0x5ac   : > { %5324 = vmatpush1.bf16.msra.mxu0 %v7283_v63  ;;  %v7382_v63 = vld [vmem:[#allocation13 + $0x360] ss:$16 sps:$4 sm:$0xff]  }
 0x5ad   : > { %6520 = vmatmul.mubr.msk.bf16.vlgmr.msra.gmra.mrb[40].mxu1 %vm3655_vm5, %v4451_v22  ;;  %5325 = vmatprep.subr.bf16.mxu0 %v7288_v40  ;;  %v7342_v22 = vld [vmem:[#allocation13 + $0x284] ss:$16 sps:$4 sm:$0xff]  }
 0x5ae   : > { %5357 = vmatpush1.bf16.msra.mxu1 %v7319_v9  ;;  %v7384_v40 = vld [vmem:[#allocation13 + $0x364] ss:$16 sps:$4 sm:$0xff]  }
 0x5af   : > { %5358 = vmatprep.subr.bf16.mxu1 %v7324_v5 }
 0x5b0   : > { %5326 = vmatpush1.bf16.msra.mxu0 %v7286_v41 }
 0x5b1   : > { %5327 = vmatprep.subr.bf16.mxu0 %v7291_v43 }
 0x5b2   : > { %5359 = vmatpush1.bf16.msra.mxu1 %v7322_v3 }
 0x5b3   : > { %5360 = vmatprep.subr.bf16.mxu1 %v7330_v11  ;;  %v7333_v11 = vld [vmem:[#allocation13 + $0x2c] ss:$16 sps:$4 sm:$0xff]  }
 0x5b4   : > { %5328 = vmatpush1.bf16.msra.mxu0 %v7289_v31  ;;  %v7388_v31 = vld [vmem:[#allocation13 + $0x380] ss:$16 sps:$4 sm:$0xff]  }
 0x5b5   : > { %5329 = vmatprep.subr.bf16.mxu0 %v7294_v10  ;;  %v7390_v10 = vld [vmem:[#allocation13 + $0x384] ss:$16 sps:$4 sm:$0xff]  }
 0x5b6   : > { %5361 = vmatpush1.bf16.msra.mxu1 %v7328_v8  ;;  %v7325_v8 = vld [vmem:[#allocation13 + $0x8] ss:$16 sps:$4 sm:$0xff]  }
 0x5b7   : > { %5362 = vmatprep.subr.bf16.mxu1 %v7336_v17  ;;  %v7349_v17 = vld [vmem:[#allocation13 + $0x88] ss:$16 sps:$4 sm:$0xff]  }
 0x5b8   : > { %5330 = vmatpush1.bf16.msra.mxu0 %v7292_v44 }
 0x5b9   : > { %v8570_v24 = vpop.f32.mrb[12].mxu1  ;;  %5331 = vmatprep.subr.bf16.mxu0 %v7297_v13 }
 0x5ba   : > { %v6437_v37 = vpop.f32.mrb[13].mxu1  ;;  %5363 = vmatpush1.bf16.msra.mxu1 %v7334_v2  ;;  %v7343_v2 = vld [vmem:[#allocation13 + $0x68] ss:$16 sps:$4 sm:$0xff]  }
 0x5bb   : > { %v3713_v19 = vpop.f32.mrb[14].mxu1  ;;  %5364 = vmatprep.subr.bf16.mxu1 %v7342_v22  ;;  %v7346_v37 = vld [vmem:[#allocation13 + $0x2a0] ss:$16 sps:$4 sm:$0xff]   ;;  %v7361_v22 = vld [vmem:[#allocation13 + $0xc8] ss:$16 sps:$4 sm:$0xff]  }
 0x5bc   : > { %v6438_v25 = vpop.f32.mrb[15].mxu1  ;;  %5332 = vmatpush1.bf16.msra.mxu0 %v7295_v45  ;;  %v7348_v19 = vld [vmem:[#allocation13 + $0x2a4] ss:$16 sps:$4 sm:$0xff]   ;;  %v7394_v45 = vld [vmem:[#allocation13 + $0x3a0] ss:$16 sps:$4 sm:$0xff]  }
 0x5bd   : > { %5333 = vmatprep.subr.bf16.mxu0 %v7300_v16  ;;  %v7352_v25 = vld [vmem:[#allocation13 + $0x2c0] ss:$16 sps:$4 sm:$0xff]   ;;  %v7396_v16 = vld [vmem:[#allocation13 + $0x3a4] ss:$16 sps:$4 sm:$0xff]  }
 0x5be   : > { %5365 = vmatpush1.bf16.msra.mxu1 %v7340_v21  ;;  %v7363_v21 = vld [vmem:[#allocation13 + $0xcc] ss:$16 sps:$4 sm:$0xff]  }
 0x5bf   : > { %5366 = vmatprep.subr.bf16.mxu1 %v7348_v19  ;;  %v7367_v19 = vld [vmem:[#allocation13 + $0xe8] ss:$16 sps:$4 sm:$0xff]  }
 0x5c0   : > { %5334 = vmatpush1.bf16.msra.mxu0 %v7298_v46 }
 0x5c1   : > { %5335 = vmatprep.subr.bf16.mxu0 %v7303_v47 }
 0x5c2   : > { %5367 = vmatpush1.bf16.msra.mxu1 %v7346_v37  ;;  %v7369_v37 = vld [vmem:[#allocation13 + $0xec] ss:$16 sps:$4 sm:$0xff]  }
 0x5c3   : > { %5368 = vmatprep.subr.bf16.mxu1 %v7354_v26  ;;  %v7373_v26 = vld [vmem:[#allocation13 + $0x108] ss:$16 sps:$4 sm:$0xff]  }
 0x5c4   : > { %5336 = vmatpush1.bf16.msra.mxu0 %v7301_v23  ;;  %v7400_v23 = vld [vmem:[#allocation13 + $0x3c0] ss:$16 sps:$4 sm:$0xff]  }
 0x5c5   : > { %5337 = vmatprep.subr.bf16.mxu0 %v7306_v18  ;;  %v7402_v18 = vld [vmem:[#allocation13 + $0x3c4] ss:$16 sps:$4 sm:$0xff]  }
 0x5c6   : > { %5369 = vmatpush1.bf16.msra.mxu1 %v7352_v25  ;;  %v7375_v25 = vld [vmem:[#allocation13 + $0x10c] ss:$16 sps:$4 sm:$0xff]  }
 0x5c7   : > { %5370 = vmatprep.subr.bf16.mxu1 %v7360_v28  ;;  %v7379_v28 = vld [vmem:[#allocation13 + $0x128] ss:$16 sps:$4 sm:$0xff]  }
 0x5c8   : > { %5338 = vmatpush1.bf16.msra.mxu0 %v7304_v48 }
 0x5c9   : > { %5339 = vmatprep.subr.bf16.mxu0 %v7309_v49 }
 0x5ca   : > { %5371 = vmatpush1.bf16.msra.mxu1 %v7358_v27  ;;  %v7381_v27 = vld [vmem:[#allocation13 + $0x12c] ss:$16 sps:$4 sm:$0xff]  }
 0x5cb   : > { %5372 = vmatprep.subr.bf16.mxu1 %v7366_v30  ;;  %v7385_v30 = vld [vmem:[#allocation13 + $0x148] ss:$16 sps:$4 sm:$0xff]  }
 0x5cc   : > { %5340 = vmatpush1.bf16.msra.mxu0 %v7307_v50  ;;  %v7408_v50 = vld [vmem:[#allocation13 + $0x3e4] ss:$16 sps:$4 sm:$0xff]  }
 0x5cd   : > { %5341 = vmatprep.subr.bf16.mxu0 %v7312_v51  ;;  %v7406_v51 = vld [vmem:[#allocation13 + $0x3e0] ss:$16 sps:$4 sm:$0xff]  }
 0x5ce   : > { %5373 = vmatpush1.bf16.msra.mxu1 %v7364_v29  ;;  %v7387_v29 = vld [vmem:[#allocation13 + $0x14c] ss:$16 sps:$4 sm:$0xff]  }
 0x5cf   : > { %5374 = vmatprep.subr.bf16.mxu1 %v7372_v32  ;;  %v7391_v32 = vld [vmem:[#allocation13 + $0x168] ss:$16 sps:$4 sm:$0xff]  }
 0x5d0   : > { %5342 = vmatpush1.bf16.msra.mxu0 %v7310_v53 }
 0x5d1   : > { %5343 = vmatprep.subr.bf16.mxu0 %v7315_v54 }
 0x5d2   : > { %5375 = vmatpush1.bf16.msra.mxu1 %v7370_v33  ;;  %v7393_v33 = vld [vmem:[#allocation13 + $0x16c] ss:$16 sps:$4 sm:$0xff]  }
 0x5d3   : > { %5376 = vmatprep.subr.bf16.mxu1 %v7378_v39  ;;  %v7397_v39 = vld [vmem:[#allocation13 + $0x188] ss:$16 sps:$4 sm:$0xff]  }
 0x5d4   : > { %5344 = vmatpush1.bf16.msra.mxu0 %v7313_v57 }
 0x5d5   : > { %5345 = vmatprep.subr.bf16.mxu0 %v7318_v60 }
 0x5d6   : > { %5377 = vmatpush1.bf16.msra.mxu1 %v7376_v35  ;;  %v7399_v35 = vld [vmem:[#allocation13 + $0x18c] ss:$16 sps:$4 sm:$0xff]  }
 0x5d7   : > { %5378 = vmatprep.subr.bf16.mxu1 %v7384_v40  ;;  %v7403_v40 = vld [vmem:[#allocation13 + $0x1a8] ss:$16 sps:$4 sm:$0xff]  }
 0x5d8   : > { %5346 = vmatpush1.bf16.msra.mxu0 %v7316_v61 }
 0x5d9   : > { %5397 = vmatprep.subr.bf16.mxu0 %v7327_v6 }
 0x5da   : > { %5379 = vmatpush1.bf16.msra.mxu1 %v7382_v63  ;;  %v7405_v63 = vld [vmem:[#allocation13 + $0x1ac] ss:$16 sps:$4 sm:$0xff]  }
 0x5db   : > { %5380 = vmatprep.subr.bf16.mxu1 %v7390_v10  ;;  %v7409_v10 = vld [vmem:[#allocation13 + $0x1c8] ss:$16 sps:$4 sm:$0xff]  }
 0x5de   : > { %5381 = vmatpush1.bf16.msra.mxu1 %v7388_v31 }
 0x5df   : > { %5382 = vmatprep.subr.bf16.mxu1 %v7396_v16 }
 0x5e2   : > { %5383 = vmatpush1.bf16.msra.mxu1 %v7394_v45  ;;  %v7414_v45 = vld [vmem:[#allocation13 + $0x1ec] ss:$16 sps:$4 sm:$0xff]  }
 0x5e3   : > { %5384 = vmatprep.subr.bf16.mxu1 %v7402_v18  ;;  %v7412_v18 = vld [vmem:[#allocation13 + $0x1e8] ss:$16 sps:$4 sm:$0xff]  }
 0x5e6   : > { %5385 = vmatpush1.bf16.msra.mxu1 %v7400_v23 }
 0x5e7   : > { %5386 = vmatprep.subr.bf16.mxu1 %v7408_v50  ;;  %v7418_v50 = vld [vmem:[#allocation13 + $0x228] ss:$16 sps:$4 sm:$0xff]  }
 0x5ea   : > { %5387 = vmatpush1.bf16.msra.mxu1 %v7406_v51  ;;  %v7421_v51 = vld [vmem:[#allocation13 + $0x248] ss:$16 sps:$4 sm:$0xff]  }
 0x634   : > { %v3826_v55 = vpop.f32.mrb[16].mxu1 }
 0x635   : > { %v6449_v56 = vpop.f32.mrb[17].mxu1 }
 0x636   : > { %v3829_v58 = vpop.f32.mrb[18].mxu1  ;;  %v7417_v56 = vld [vmem:[#allocation13 + $0x20c] ss:$16 sps:$4 sm:$0xff]  }
 0x637   : > { %v6450_v20 = vpop.f32.mrb[19].mxu1  ;;  %5438 = vmatprep.subr.bf16.mxu1 %v7417_v56  ;;  %v7427_v56 = vld [vmem:[#allocation13 + $0x288] ss:$16 sps:$4 sm:$0xff]  }
 0x63c   : > { %v8572_v0 = vpop.f32.mrb[20].mxu1 }
 0x63d   : > { %v6461_v1 = vpop.f32.mrb[21].mxu1 }
 0x63e   : > { %v3936_v59 = vpop.f32.mrb[22].mxu1 }
 0x63f   : > { %v6462_v7 = vpop.f32.mrb[23].mxu1 }
 0x644   : > { %v4049_v12 = vpop.f32.mrb[24].mxu1 }
 0x645   : > { %v6685_v14 = vpack.i.bf16 %v3826_v55, %v4049_v12  ;;  %v6473_v15 = vpop.f32.mrb[25].mxu1  ;;  %v7331_v12 = vld [vmem:[#allocation13 + $0x28] ss:$16 sps:$4 sm:$0xff]  }
 0x646   : > { %v4052_v4 = vpop.f32.mrb[26].mxu1  ;;  %v7337_v15 = vld [vmem:[#allocation13 + $0x48] ss:$16 sps:$4 sm:$0xff]  }
 0x647   : > { %6686 = vrot.lane.b32.xlu1 %v6685_v14, %s7842_s4  ;;  %v6474_v34 = vpop.f32.mrb[27].mxu1  ;;  %v7339_v14 = vld [vmem:[#allocation13 + $0x4c] ss:$16 sps:$4 sm:$0xff]  }
 0x648   : > { %v7357_v4 = vld [vmem:[#allocation13 + $0xac] ss:$16 sps:$4 sm:$0xff]   ;;  %v7355_v34 = vld [vmem:[#allocation13 + $0xa8] ss:$16 sps:$4 sm:$0xff]  }
 0x668   : > { %v8575_v41 = vpop.f32.mrb[28].mxu1 }
 0x669   : > { %v6485_v43 = vpop.f32.mrb[29].mxu1 }
 0x66a   : > { %v4159_v44 = vpop.f32.mrb[30].mxu1  ;;  %v7411_v43 = vld [vmem:[#allocation13 + $0x1cc] ss:$16 sps:$4 sm:$0xff]  }
 0x66b   : > { %v6486_v13 = vpop.f32.mrb[31].mxu1 }
 0x670   : > { %v4272_v46 = vpop.f32.mrb[32].mxu1 }
 0x671   : > { %v6497_v47 = vpop.f32.mrb[33].mxu1 }
 0x672   : > { %v4275_v48 = vpop.f32.mrb[34].mxu1 }
 0x673   : > { %v6498_v49 = vpop.f32.mrb[35].mxu1  ;;  %v7415_v48 = vld [vmem:[#allocation13 + $0x208] ss:$16 sps:$4 sm:$0xff]  }
 0x674   : > { %v7420_v49 = vld [vmem:[#allocation13 + $0x22c] ss:$16 sps:$4 sm:$0xff]  }
 0x678   : > { %v8577_v53 = vpop.f32.mrb[36].mxu1 }
 0x679   : > { %v6509_v54 = vpop.f32.mrb[37].mxu1 }
 0x67a   : > { %v4382_v55 = vpop.f32.mrb[38].mxu1  ;;  %v7424_v54 = vld [vmem:[#allocation13 + $0x268] ss:$16 sps:$4 sm:$0xff]  }
 0x67b   : > { %v6510_v57 = vpop.f32.mrb[39].mxu1  ;;  %v7429_v55 = vld [vmem:[#allocation13 + $0x28c] ss:$16 sps:$4 sm:$0xff]  }
 0x67c   : > { %v7432_v57 = vld [vmem:[#allocation13 + $0x2ac] ss:$16 sps:$4 sm:$0xff]  }
 0x680   : > { %v4495_v58 = vpop.f32.mrb[40].mxu1 }
 0x681   : > { %v6690_v20 = vpack.i.bf16 %v4272_v46, %v4495_v58  ;;  %v6521_v60 = vpop.f32.mrb[41].mxu1  ;;  %v7430_v58 = vld [vmem:[#allocation13 + $0x2a8] ss:$16 sps:$4 sm:$0xff]  }
 0x682   : > { %v4498_v52 = vpop.f32.mrb[42].mxu1  ;;  %v7433_v60 = vld [vmem:[#allocation13 + $0x2c8] ss:$16 sps:$4 sm:$0xff]  }
 0x683   : > { %6691 = vrot.lane.b32.xlu1 %v6690_v20, %s7842_s4  ;;  %v6522_v61 = vpop.f32.mrb[43].mxu1  ;;  %v7435_v20 = vld [vmem:[#allocation13 + $0x2cc] ss:$16 sps:$4 sm:$0xff]   ;;  %s8803_s4 = sld [smem:[#allocation40_spill]] }
 0x684   : > { %v7438_v52 = vld [vmem:[#allocation13 + $0x2ec] ss:$16 sps:$4 sm:$0xff]   ;;  %v7436_v61 = vld [vmem:[#allocation13 + $0x2e8] ss:$16 sps:$4 sm:$0xff]  }
 0x6b9   : > { %v6687_v9 = vpop.permute.xlu1 %6686 }
 0x6ba   : > { %v6689_v1 = vunpack.i.h.bf16 %v6687_v9  ;;  %v6688_v59 = vunpack.i.l.bf16 %v6687_v9  ;;  %v7441_v9 = vld [vmem:[#allocation13 + $0x30c] ss:$16 sps:$4 sm:$0xff]  }
 0x6bc   : > { %v4517_v5 = vsel %vm3604_vm1, %v8570_v24, %v6689_v1  ;;  %v4518_v6 = vsel %vm3604_vm1, %v8572_v0, %v6688_v59  ;;  %v7345_v24 = vld [vmem:[#allocation13 + $0x6c] ss:$16 sps:$4 sm:$0xff]   ;;  %v7439_v1 = vld [vmem:[#allocation13 + $0x308] ss:$16 sps:$4 sm:$0xff]  }
 0x6bd   : > { %v8584_v7 = vpack.c.bf16 %v4517_v5, %v4517_v5  ;;  %v4522_v3 = vpack.c.bf16 %v4518_v6, %v4518_v6  ;;  %v7351_v0 = vld [vmem:[#allocation13 + $0x8c] ss:$16 sps:$4 sm:$0xff]   ;;  %v7442_v5 = vld [vmem:[#allocation13 + $0x328] ss:$16 sps:$4 sm:$0xff]  }
 0x6be   : > { %v7444_v59 = vld [vmem:[#allocation13 + $0x32c] ss:$16 sps:$4 sm:$0xff]  }
 0x6bf   : > { %5347 = vmatprep.mubr.bf16.mxu0 %v4522_v3  ;;  %v7447_v6 = vld [vmem:[#allocation13 + $0x34c] ss:$16 sps:$4 sm:$0xff]  }
 0x6c0   : > { %5348 = vmatmul.mubr.bf16.vlgmr.msra.gmra.mrb[44].mxu0 %v8584_v7 }
 0x6c1   : > { %5398 = vmatpush1.bf16.msra.mxu0 %v7325_v8  ;;  %5429 = vmatprep.mubr.bf16.mxu0 %v4522_v3  ;;  %v7450_v3 = vld [vmem:[#allocation13 + $0x36c] ss:$16 sps:$4 sm:$0xff]   ;;  %v7448_v8 = vld [vmem:[#allocation13 + $0x368] ss:$16 sps:$4 sm:$0xff]  }
 0x6c2   : > { %5399 = vmatprep.subr.bf16.mxu0 %v7333_v11  ;;  %v7453_v11 = vld [vmem:[#allocation13 + $0x38c] ss:$16 sps:$4 sm:$0xff]  }
 0x6c5   : > { %5400 = vmatpush1.bf16.msra.mxu0 %v7331_v12  ;;  %v7451_v12 = vld [vmem:[#allocation13 + $0x388] ss:$16 sps:$4 sm:$0xff]  }
 0x6c6   : > { %5401 = vmatprep.subr.bf16.mxu0 %v7339_v14  ;;  %v7456_v14 = vld [vmem:[#allocation13 + $0x3ac] ss:$16 sps:$4 sm:$0xff]  }
 0x6c9   : > { %5402 = vmatpush1.bf16.msra.mxu0 %v7337_v15  ;;  %v7454_v15 = vld [vmem:[#allocation13 + $0x3a8] ss:$16 sps:$4 sm:$0xff]  }
 0x6ca   : > { %5403 = vmatprep.subr.bf16.mxu0 %v7345_v24  ;;  %v7459_v24 = vld [vmem:[#allocation13 + $0x3cc] ss:$16 sps:$4 sm:$0xff]  }
 0x6cd   : > { %5404 = vmatpush1.bf16.msra.mxu0 %v7343_v2  ;;  %v7457_v2 = vld [vmem:[#allocation13 + $0x3c8] ss:$16 sps:$4 sm:$0xff]  }
 0x6ce   : > { %5405 = vmatprep.subr.bf16.mxu0 %v7351_v0  ;;  %v7462_v0 = vld [vmem:[#allocation13 + $0x3ec] ss:$16 sps:$4 sm:$0xff]  }
 0x6d1   : > { %5406 = vmatpush1.bf16.msra.mxu0 %v7349_v17  ;;  %v7460_v17 = vld [vmem:[#allocation13 + $0x3e8] ss:$16 sps:$4 sm:$0xff]  }
 0x6d2   : > { %5407 = vmatprep.subr.bf16.mxu0 %v7357_v4 }
 0x6d5   : > { %5408 = vmatpush1.bf16.msra.mxu0 %v7355_v34 }
 0x6d6   : > { %5409 = vmatprep.subr.bf16.mxu0 %v7363_v21 }
 0x6d9   : > { %5410 = vmatpush1.bf16.msra.mxu0 %v7361_v22 }
 0x6da   : > { %5411 = vmatprep.subr.bf16.mxu0 %v7369_v37  ;;  %v4653_v37 = vld [vmem:[%s8801_s23] sm:$0xf] }
 0x6dd   : > { %5412 = vmatpush1.bf16.msra.mxu0 %v7367_v19  ;;  %v4658_v19 = vrot.slane %v4653_v37, %v8297_v36 }
 0x6de   : > { %5413 = vmatprep.subr.bf16.mxu0 %v7375_v25  ;;  %v4662_v25 = vrot.slane %v4653_v37, %v8302_v38 }
 0x6e1   : > { %5414 = vmatpush1.bf16.msra.mxu0 %v7373_v26 }
 0x6e2   : > { %5415 = vmatprep.subr.bf16.mxu0 %v7381_v27 }
 0x6e5   : > { %5416 = vmatpush1.bf16.msra.mxu0 %v7379_v28 }
 0x6e6   : > { %5417 = vmatprep.subr.bf16.mxu0 %v7387_v29 }
 0x6e9   : > { %5418 = vmatpush1.bf16.msra.mxu0 %v7385_v30 }
 0x6ea   : > { %5419 = vmatprep.subr.bf16.mxu0 %v7393_v33 }
 0x6ed   : > { %5420 = vmatpush1.bf16.msra.mxu0 %v7391_v32 }
 0x6ee   : > { %5421 = vmatprep.subr.bf16.mxu0 %v7399_v35 }
 0x6f1   : > { %5422 = vmatpush1.bf16.msra.mxu0 %v7397_v39 }
 0x6f2   : > { %5423 = vmatprep.subr.bf16.mxu0 %v7405_v63 }
 0x6f5   : > { %5424 = vmatpush1.bf16.msra.mxu0 %v7403_v40  ;;  %v6692_v31 = vpop.permute.xlu1 %6691 }
 0x6f6   : > { %v6694_v44 = vunpack.i.h.bf16 %v6692_v31  ;;  %v6693_v13 = vunpack.i.l.bf16 %v6692_v31  ;;  %5425 = vmatprep.subr.bf16.mxu0 %v7411_v43  ;;  %v4666_v31 = vrot.slane %v4653_v37, %v8307_v42 }
 0x6f8   : > { %v4519_v16 = vsel %vm3604_vm1, %v8575_v41, %v6694_v44  ;;  %v4520_v46 = vsel %vm3604_vm1, %v8577_v53, %v6693_v13  ;;  %v7423_v41 = vld [vmem:[#allocation13 + $0x24c] ss:$16 sps:$4 sm:$0xff]   ;;  %v7497_v44 = vld [vmem:[%s8237_s28] sm:$0xff] }
 0x6f9   : > { %v8591_v47 = vpack.c.bf16 %v4519_v16, %v4519_v16  ;;  %5426 = vmatpush1.bf16.msra.mxu0 %v7409_v10  ;;  %v4524_v23 = vpack.c.bf16 %v4520_v46, %v4520_v46  ;;  %v7426_v53 = vld [vmem:[#allocation13 + $0x26c] ss:$16 sps:$4 sm:$0xff]   ;;  %v4670_v10 = vrot.slane %v4653_v37, %v8314_v62 }
 0x6fa   : > { %5427 = vmatprep.subr.bf16.mxu0 %v7414_v45  ;;  %v7498_v45 = vld [vmem:[%s8237_s28 + $0x8] sm:$0xff] }
 0x6fb   : > { %5388 = vmatprep.mubr.bf16.mxu1 %v4524_v23 }
 0x6fc   : > { %5389 = vmatmul.mubr.bf16.vlgmr.msra.gmra.mrb[44].mxu1 %v8591_v47 }
 0x6fd   : > { %5428 = vmatpush1.bf16.msra.mxu0 %v7412_v18  ;;  %5439 = vmatpush1.bf16.msra.mxu1 %v7415_v48 }
 0x6fe   : > { %5470 = vmatprep.mubr.bf16.mxu1 %v4524_v23  ;;  %5440 = vmatprep.subr.bf16.mxu1 %v7420_v49 }
 0x700   : > { %5430 = vmatmul.mubr.bf16.vlgmr.msra.gmra.mrb[48].mxu0 %v8584_v7  ;;  %v7445_v7 = vld [vmem:[#allocation13 + $0x348] ss:$16 sps:$4 sm:$0xff]  }
 0x701   : > { %5441 = vmatpush1.bf16.msra.mxu1 %v7418_v50 }
 0x702   : > { %5442 = vmatprep.subr.bf16.mxu1 %v7423_v41 }
 0x705   : > { %5443 = vmatpush1.bf16.msra.mxu1 %v7421_v51  ;;  %v7499_v51 = vld [vmem:[%s8237_s28 + $0x10] sm:$0xff] }
 0x706   : > { %5444 = vmatprep.subr.bf16.mxu1 %v7426_v53 }
 0x709   : > { %5445 = vmatpush1.bf16.msra.mxu1 %v7424_v54 }
 0x70a   : > { %5446 = vmatprep.subr.bf16.mxu1 %v7429_v55  ;;  %v7500_v55 = vld [vmem:[%s8237_s28 + $0x18] sm:$0xff]  ;;  %s6394_s28 = sshll.u32 %s8797_s13, 10 }
 0x70b   : > { %s8612_s27 = scalar_lea.hbm %s8803_s4, %s6394_s28 }
 0x70d   : > { %5447 = vmatpush1.bf16.msra.mxu1 %v7427_v56 }
 0x70e   : > { %5448 = vmatprep.subr.bf16.mxu1 %v7432_v57 }
 0x711   : > { %5449 = vmatpush1.bf16.msra.mxu1 %v7430_v58 }
 0x712   : > { %5450 = vmatprep.subr.bf16.mxu1 %v7435_v20 }
 0x715   : > { %5451 = vmatpush1.bf16.msra.mxu1 %v7433_v60 }
 0x716   : > { %5452 = vmatprep.subr.bf16.mxu1 %v7438_v52 }
 0x719   : > { %5453 = vmatpush1.bf16.msra.mxu1 %v7436_v61 }
 0x71a   : > { %5454 = vmatprep.subr.bf16.mxu1 %v7441_v9 }
 0x71d   : > { %5455 = vmatpush1.bf16.msra.mxu1 %v7439_v1 }
 0x71e   : > { %5456 = vmatprep.subr.bf16.mxu1 %v7444_v59 }
 0x721   : > { %5457 = vmatpush1.bf16.msra.mxu1 %v7442_v5 }
 0x722   : > { %5458 = vmatprep.subr.bf16.mxu1 %v7447_v6 }
 0x725   : > { %5459 = vmatpush1.bf16.msra.mxu1 %v7445_v7 }
 0x726   : > { %5460 = vmatprep.subr.bf16.mxu1 %v7450_v3 }
 0x729   : > { %5461 = vmatpush1.bf16.msra.mxu1 %v7448_v8 }
 0x72a   : > { %5462 = vmatprep.subr.bf16.mxu1 %v7453_v11 }
 0x72d   : > { %5463 = vmatpush1.bf16.msra.mxu1 %v7451_v12 }
 0x72e   : > { %5464 = vmatprep.subr.bf16.mxu1 %v7456_v14 }
 0x731   : > { %5465 = vmatpush1.bf16.msra.mxu1 %v7454_v15 }
 0x732   : > { %5466 = vmatprep.subr.bf16.mxu1 %v7459_v24 }
 0x735   : > { %5467 = vmatpush1.bf16.msra.mxu1 %v7457_v2 }
 0x736   : > { %5468 = vmatprep.subr.bf16.mxu1 %v7462_v0 }
 0x739   : > { %5469 = vmatpush1.bf16.msra.mxu1 %v7460_v17 }
 0x73c   : > { %5471 = vmatmul.mubr.bf16.vlgmr.msra.gmra.mrb[48].mxu1 %v8591_v47 }
 0x793   : > { %v5349_v4 = vpop.f32.mrb[44].mxu0 }
 0x794   : > { %v5351_v34 = vpop.f32.mrb[45].mxu0  ;;  %v5350_v26 = vadd.f32 %v5349_v4, %v4658_v19 }
 0x795   : > { %v5353_v21 = vpop.f32.mrb[46].mxu0  ;;  %v5352_v27 = vadd.f32 %v5351_v34, %v4662_v25 }
 0x796   : > { %v5354_v22 = vpop.f32.mrb[47].mxu0 }
 0x7cf   : > { %v5390_v28 = vpop.f32.mrb[44].mxu1 }
 0x7d0   : > { %v5391_v29 = vadd.f32 %v5390_v28, %v5350_v26  ;;  %v5392_v30 = vpop.f32.mrb[45].mxu1 }
 0x7d1   : > { %v5393_v33 = vadd.f32 %v5392_v30, %v5352_v27  ;;  %v5394_v32 = vpop.f32.mrb[46].mxu1 }
 0x7d2   : > { %v5395_v35 = vpop.f32.mrb[47].mxu1  ;;  %v5479_v13 = vadd.f32 %v7497_v44, %v5391_v29 }
 0x7d3   : > { %v5431_v39 = vpop.f32.mrb[48].mxu0  ;;  %v5480_v16 = vadd.f32 %v7498_v45, %v5393_v33 }
 0x7d4   : > { %v5433_v63 = vpop.f32.mrb[49].mxu0  ;;  %v5432_v46 = vadd.f32 %v5431_v39, %v4666_v31 }
 0x7d5   : > { %v5435_v40 = vpop.f32.mrb[50].mxu0  ;;  %v5434_v47 = vadd.f32 %v5433_v63, %v4670_v10  ;;  %v5483_v41 = vadd.f32 %v5480_v16, %v5479_v13 }
 0x7d6   : > { %v5436_v43 = vpop.f32.mrb[51].mxu0 }
 0x80f   : > { %v5472_v23 = vpop.f32.mrb[48].mxu1 }
 0x810   : > { %v5473_v18 = vadd.f32 %v5472_v23, %v5432_v46  ;;  %v5474_v48 = vpop.f32.mrb[49].mxu1 }
 0x811   : > { %v5475_v49 = vadd.f32 %v5474_v48, %v5434_v47  ;;  %v5476_v50 = vpop.f32.mrb[50].mxu1 }
 0x812   : > { %v5481_v53 = vadd.f32 %v7499_v51, %v5473_v18  ;;  %v5477_v54 = vpop.f32.mrb[51].mxu1 }
 0x813   : > { %v5482_v56 = vadd.f32 %v7500_v55, %v5475_v49 }
 0x814   : > { %v5484_v57 = vadd.f32 %v5483_v41, %v5481_v53 }
 0x816   : > { %v5485_v58 = vadd.f32 %v5484_v57, %v5482_v56 }
 0x818   : > { %5486 = vadd.xlane.f32.xlu1 %v5485_v58 }
 0x8a5   : > { %v5487_v20 = vpop.xlane.xlu1 %5486 }
 0x8a6   : > { %v5489_v60 = vmul.f32 0.001953125, %v5487_v20 }
 0x8a8   : > { %v5490_v52 = vsub.f32 %v5479_v13, %v5489_v60  ;;  %v5491_v61 = vsub.f32 %v5480_v16, %v5489_v60  ;;  %v5492_v9 = vsub.f32 %v5481_v53, %v5489_v60  ;;  %v5493_v1 = vsub.f32 %v5482_v56, %v5489_v60 }
 0x8aa   : > { %v5494_v59 = vmul.f32 %v5490_v52, %v5490_v52  ;;  %v5495_v5 = vmul.f32 %v5491_v61, %v5491_v61  ;;  %v5496_v6 = vmul.f32 %v5492_v9, %v5492_v9  ;;  %v5497_v3 = vmul.f32 %v5493_v1, %v5493_v1 }
 0x8ac   : > { %v5498_v7 = vadd.f32 %v5495_v5, %v5494_v59 }
 0x8ae   : > { %v5499_v8 = vadd.f32 %v5498_v7, %v5496_v6 }
 0x8b0   : > { %v5500_v11 = vadd.f32 %v5499_v8, %v5497_v3 }
 0x8b2   : > { %5501 = vadd.xlane.f32.xlu0 %v5500_v11 }
 0x8b3   : > { %7716 = shalt.err (!%p7713_p5)
}
 0x8b4   : > { %s7717_s8 = scalar_lea.hbm %s8612_s27, 1024  ;;  %s7721_s21 = scalar_lea.hbm %s8803_s4, 2048 }
 0x8b5   : > { %p7718_p3 = scmp.ne.s32.totalorder %s8612_s27, %s7717_s8  ;;  %p7722_p4 = scmp.lt.u32.totalorder %s8612_s27, %s8803_s4 }
 0x8b6   : > { %p7723_p10 = scmp.lt.u32.totalorder %s7721_s21, %s7717_s8  ;;  %p7725_p2 = scmp.lt.u32.totalorder %s7717_s8, %s8612_s27 }
 0x8b7   : > { %p7719_p6 = pnand %p7718_p3, %p8804_p1 }
 0x8b8   : > { %p7724_p13 = por %p7723_p10, %p7722_p4 }
 0x8b9   : > { %p7720_p0 = pneg %p7719_p6 }
 0x8ba   : > { %p7726_p12 = por %p7725_p2, %p7724_p13 }
 0x8bc   : > { %p7727_p8 = pnand %p7726_p12, %p7720_p0 }
 0x8be   : > { %7730 = shalt.err (!%p7727_p8)
}
 0x8bf   : > { %s7845_s17 = smov 128   ;;  %s7846_s23 = smov 8  }
 0x8c0   : > { %6582 = dma.vmem_to_hbm [thread:$0]  (%p8804_p1), %s8614_s26, 1024, %s8612_s27, %s5572_s3, %s7845_s17, %s7845_s17, %s7846_s23  }
 0x8c1   : > { %s8805_s11 = sld [smem:[#allocation37_spill]]  ;;  %s8806_s12 = sld [smem:[#allocation38_spill]] }
 0x8c2   : > { %s6393_s26 = sshll.u32 %s8797_s13, 9  ;;  %s686_s27 = scalar_lea.vmem [#allocation14], %s8233_s9 }
 0x8c3   : > { %s5588_s3 = sshll.u32 %s686_s27, 4  ;;  %s8807_s14 = sld [smem:[#allocation39_spill]]  ;;  %s8661_s3 = int_to_ptr.vmem [resolvable:$true] %s5588_s3 }
 0x8c4   : > { %s5567_s9 = scalar_lea.sflag [#allocation4], %s8230_s22  ;;  %s7731_s13 = scalar_lea.vmem %s8661_s3, 512 }
 0x8c5   : > { %p7732_p9 = scmp.ne.s32.totalorder %s8661_s3, %s7731_s13  ;;  %s7847_s21 = smov [#allocation14]  }
 0x8c6   : > { %s7735_s25 = sshll.u32 %s7847_s21, 4  ;;  %s7736_s25 = int_to_ptr.vmem [resolvable:$false] %s7735_s25 }
 0x8c7   : > { %v5510_v24 = vld [vmem:[%s8805_s11] sm:$0xf]  ;;  %p7733_p7 = pnand %p7732_p9, %p8804_p1  ;;  %s7737_s16 = scalar_lea.vmem %s7736_s25, 1024 }
 0x8c8   : > { %v5536_v2 = vld [vmem:[%s8806_s12] sm:$0xf]  ;;  %v5515_v0 = vrot.slane %v5510_v24, %v8297_v36  ;;  %v5519_v17 = vrot.slane %v5510_v24, %v8302_v38  ;;  %v5523_v4 = vrot.slane %v5510_v24, %v8307_v42  ;;  %v5527_v34 = vrot.slane %v5510_v24, %v8314_v62  ;;  %p7738_p5 = scmp.lt.s32.totalorder %s8661_s3, %s7736_s25  ;;  %p7739_p3 = scmp.lt.s32.totalorder %s7737_s16, %s7731_s13 }
 0x8c9   : > { %v5541_v22 = vrot.slane %v5536_v2, %v8297_v36  ;;  %v5545_v37 = vrot.slane %v5536_v2, %v8302_v38  ;;  %v5549_v19 = vrot.slane %v5536_v2, %v8307_v42  ;;  %v5553_v25 = vrot.slane %v5536_v2, %v8314_v62  ;;  %s8659_s1 = scalar_lea.hbm %s8807_s14, %s6393_s26  ;;  %p7734_p11 = pneg %p7733_p7 }
 0x8ca   : > { %p7740_p6 = por %p7739_p3, %p7738_p5 }
 0x8cc   : > { %p7741_p0 = pnand %p7740_p6, %p7734_p11 }
 0x93f   : > { %v5502_v12 = vpop.xlane.xlu0 %5501 }
 0x940   : > { %v5503_v14 = vmul.f32 0.001953125, %v5502_v12 }
 0x942   : > { %v5504_v15 = vadd.f32 1e-05, %v5503_v14 }
 0x944   : > { %7495 = vrsqrt.f32 %v5504_v15 }
 0x94e   : > { %v7496_v21 = vpop.eup %7495 }
 0x94f   : > { %v5506_v26 = vmul.f32 %v7496_v21, %v5490_v52  ;;  %v5507_v27 = vmul.f32 %v7496_v21, %v5491_v61  ;;  %v5508_v28 = vmul.f32 %v7496_v21, %v5492_v9  ;;  %v5509_v29 = vmul.f32 %v7496_v21, %v5493_v1 }
 0x951   : > { %v5532_v30 = vmul.f32 %v5515_v0, %v5506_v26  ;;  %v5533_v33 = vmul.f32 %v5519_v17, %v5507_v27  ;;  %v5534_v32 = vmul.f32 %v5523_v4, %v5508_v28  ;;  %v5535_v35 = vmul.f32 %v5527_v34, %v5509_v29 }
 0x953   : > { %v5558_v36 = vadd.f32 %v5541_v22, %v5532_v30  ;;  %v5559_v39 = vadd.f32 %v5545_v37, %v5533_v33  ;;  %v5560_v38 = vadd.f32 %v5549_v19, %v5534_v32  ;;  %v5561_v63 = vadd.f32 %v5553_v25, %v5535_v35 }
 0x955   : > { %5562 = vst [vmem:[%s686_s27] sm:$0xff] %v5558_v36  ;;  %5563 = vst [vmem:[%s686_s27 + $0x8] sm:$0xff] %v5559_v39 }
 0x956   : > { %5564 = vst [vmem:[%s686_s27 + $0x10] sm:$0xff] %v5560_v38  ;;  %5565 = vst [vmem:[%s686_s27 + $0x18] sm:$0xff] %v5561_v63 }
 0x957   : > { %7744 = shalt.err (!%p7741_p0)
}
 0x958   : > { %s7745_s22 = scalar_lea.hbm %s8659_s1, 512  ;;  %s7749_s28 = scalar_lea.hbm %s8807_s14, 1024 }
 0x959   : > { %p7746_p4 = scmp.ne.s32.totalorder %s8659_s1, %s7745_s22  ;;  %p7750_p2 = scmp.lt.u32.totalorder %s8659_s1, %s8807_s14 }
 0x95a   : > { %p7751_p12 = scmp.lt.u32.totalorder %s7749_s28, %s7745_s22  ;;  %p7753_p9 = scmp.lt.u32.totalorder %s7745_s22, %s8659_s1 }
 0x95b   : > { %p7747_p10 = pnand %p7746_p4, %p8804_p1 }
 0x95c   : > { %p7752_p8 = por %p7751_p12, %p7750_p2 }
 0x95d   : > { %p7748_p13 = pneg %p7747_p10 }
 0x95e   : > { %p7754_p7 = por %p7753_p9, %p7752_p8 }
 0x960   : > { %p7755_p11 = pnand %p7754_p7, %p7748_p13 }
 0x962   : > { %7758 = shalt.err (!%p7755_p11)
}
 0x963   : > { %6581 = dma.vmem_to_hbm [thread:$0]  (%p8804_p1), %s8661_s3, 512, %s8659_s1, %s5567_s9  }
 0x964 PF: > { %s8808_s18 = sld [smem:[#allocation23_spill]]  ;;  %s8809_s29 = sld [smem:[#allocation30_spill]] }
 0x965   : > { %s8810_s12 = sld [smem:[#allocation26_spill]] }
 0x96a   : > { %s5617_s26 = sand.u32 1, %s8808_s18   ;;  %p8811_p5 = scmp.ne.s32.totalorder %s8809_s29, 0 }
 0x96b   : > { %p8812_p3 = scmp.ge.s32.totalorder %s8810_s12, 2  ;;  %s5618_s27 = scalar_lea.sflag [#allocation4], %s5617_s26 }
 0x96d   : > { %p6609_p6 = pnand %p8812_p3, %p8811_p5 }
 0x96f   : > { %7800 = dma.done.wait (!%p6609_p6), %s5618_s27, 512  }
 0x970   : > { %7802 = vsyncadd (!%p6609_p6), %s5618_s27, 4294966784  ;;  %s5627_s30 = scalar_lea.sflag [#allocation16], %s5617_s26 }
 0x971   : > { %7804 = dma.done.wait (!%p6609_p6), %s5627_s30, 1024  }
 0x972   : > { %7806 = vsyncadd (!%p6609_p6), %s5627_s30, 4294966272  ;;  %s40_s23 = sadd.s32 1, %s8810_s12   ;;  %s8813_s24 = sld [smem:[#allocation29_spill]] }
 0x973   : > { %p37_p0 = scmp.ge.s32.totalorder %s40_s23, 4   ;;  %s8814_s21 = sld [smem:[#allocation25_spill]] }
 0x974   : > { %s8815_s22 = sld [smem:[#allocation27_spill]]  ;;  %s8816_s18 = smov %s7813_s19 }
 0x975   : > { %s8817_s19 = smov %s7817_s20  ;;  %39 = sbr.rel (!%p37_p0) target bundleno = 23 (0x17), region = 188 }
 0x978   : > { %s8818_s20 = smov %s8813_s24 }
 0x97c   :  { %5632 = vsyncpa [#allocation3], 1 }
 0x97d   :  { %5634 = vsyncpa [#allocation3 + $0x1], 1 }
 0x97e   :  { %5635 = vsyncpa [#allocation6], 1 }
 0x97f   :  { %5637 = vsyncpa [#allocation6 + $0x1], 1 }
 0x980   :  { %5638 = vsyncpa [#allocation9], 1 }
 0x981   :  { %5639 = vsyncpa [#allocation12], 1 }
 0x982   :  { %5640 = vsyncpa [#allocation4], 1 }
 0x983   :  { %5642 = vsyncpa [#allocation4 + $0x1], 1 }
 0x984   :  { %5643 = vsyncpa [#allocation16], 1 }
 0x985   :  { %5645 = vsyncpa [#allocation16 + $0x1], 1 }

</bundles_post_ra>
